<compile_context>
chip_gen: v7x
topology: tpu7x:2x2x1
jax: 0.10.0
libtpu: 0.0.40
codegen_flags: <defaults>
</compile_context>

<pallas_src>
import numpy as np
import jax
import jax.numpy as jnp
from jax import lax
from jax.experimental import pallas as pl
from jax.experimental.pallas import tpu as pltpu

# sym7 decomposition low-pass filter (pywt.Wavelet('sym7').dec_lo), hardcoded
# so no pywt dependency is needed.
SYM7_DEC_LO = np.array([
    0.002681814568257878,
    -0.0010473848886829163,
    -0.01263630340325193,
    0.03051551316596357,
    0.0678926935013727,
    -0.049552834937127255,
    0.017441255086855827,
    0.5361019170917628,
    0.767764317003164,
    0.2886296317515146,
    -0.14004724044296152,
    -0.10780823770381774,
    0.004010244871533663,
    0.010268176708511255,
], dtype=np.float64)
_L = SYM7_DEC_LO.shape[0]
# QMF relation used by PyWavelets: dec_hi[k] = (-1)^(k+1) * dec_lo[L-1-k]
SYM7_DEC_HI = np.array(
    [((-1.0) ** (k + 1)) * SYM7_DEC_LO[_L - 1 - k] for k in range(_L)],
    dtype=np.float64)


def _analysis_matrix(n_pad, n_out, h0, h1):
    """float64 (n_pad, 2*n_out) matrix of the stride-2 analysis filter bank.

    pytorch_wavelets' prep_filt_afb1d reverses the dec filters and then uses
    F.conv2d (cross-correlation): out_lo[o] = sum_k h0[::-1][k] * xpad[2o+k].
    Columns [0:n_out] are low-pass outputs, [n_out:2*n_out] high-pass.
    """
    h0r = np.asarray(h0, dtype=np.float64)[::-1]
    h1r = np.asarray(h1, dtype=np.float64)[::-1]
    L = h0r.shape[0]
    A = np.zeros((n_pad, 2 * n_out), dtype=np.float64)
    for o in range(n_out):
        for k in range(L):
            A[2 * o + k, o] += h0r[k]
            A[2 * o + k, n_out + o] += h1r[k]
    return A


def _reflect_index(n, pad_lo, pad_hi):
    """Source indices of np/torch 'reflect' padding (no edge repetition)."""
    idx = np.arange(-pad_lo, n + pad_hi)
    if n == 1:
        return np.zeros_like(idx)
    period = 2 * (n - 1)
    m = np.mod(idx, period)
    return np.where(m >= n, period - m, m)


def _folded_analysis_matrix(n, align):
    """(n, 2*n_pad_out) fp32 matrix: reflect padding folded into the banded
    stride-2 analysis bank, embedded in a tile-aligned layout.

    Low-pass outputs occupy columns [0, n_out); high-pass outputs occupy
    [n_pad_out, n_pad_out + n_out) where n_pad_out = round_up(n_out, align),
    so the lo/hi split point is lane (align=128) / sublane (align=8) aligned.
    """
    L = _L
    n_out = (n + L - 1) // 2                       # pywt.dwt_coeff_len, non-per modes
    n_pad_out = ((n_out + align - 1) // align) * align
    pad = 2 * (n_out - 1) - n + L
    pad_lo, pad_hi = pad // 2, (pad + 1) // 2
    A = _analysis_matrix(n + pad, n_out, SYM7_DEC_LO, SYM7_DEC_HI)   # (n+pad, 2*n_out)
    idx = _reflect_index(n, pad_lo, pad_hi)                          # (n+pad,)
    Af = np.zeros((n, 2 * n_out), dtype=np.float64)
    np.add.at(Af, idx, A)                          # fold reflection rows together
    out = np.zeros((n, 2 * n_pad_out), dtype=np.float64)
    out[:, :n_out] = Af[:, :n_out]
    out[:, n_pad_out:n_pad_out + n_out] = Af[:, n_out:]
    return out.astype(np.float32), n_out, n_pad_out


def _dwt_kernel(x_ref, acolT_ref, arow_ref, yl_ref, yh_ref, t1_ref):
    B, _, W = x_ref.shape
    Hout, Wout = yl_ref.shape[1], yl_ref.shape[2]
    P = acolT_ref.shape[0]                # 2 * Hpad (multiple of 16)
    Q = arow_ref.shape[1]                 # 2 * Wpad (multiple of 256)
    Hpad, Wpad = P // 2, Q // 2

    # ---- height (column) pass: per-image (P,H) @ (H,W) rank-2 matmuls; the
    #      filter is read from its single VMEM block (no per-image broadcast).
    for b in range(B):                    # B is a static Python int
        t1_ref[b] = jnp.dot(acolT_ref[...], x_ref[b],
                            preferred_element_type=jnp.float32,
                            precision=lax.Precision.HIGHEST)

    # ---- width (row) pass: ONE rank-2 MXU matmul with M = B * 2*Hpad --------
    t1 = t1_ref[...].reshape(B * P, W)    # free merge: P % 8 == 0
    y = jnp.dot(t1, arow_ref[...],
                preferred_element_type=jnp.float32,
                precision=lax.Precision.HIGHEST).reshape(B, P, Q)

    # ---- quadrant split: every offset is tile aligned (Hpad%8, Wpad%128) ----
    yl_ref[...] = y[:, :Hout, :Wout]                                   # LL
    yh_ref[:, 0, :, :] = y[:, Hpad:Hpad + Hout, :Wout]                 # LH (w-lo, h-hi)
    yh_ref[:, 1, :, :] = y[:, :Hout, Wpad:Wpad + Wout]                 # HL (w-hi, h-lo)
    yh_ref[:, 2, :, :] = y[:, Hpad:Hpad + Hout, Wpad:Wpad + Wout]      # HH


def _vmem_limit_bytes():
    """Scoped VMEM limit per generation: ~3/4 of physical, capped at 96 MiB
    (=> ~96 MiB on v5e/v6e's 128 MiB, ~48 MiB on v7x's 64 MiB)."""
    try:
        phys = int(pltpu.get_tpu_info().vmem_capacity_bytes)
    except Exception:
        phys = 64 * 1024 * 1024           # conservative (v7x-sized) fallback
    return int(min(phys * 3 // 4, 96 * 1024 * 1024))


_MAX_B = 32     # cap: the height pass is an unrolled per-image loop


def _pick_batch(NC, H, W, Hout, Wout, Hpad, Wpad, vmem_limit):
    """Returns (images per grid step, number of grid steps)."""
    P, Q = 2 * Hpad, 2 * Wpad
    fixed = 4 * 2 * (P * H + W * Q)            # filter blocks (worst case double-buffered)
    per_img = 4 * (2 * H * W                   # input block, double-buffered
                   + P * W                     # column-pass scratch
                   + P * Q                     # width-pass result
                   + 2 * Hout * Wout           # Yl block, double-buffered
                   + 2 * 3 * Hout * Wout)      # Yh block, double-buffered
    budget = max(vmem_limit // 2 - fixed, per_img)
    b_max = int(max(1, min(budget // per_img, _MAX_B)))
    steps = max(1, -(-NC // b_max))
    if NC >= 2:
        steps = max(steps, 2)                  # let both TensorCores work (v7x)
    if steps > 1 and steps % 2 == 1:
        steps += 1                             # even grid length for 2-TC chips
    B = -(-NC // steps)
    return int(B), int(steps)


def dwt_forward(x):
    """Equivalent of DWT.forward (pytorch_wavelets DWTForward(J=1,'sym7','reflect')).

    Returns [Yl, Yh] with Yl: (N, C, H', W'), Yh: [ (N, C, 3, H', W') ],
    Yh[0][:, :, 0/1/2] = LH / HL / HH (pytorch_wavelets ordering).
    """
    N, C, H, W = x.shape
    a_col_np, Hout, Hpad = _folded_analysis_matrix(H, 8)       # (H, 2*Hpad)
    a_row_np, Wout, Wpad = _folded_analysis_matrix(W, 128)     # (W, 2*Wpad)
    a_colT = jnp.asarray(np.ascontiguousarray(a_col_np.T))     # (2*Hpad, H)
    a_row = jnp.asarray(a_row_np)

    NC = N * C
    x2 = x.astype(jnp.float32).reshape(NC, H, W)

    vmem_limit = _vmem_limit_bytes()
    B, steps = _pick_batch(NC, H, W, Hout, Wout, Hpad, Wpad, vmem_limit)
    NCp = B * steps
    if NCp != NC:
        x2 = jnp.pad(x2, ((0, NCp - NC), (0, 0), (0, 0)))

    def build_and_call(single_buffer_filters):
        if single_buffer_filters:
            # Filter blocks are constant across the grid -> single-buffer them.
            acolT_spec = pl.BlockSpec((2 * Hpad, H), lambda i: (0, 0),
                                      pipeline_mode=pl.Buffered(1))
            arow_spec = pl.BlockSpec((W, 2 * Wpad), lambda i: (0, 0),
                                     pipeline_mode=pl.Buffered(1))
        else:
            acolT_spec = pl.BlockSpec((2 * Hpad, H), lambda i: (0, 0))
            arow_spec = pl.BlockSpec((W, 2 * Wpad), lambda i: (0, 0))
        return pl.pallas_call(
            _dwt_kernel,
            out_shape=(
                jax.ShapeDtypeStruct((NCp, Hout, Wout), jnp.float32),
                jax.ShapeDtypeStruct((NCp, 3, Hout, Wout), jnp.float32),
            ),
            grid_spec=pltpu.PrefetchScalarGridSpec(
                num_scalar_prefetch=0,
                grid=(steps,),
                in_specs=[
                    pl.BlockSpec((B, H, W), lambda i: (i, 0, 0)),
                    acolT_spec,
                    arow_spec,
                ],
                out_specs=(
                    pl.BlockSpec((B, Hout, Wout), lambda i: (i, 0, 0)),
                    pl.BlockSpec((B, 3, Hout, Wout), lambda i: (i, 0, 0, 0)),
                ),
                scratch_shapes=[pltpu.VMEM((B, 2 * Hpad, W), jnp.float32)],
            ),
            compiler_params=pltpu.CompilerParams(
                dimension_semantics=("parallel",),
                vmem_limit_bytes=vmem_limit),
        )(x2, a_colT, a_row)

    try:
        yl, yh = build_and_call(True)
    except Exception:
        # pl.Buffered(1) not accepted by this jax/Mosaic build: fall back to
        # default double-buffered filter blocks (slightly more VMEM, same math).
        yl, yh = build_and_call(False)

    if NCp != NC:
        yl = yl[:NC]
        yh = yh[:NC]
    Yl = yl.reshape(N, C, Hout, Wout)           # free (contiguous) reshape
    Yh = [yh.reshape(N, C, 3, Hout, Wout)]      # free (contiguous) reshape
    return [Yl, Yh]


def _reference(x):
    """Plain-JAX reference: explicit reflect pad + unfolded analysis matrices.

    Independent path (no padding fold, no lane/sublane alignment), validating
    both the folded/aligned matrices and the Pallas kernel."""
    N, C, H, W = x.shape
    L = _L
    Hout = (H + L - 1) // 2
    Wout = (W + L - 1) // 2
    ph = 2 * (Hout - 1) - H + L
    pw = 2 * (Wout - 1) - W + L
    xp = jnp.pad(
        x.astype(jnp.float32),
        ((0, 0), (0, 0), (ph // 2, (ph + 1) // 2), (pw // 2, (pw + 1) // 2)),
        mode="reflect")
    Hp, Wp = H + ph, W + pw
    a_row = jnp.asarray(
        _analysis_matrix(Wp, Wout, SYM7_DEC_LO, SYM7_DEC_HI).astype(np.float32))
    a_col = jnp.asarray(
        _analysis_matrix(Hp, Hout, SYM7_DEC_LO, SYM7_DEC_HI).astype(np.float32))
    # y[n,c,p,q] = sum_{h,w} a_col[h,p] * xp[n,c,h,w] * a_row[w,q]
    y = jnp.einsum("hp,nchw,wq->ncpq", a_col, xp, a_row,
                   precision=lax.Precision.HIGHEST)
    Yl = y[:, :, :Hout, :Wout]
    Yh = [jnp.stack([y[:, :, Hout:, :Wout], y[:, :, :Hout, Wout:],
                     y[:, :, Hout:, Wout:]], axis=2)]
    return [Yl, Yh]


if __name__ == "__main__":
    key = jax.random.PRNGKey(0)
    x = jax.random.normal(key, (2, 4, 16, 16), dtype=jnp.float32)

    out = dwt_forward(x)
    Yl, Yh = out[0], out[1]
    jax.block_until_ready(Yl)
    jax.block_until_ready(Yh[0])

    assert Yl.shape == (2, 4, 14, 14), Yl.shape
    assert Yh[0].shape == (2, 4, 3, 14, 14), Yh[0].shape

    ref = _reference(x)
    np.testing.assert_allclose(np.asarray(Yl), np.asarray(ref[0]),
                               rtol=1e-4, atol=1e-4)
    np.testing.assert_allclose(np.asarray(Yh[0]), np.asarray(ref[1][0]),
                               rtol=1e-4, atol=1e-4)

    print("KERNEL_OK")
</pallas_src>

<mosaic_0001>
module attributes {stable_mosaic.version = 11 : i64} {
  func.func @_dwt_kernel(%arg0: i32, %arg1: memref<4x16x16xf32, #tpu.memory_space<vmem>>, %arg2: memref<32x16xf32, #tpu.memory_space<vmem>>, %arg3: memref<16x256xf32, #tpu.memory_space<vmem>>, %arg4: memref<4x14x14xf32, #tpu.memory_space<vmem>>, %arg5: memref<4x3x14x14xf32, #tpu.memory_space<vmem>>, %arg6: memref<4x32x16xf32, #tpu.memory_space<vmem>>) attributes {dimension_semantics = [#tpu.dimension_semantics<parallel>], iteration_bounds = array<i64: 2>, scalar_prefetch = 0 : i64, scratch_operands = 1 : i64, tpu.core_type = #tpu.core_type<tc>, window_params = [{transform_indices = @transform_0, window_bounds = array<i64: 4, 16, 16>}, {pipeline_mode = #tpu.pipeline_mode<synchronous>, transform_indices = @transform_1, window_bounds = array<i64: 32, 16>}, {pipeline_mode = #tpu.pipeline_mode<synchronous>, transform_indices = @transform_2, window_bounds = array<i64: 16, 256>}, {transform_indices = @transform_3, window_bounds = array<i64: 4, 14, 14>}, {transform_indices = @transform_4, window_bounds = array<i64: 4, 3, 14, 14>}]} {
    %c0 = arith.constant 0 : index
    %c0_0 = arith.constant 0 : index
    %0 = vector.load %arg2[%c0, %c0_0] : memref<32x16xf32, #tpu.memory_space<vmem>>, vector<32x16xf32>
    %c0_1 = arith.constant 0 : index
    %c0_2 = arith.constant 0 : index
    %c0_3 = arith.constant 0 : index
    %1 = vector.load %arg1[%c0_1, %c0_2, %c0_3] : memref<4x16x16xf32, #tpu.memory_space<vmem>>, vector<1x16x16xf32>
    %2 = vector.shape_cast %1 : vector<1x16x16xf32> to vector<16x16xf32>
    %cst = arith.constant dense<0.000000e+00> : vector<32x16xf32>
    %3 = tpu.matmul %0, %2, %cst {dimension_numbers = #tpu.dot_dimension_numbers<[1], [0], [0], [1], [0, 0, 1, 1], [], []>, precision = #tpu.contract_precision<fp32>} : vector<32x16xf32>, vector<16x16xf32>, vector<32x16xf32> -> vector<32x16xf32>
    %c0_4 = arith.constant 0 : index
    %c0_5 = arith.constant 0 : index
    %c0_6 = arith.constant 0 : index
    %4 = vector.load %arg6[%c0_4, %c0_5, %c0_6] : memref<4x32x16xf32, #tpu.memory_space<vmem>>, vector<1x32x16xf32>
    %5 = vector.shape_cast %4 : vector<1x32x16xf32> to vector<32x16xf32>
    %6 = vector.shape_cast %3 : vector<32x16xf32> to vector<1x32x16xf32>
    tpu.vector_store %arg6[%c0_4, %c0_5, %c0_6], %6 {strides = array<i32>} : memref<4x32x16xf32, #tpu.memory_space<vmem>>, vector<1x32x16xf32>,
    %c0_7 = arith.constant 0 : index
    %c0_8 = arith.constant 0 : index
    %7 = vector.load %arg2[%c0_7, %c0_8] : memref<32x16xf32, #tpu.memory_space<vmem>>, vector<32x16xf32>
    %c1 = arith.constant 1 : index
    %c0_9 = arith.constant 0 : index
    %c0_10 = arith.constant 0 : index
    %8 = vector.load %arg1[%c1, %c0_9, %c0_10] : memref<4x16x16xf32, #tpu.memory_space<vmem>>, vector<1x16x16xf32>
    %9 = vector.shape_cast %8 : vector<1x16x16xf32> to vector<16x16xf32>
    %cst_11 = arith.constant dense<0.000000e+00> : vector<32x16xf32>
    %10 = tpu.matmul %7, %9, %cst_11 {dimension_numbers = #tpu.dot_dimension_numbers<[1], [0], [0], [1], [0, 0, 1, 1], [], []>, precision = #tpu.contract_precision<fp32>} : vector<32x16xf32>, vector<16x16xf32>, vector<32x16xf32> -> vector<32x16xf32>
    %c1_12 = arith.constant 1 : index
    %c0_13 = arith.constant 0 : index
    %c0_14 = arith.constant 0 : index
    %11 = vector.load %arg6[%c1_12, %c0_13, %c0_14] : memref<4x32x16xf32, #tpu.memory_space<vmem>>, vector<1x32x16xf32>
    %12 = vector.shape_cast %11 : vector<1x32x16xf32> to vector<32x16xf32>
    %13 = vector.shape_cast %10 : vector<32x16xf32> to vector<1x32x16xf32>
    tpu.vector_store %arg6[%c1_12, %c0_13, %c0_14], %13 {strides = array<i32>} : memref<4x32x16xf32, #tpu.memory_space<vmem>>, vector<1x32x16xf32>,
    %c0_15 = arith.constant 0 : index
    %c0_16 = arith.constant 0 : index
    %14 = vector.load %arg2[%c0_15, %c0_16] : memref<32x16xf32, #tpu.memory_space<vmem>>, vector<32x16xf32>
    %c2 = arith.constant 2 : index
    %c0_17 = arith.constant 0 : index
    %c0_18 = arith.constant 0 : index
    %15 = vector.load %arg1[%c2, %c0_17, %c0_18] : memref<4x16x16xf32, #tpu.memory_space<vmem>>, vector<1x16x16xf32>
    %16 = vector.shape_cast %15 : vector<1x16x16xf32> to vector<16x16xf32>
    %cst_19 = arith.constant dense<0.000000e+00> : vector<32x16xf32>
    %17 = tpu.matmul %14, %16, %cst_19 {dimension_numbers = #tpu.dot_dimension_numbers<[1], [0], [0], [1], [0, 0, 1, 1], [], []>, precision = #tpu.contract_precision<fp32>} : vector<32x16xf32>, vector<16x16xf32>, vector<32x16xf32> -> vector<32x16xf32>
    %c2_20 = arith.constant 2 : index
    %c0_21 = arith.constant 0 : index
    %c0_22 = arith.constant 0 : index
    %18 = vector.load %arg6[%c2_20, %c0_21, %c0_22] : memref<4x32x16xf32, #tpu.memory_space<vmem>>, vector<1x32x16xf32>
    %19 = vector.shape_cast %18 : vector<1x32x16xf32> to vector<32x16xf32>
    %20 = vector.shape_cast %17 : vector<32x16xf32> to vector<1x32x16xf32>
    tpu.vector_store %arg6[%c2_20, %c0_21, %c0_22], %20 {strides = array<i32>} : memref<4x32x16xf32, #tpu.memory_space<vmem>>, vector<1x32x16xf32>,
    %c0_23 = arith.constant 0 : index
    %c0_24 = arith.constant 0 : index
    %21 = vector.load %arg2[%c0_23, %c0_24] : memref<32x16xf32, #tpu.memory_space<vmem>>, vector<32x16xf32>
    %c3 = arith.constant 3 : index
    %c0_25 = arith.constant 0 : index
    %c0_26 = arith.constant 0 : index
    %22 = vector.load %arg1[%c3, %c0_25, %c0_26] : memref<4x16x16xf32, #tpu.memory_space<vmem>>, vector<1x16x16xf32>
    %23 = vector.shape_cast %22 : vector<1x16x16xf32> to vector<16x16xf32>
    %cst_27 = arith.constant dense<0.000000e+00> : vector<32x16xf32>
    %24 = tpu.matmul %21, %23, %cst_27 {dimension_numbers = #tpu.dot_dimension_numbers<[1], [0], [0], [1], [0, 0, 1, 1], [], []>, precision = #tpu.contract_precision<fp32>} : vector<32x16xf32>, vector<16x16xf32>, vector<32x16xf32> -> vector<32x16xf32>
    %c3_28 = arith.constant 3 : index
    %c0_29 = arith.constant 0 : index
    %c0_30 = arith.constant 0 : index
    %25 = vector.load %arg6[%c3_28, %c0_29, %c0_30] : memref<4x32x16xf32, #tpu.memory_space<vmem>>, vector<1x32x16xf32>
    %26 = vector.shape_cast %25 : vector<1x32x16xf32> to vector<32x16xf32>
    %27 = vector.shape_cast %24 : vector<32x16xf32> to vector<1x32x16xf32>
    tpu.vector_store %arg6[%c3_28, %c0_29, %c0_30], %27 {strides = array<i32>} : memref<4x32x16xf32, #tpu.memory_space<vmem>>, vector<1x32x16xf32>,
    %c0_31 = arith.constant 0 : index
    %c0_32 = arith.constant 0 : index
    %c0_33 = arith.constant 0 : index
    %28 = vector.load %arg6[%c0_31, %c0_32, %c0_33] : memref<4x32x16xf32, #tpu.memory_space<vmem>>, vector<4x32x16xf32>
    %29 = vector.shape_cast %28 : vector<4x32x16xf32> to vector<128x16xf32>
    %c0_34 = arith.constant 0 : index
    %c0_35 = arith.constant 0 : index
    %30 = vector.load %arg3[%c0_34, %c0_35] : memref<16x256xf32, #tpu.memory_space<vmem>>, vector<16x256xf32>
    %cst_36 = arith.constant dense<0.000000e+00> : vector<128x256xf32>
    %31 = tpu.matmul %29, %30, %cst_36 {dimension_numbers = #tpu.dot_dimension_numbers<[1], [0], [0], [1], [0, 0, 1, 1], [], []>, precision = #tpu.contract_precision<fp32>} : vector<128x16xf32>, vector<16x256xf32>, vector<128x256xf32> -> vector<128x256xf32>
    %32 = vector.shape_cast %31 : vector<128x256xf32> to vector<4x32x256xf32>
    %33 = vector.extract_strided_slice %32 {offsets = [0, 0, 0], sizes = [4, 14, 14], strides = [1, 1, 1]} : vector<4x32x256xf32> to vector<4x14x14xf32>
    %c0_37 = arith.constant 0 : index
    %c0_38 = arith.constant 0 : index
    %c0_39 = arith.constant 0 : index
    %34 = vector.load %arg4[%c0_37, %c0_38, %c0_39] : memref<4x14x14xf32, #tpu.memory_space<vmem>>, vector<4x14x14xf32>
    tpu.vector_store %arg4[%c0_37, %c0_38, %c0_39], %33 {strides = array<i32>} : memref<4x14x14xf32, #tpu.memory_space<vmem>>, vector<4x14x14xf32>,
    %35 = vector.extract_strided_slice %32 {offsets = [0, 16, 0], sizes = [4, 14, 14], strides = [1, 1, 1]} : vector<4x32x256xf32> to vector<4x14x14xf32>
    %c0_40 = arith.constant 0 : index
    %c0_41 = arith.constant 0 : index
    %c0_42 = arith.constant 0 : index
    %c0_43 = arith.constant 0 : index
    %36 = vector.load %arg5[%c0_40, %c0_41, %c0_42, %c0_43] : memref<4x3x14x14xf32, #tpu.memory_space<vmem>>, vector<4x1x14x14xf32>
    %37 = vector.shape_cast %36 : vector<4x1x14x14xf32> to vector<4x14x14xf32>
    %38 = vector.shape_cast %35 : vector<4x14x14xf32> to vector<4x1x14x14xf32>
    tpu.vector_store %arg5[%c0_40, %c0_41, %c0_42, %c0_43], %38 {strides = array<i32>} : memref<4x3x14x14xf32, #tpu.memory_space<vmem>>, vector<4x1x14x14xf32>,
    %39 = vector.extract_strided_slice %32 {offsets = [0, 0, 128], sizes = [4, 14, 14], strides = [1, 1, 1]} : vector<4x32x256xf32> to vector<4x14x14xf32>
    %c0_44 = arith.constant 0 : index
    %c1_45 = arith.constant 1 : index
    %c0_46 = arith.constant 0 : index
    %c0_47 = arith.constant 0 : index
    %40 = vector.load %arg5[%c0_44, %c1_45, %c0_46, %c0_47] : memref<4x3x14x14xf32, #tpu.memory_space<vmem>>, vector<4x1x14x14xf32>
    %41 = vector.shape_cast %40 : vector<4x1x14x14xf32> to vector<4x14x14xf32>
    %42 = vector.shape_cast %39 : vector<4x14x14xf32> to vector<4x1x14x14xf32>
    tpu.vector_store %arg5[%c0_44, %c1_45, %c0_46, %c0_47], %42 {strides = array<i32>} : memref<4x3x14x14xf32, #tpu.memory_space<vmem>>, vector<4x1x14x14xf32>,
    %43 = vector.extract_strided_slice %32 {offsets = [0, 16, 128], sizes = [4, 14, 14], strides = [1, 1, 1]} : vector<4x32x256xf32> to vector<4x14x14xf32>
    %c0_48 = arith.constant 0 : index
    %c2_49 = arith.constant 2 : index
    %c0_50 = arith.constant 0 : index
    %c0_51 = arith.constant 0 : index
    %44 = vector.load %arg5[%c0_48, %c2_49, %c0_50, %c0_51] : memref<4x3x14x14xf32, #tpu.memory_space<vmem>>, vector<4x1x14x14xf32>
    %45 = vector.shape_cast %44 : vector<4x1x14x14xf32> to vector<4x14x14xf32>
    %46 = vector.shape_cast %43 : vector<4x14x14xf32> to vector<4x1x14x14xf32>
    tpu.vector_store %arg5[%c0_48, %c2_49, %c0_50, %c0_51], %46 {strides = array<i32>} : memref<4x3x14x14xf32, #tpu.memory_space<vmem>>, vector<4x1x14x14xf32>,
    return
  }
  func.func @transform_0(%arg0: i32) -> (i32, i32, i32) {
    %c0_i32 = arith.constant 0 : i32
    %c0_i32_0 = arith.constant 0 : i32
    %c0_i32_1 = arith.constant 0 : i32
    return %arg0, %c0_i32, %c0_i32_0 : i32, i32, i32
  }
  func.func @transform_1(%arg0: i32) -> (i32, i32) {
    %c0_i32 = arith.constant 0 : i32
    %c0_i32_0 = arith.constant 0 : i32
    %c0_i32_1 = arith.constant 0 : i32
    return %c0_i32, %c0_i32_0 : i32, i32
  }
  func.func @transform_2(%arg0: i32) -> (i32, i32) {
    %c0_i32 = arith.constant 0 : i32
    %c0_i32_0 = arith.constant 0 : i32
    %c0_i32_1 = arith.constant 0 : i32
    return %c0_i32, %c0_i32_0 : i32, i32
  }
  func.func @transform_3(%arg0: i32) -> (i32, i32, i32) {
    %c0_i32 = arith.constant 0 : i32
    %c0_i32_0 = arith.constant 0 : i32
    %c0_i32_1 = arith.constant 0 : i32
    return %arg0, %c0_i32, %c0_i32_0 : i32, i32, i32
  }
  func.func @transform_4(%arg0: i32) -> (i32, i32, i32, i32) {
    %c0_i32 = arith.constant 0 : i32
    %c0_i32_0 = arith.constant 0 : i32
    %c0_i32_1 = arith.constant 0 : i32
    %c0_i32_2 = arith.constant 0 : i32
    return %arg0, %c0_i32, %c0_i32_0, %c0_i32_1 : i32, i32, i32, i32
  }
}

module attributes {stable_mosaic.version = 11 : i64} {
  func.func @_dwt_kernel(%arg0: i32, %arg1: memref<4x16x16xf32, #tpu.memory_space<vmem>>, %arg2: memref<32x16xf32, #tpu.memory_space<vmem>>, %arg3: memref<16x256xf32, #tpu.memory_space<vmem>>, %arg4: memref<4x14x14xf32, #tpu.memory_space<vmem>>, %arg5: memref<4x3x14x14xf32, #tpu.memory_space<vmem>>, %arg6: memref<4x32x16xf32, #tpu.memory_space<vmem>>) attributes {dimension_semantics = [#tpu.dimension_semantics<parallel>], iteration_bounds = array<i64: 2>, scalar_prefetch = 0 : i64, scratch_operands = 1 : i64, tpu.core_type = #tpu.core_type<tc>, window_params = [{transform_indices = @transform_0, window_bounds = array<i64: 4, 16, 16>}, {pipeline_mode = #tpu.pipeline_mode<synchronous>, transform_indices = @transform_1, window_bounds = array<i64: 32, 16>}, {pipeline_mode = #tpu.pipeline_mode<synchronous>, transform_indices = @transform_2, window_bounds = array<i64: 16, 256>}, {transform_indices = @transform_3, window_bounds = array<i64: 4, 14, 14>}, {transform_indices = @transform_4, window_bounds = array<i64: 4, 3, 14, 14>}]} {
    %c0 = arith.constant 0 : index
    %c0_0 = arith.constant 0 : index
    %0 = vector.load %arg2[%c0, %c0_0] : memref<32x16xf32, #tpu.memory_space<vmem>>, vector<32x16xf32>
    %c0_1 = arith.constant 0 : index
    %c0_2 = arith.constant 0 : index
    %c0_3 = arith.constant 0 : index
    %1 = vector.load %arg1[%c0_1, %c0_2, %c0_3] : memref<4x16x16xf32, #tpu.memory_space<vmem>>, vector<1x16x16xf32>
    %2 = vector.shape_cast %1 : vector<1x16x16xf32> to vector<16x16xf32>
    %cst = arith.constant dense<0.000000e+00> : vector<32x16xf32>
    %3 = tpu.matmul %0, %2, %cst {dimension_numbers = #tpu.dot_dimension_numbers<[1], [0], [0], [1], [0, 0, 1, 1], [], []>, precision = #tpu.contract_precision<fp32>} : vector<32x16xf32>, vector<16x16xf32>, vector<32x16xf32> -> vector<32x16xf32>
    %c0_4 = arith.constant 0 : index
    %c0_5 = arith.constant 0 : index
    %c0_6 = arith.constant 0 : index
    %4 = vector.load %arg6[%c0_4, %c0_5, %c0_6] : memref<4x32x16xf32, #tpu.memory_space<vmem>>, vector<1x32x16xf32>
    %5 = vector.shape_cast %4 : vector<1x32x16xf32> to vector<32x16xf32>
    %6 = vector.shape_cast %3 : vector<32x16xf32> to vector<1x32x16xf32>
    tpu.vector_store %arg6[%c0_4, %c0_5, %c0_6], %6 {strides = array<i32>} : memref<4x32x16xf32, #tpu.memory_space<vmem>>, vector<1x32x16xf32>,
    %c0_7 = arith.constant 0 : index
    %c0_8 = arith.constant 0 : index
    %7 = vector.load %arg2[%c0_7, %c0_8] : memref<32x16xf32, #tpu.memory_space<vmem>>, vector<32x16xf32>
    %c1 = arith.constant 1 : index
    %c0_9 = arith.constant 0 : index
    %c0_10 = arith.constant 0 : index
    %8 = vector.load %arg1[%c1, %c0_9, %c0_10] : memref<4x16x16xf32, #tpu.memory_space<vmem>>, vector<1x16x16xf32>
    %9 = vector.shape_cast %8 : vector<1x16x16xf32> to vector<16x16xf32>
    %cst_11 = arith.constant dense<0.000000e+00> : vector<32x16xf32>
    %10 = tpu.matmul %7, %9, %cst_11 {dimension_numbers = #tpu.dot_dimension_numbers<[1], [0], [0], [1], [0, 0, 1, 1], [], []>, precision = #tpu.contract_precision<fp32>} : vector<32x16xf32>, vector<16x16xf32>, vector<32x16xf32> -> vector<32x16xf32>
    %c1_12 = arith.constant 1 : index
    %c0_13 = arith.constant 0 : index
    %c0_14 = arith.constant 0 : index
    %11 = vector.load %arg6[%c1_12, %c0_13, %c0_14] : memref<4x32x16xf32, #tpu.memory_space<vmem>>, vector<1x32x16xf32>
    %12 = vector.shape_cast %11 : vector<1x32x16xf32> to vector<32x16xf32>
    %13 = vector.shape_cast %10 : vector<32x16xf32> to vector<1x32x16xf32>
    tpu.vector_store %arg6[%c1_12, %c0_13, %c0_14], %13 {strides = array<i32>} : memref<4x32x16xf32, #tpu.memory_space<vmem>>, vector<1x32x16xf32>,
    %c0_15 = arith.constant 0 : index
    %c0_16 = arith.constant 0 : index
    %14 = vector.load %arg2[%c0_15, %c0_16] : memref<32x16xf32, #tpu.memory_space<vmem>>, vector<32x16xf32>
    %c2 = arith.constant 2 : index
    %c0_17 = arith.constant 0 : index
    %c0_18 = arith.constant 0 : index
    %15 = vector.load %arg1[%c2, %c0_17, %c0_18] : memref<4x16x16xf32, #tpu.memory_space<vmem>>, vector<1x16x16xf32>
    %16 = vector.shape_cast %15 : vector<1x16x16xf32> to vector<16x16xf32>
    %cst_19 = arith.constant dense<0.000000e+00> : vector<32x16xf32>
    %17 = tpu.matmul %14, %16, %cst_19 {dimension_numbers = #tpu.dot_dimension_numbers<[1], [0], [0], [1], [0, 0, 1, 1], [], []>, precision = #tpu.contract_precision<fp32>} : vector<32x16xf32>, vector<16x16xf32>, vector<32x16xf32> -> vector<32x16xf32>
    %c2_20 = arith.constant 2 : index
    %c0_21 = arith.constant 0 : index
    %c0_22 = arith.constant 0 : index
    %18 = vector.load %arg6[%c2_20, %c0_21, %c0_22] : memref<4x32x16xf32, #tpu.memory_space<vmem>>, vector<1x32x16xf32>
    %19 = vector.shape_cast %18 : vector<1x32x16xf32> to vector<32x16xf32>
    %20 = vector.shape_cast %17 : vector<32x16xf32> to vector<1x32x16xf32>
    tpu.vector_store %arg6[%c2_20, %c0_21, %c0_22], %20 {strides = array<i32>} : memref<4x32x16xf32, #tpu.memory_space<vmem>>, vector<1x32x16xf32>,
    %c0_23 = arith.constant 0 : index
    %c0_24 = arith.constant 0 : index
    %21 = vector.load %arg2[%c0_23, %c0_24] : memref<32x16xf32, #tpu.memory_space<vmem>>, vector<32x16xf32>
    %c3 = arith.constant 3 : index
    %c0_25 = arith.constant 0 : index
    %c0_26 = arith.constant 0 : index
    %22 = vector.load %arg1[%c3, %c0_25, %c0_26] : memref<4x16x16xf32, #tpu.memory_space<vmem>>, vector<1x16x16xf32>
    %23 = vector.shape_cast %22 : vector<1x16x16xf32> to vector<16x16xf32>
    %cst_27 = arith.constant dense<0.000000e+00> : vector<32x16xf32>
    %24 = tpu.matmul %21, %23, %cst_27 {dimension_numbers = #tpu.dot_dimension_numbers<[1], [0], [0], [1], [0, 0, 1, 1], [], []>, precision = #tpu.contract_precision<fp32>} : vector<32x16xf32>, vector<16x16xf32>, vector<32x16xf32> -> vector<32x16xf32>
    %c3_28 = arith.constant 3 : index
    %c0_29 = arith.constant 0 : index
    %c0_30 = arith.constant 0 : index
    %25 = vector.load %arg6[%c3_28, %c0_29, %c0_30] : memref<4x32x16xf32, #tpu.memory_space<vmem>>, vector<1x32x16xf32>
    %26 = vector.shape_cast %25 : vector<1x32x16xf32> to vector<32x16xf32>
    %27 = vector.shape_cast %24 : vector<32x16xf32> to vector<1x32x16xf32>
    tpu.vector_store %arg6[%c3_28, %c0_29, %c0_30], %27 {strides = array<i32>} : memref<4x32x16xf32, #tpu.memory_space<vmem>>, vector<1x32x16xf32>,
    %c0_31 = arith.constant 0 : index
    %c0_32 = arith.constant 0 : index
    %c0_33 = arith.constant 0 : index
    %28 = vector.load %arg6[%c0_31, %c0_32, %c0_33] : memref<4x32x16xf32, #tpu.memory_space<vmem>>, vector<4x32x16xf32>
    %29 = vector.shape_cast %28 : vector<4x32x16xf32> to vector<128x16xf32>
    %c0_34 = arith.constant 0 : index
    %c0_35 = arith.constant 0 : index
    %30 = vector.load %arg3[%c0_34, %c0_35] : memref<16x256xf32, #tpu.memory_space<vmem>>, vector<16x256xf32>
    %cst_36 = arith.constant dense<0.000000e+00> : vector<128x256xf32>
    %31 = tpu.matmul %29, %30, %cst_36 {dimension_numbers = #tpu.dot_dimension_numbers<[1], [0], [0], [1], [0, 0, 1, 1], [], []>, precision = #tpu.contract_precision<fp32>} : vector<128x16xf32>, vector<16x256xf32>, vector<128x256xf32> -> vector<128x256xf32>
    %32 = vector.shape_cast %31 : vector<128x256xf32> to vector<4x32x256xf32>
    %33 = vector.extract_strided_slice %32 {offsets = [0, 0, 0], sizes = [4, 14, 14], strides = [1, 1, 1]} : vector<4x32x256xf32> to vector<4x14x14xf32>
    %c0_37 = arith.constant 0 : index
    %c0_38 = arith.constant 0 : index
    %c0_39 = arith.constant 0 : index
    %34 = vector.load %arg4[%c0_37, %c0_38, %c0_39] : memref<4x14x14xf32, #tpu.memory_space<vmem>>, vector<4x14x14xf32>
    tpu.vector_store %arg4[%c0_37, %c0_38, %c0_39], %33 {strides = array<i32>} : memref<4x14x14xf32, #tpu.memory_space<vmem>>, vector<4x14x14xf32>,
    %35 = vector.extract_strided_slice %32 {offsets = [0, 16, 0], sizes = [4, 14, 14], strides = [1, 1, 1]} : vector<4x32x256xf32> to vector<4x14x14xf32>
    %c0_40 = arith.constant 0 : index
    %c0_41 = arith.constant 0 : index
    %c0_42 = arith.constant 0 : index
    %c0_43 = arith.constant 0 : index
    %36 = vector.load %arg5[%c0_40, %c0_41, %c0_42, %c0_43] : memref<4x3x14x14xf32, #tpu.memory_space<vmem>>, vector<4x1x14x14xf32>
    %37 = vector.shape_cast %36 : vector<4x1x14x14xf32> to vector<4x14x14xf32>
    %38 = vector.shape_cast %35 : vector<4x14x14xf32> to vector<4x1x14x14xf32>
    tpu.vector_store %arg5[%c0_40, %c0_41, %c0_42, %c0_43], %38 {strides = array<i32>} : memref<4x3x14x14xf32, #tpu.memory_space<vmem>>, vector<4x1x14x14xf32>,
    %39 = vector.extract_strided_slice %32 {offsets = [0, 0, 128], sizes = [4, 14, 14], strides = [1, 1, 1]} : vector<4x32x256xf32> to vector<4x14x14xf32>
    %c0_44 = arith.constant 0 : index
    %c1_45 = arith.constant 1 : index
    %c0_46 = arith.constant 0 : index
    %c0_47 = arith.constant 0 : index
    %40 = vector.load %arg5[%c0_44, %c1_45, %c0_46, %c0_47] : memref<4x3x14x14xf32, #tpu.memory_space<vmem>>, vector<4x1x14x14xf32>
    %41 = vector.shape_cast %40 : vector<4x1x14x14xf32> to vector<4x14x14xf32>
    %42 = vector.shape_cast %39 : vector<4x14x14xf32> to vector<4x1x14x14xf32>
    tpu.vector_store %arg5[%c0_44, %c1_45, %c0_46, %c0_47], %42 {strides = array<i32>} : memref<4x3x14x14xf32, #tpu.memory_space<vmem>>, vector<4x1x14x14xf32>,
    %43 = vector.extract_strided_slice %32 {offsets = [0, 16, 128], sizes = [4, 14, 14], strides = [1, 1, 1]} : vector<4x32x256xf32> to vector<4x14x14xf32>
    %c0_48 = arith.constant 0 : index
    %c2_49 = arith.constant 2 : index
    %c0_50 = arith.constant 0 : index
    %c0_51 = arith.constant 0 : index
    %44 = vector.load %arg5[%c0_48, %c2_49, %c0_50, %c0_51] : memref<4x3x14x14xf32, #tpu.memory_space<vmem>>, vector<4x1x14x14xf32>
    %45 = vector.shape_cast %44 : vector<4x1x14x14xf32> to vector<4x14x14xf32>
    %46 = vector.shape_cast %43 : vector<4x14x14xf32> to vector<4x1x14x14xf32>
    tpu.vector_store %arg5[%c0_48, %c2_49, %c0_50, %c0_51], %46 {strides = array<i32>} : memref<4x3x14x14xf32, #tpu.memory_space<vmem>>, vector<4x1x14x14xf32>,
    return
  }
  func.func @transform_0(%arg0: i32) -> (i32, i32, i32) {
    %c0_i32 = arith.constant 0 : i32
    %c0_i32_0 = arith.constant 0 : i32
    %c0_i32_1 = arith.constant 0 : i32
    return %arg0, %c0_i32, %c0_i32_0 : i32, i32, i32
  }
  func.func @transform_1(%arg0: i32) -> (i32, i32) {
    %c0_i32 = arith.constant 0 : i32
    %c0_i32_0 = arith.constant 0 : i32
    %c0_i32_1 = arith.constant 0 : i32
    return %c0_i32, %c0_i32_0 : i32, i32
  }
  func.func @transform_2(%arg0: i32) -> (i32, i32) {
    %c0_i32 = arith.constant 0 : i32
    %c0_i32_0 = arith.constant 0 : i32
    %c0_i32_1 = arith.constant 0 : i32
    return %c0_i32, %c0_i32_0 : i32, i32
  }
  func.func @transform_3(%arg0: i32) -> (i32, i32, i32) {
    %c0_i32 = arith.constant 0 : i32
    %c0_i32_0 = arith.constant 0 : i32
    %c0_i32_1 = arith.constant 0 : i32
    return %arg0, %c0_i32, %c0_i32_0 : i32, i32, i32
  }
  func.func @transform_4(%arg0: i32) -> (i32, i32, i32, i32) {
    %c0_i32 = arith.constant 0 : i32
    %c0_i32_0 = arith.constant 0 : i32
    %c0_i32_1 = arith.constant 0 : i32
    %c0_i32_2 = arith.constant 0 : i32
    return %arg0, %c0_i32, %c0_i32_0, %c0_i32_1 : i32, i32, i32, i32
  }
}

</mosaic_0001>

<bundles_post_ra>
// kernel: tpu_custom_call.1
= control target key start
LH: loop header
LB: loop body
LE: loop exit
PB: predicated region body
PF: predicated region fallthrough
CT: control target
= control target key end

     0   :  { %10 = vsyncpa [#allocation4], 0  ;;  %s5824_s0 = inlined_call_operand.hbm [shape: f32[8,16,16], index: 0, kind: input, shape index: {}]   ;;  %s5825_s1 = inlined_call_operand.vmem [shape: f32[32,16], index: 1, kind: input, shape index: {}]   ;;  %s5826_s2 = inlined_call_operand.vmem [shape: f32[16,256], index: 2, kind: input, shape index: {}]   ;;  %s5827_s3 = inlined_call_operand.vmem [shape: f32[8,14,14], index: 3, kind: output, shape index: {0}]   ;;  %s5828_s4 = inlined_call_operand.vmem [shape: f32[8,3,14,14], index: 4, kind: output, shape index: {1}]  }
   0x1   :  { %12 = vsyncpa [#allocation4 + $0x1], 0  ;;  %s5045_s15 = smov 0   ;;  %s5047_s16 = smov 0  }
   0x2   :  { %s5049_s17 = smov 0   ;;  %s5051_s18 = smov 0  }
   0x3 LB: > { %s4121_s19 = sadd.s32 4294967295, %s5014_s18   ;;  %s5065_s20 = sadd.s32 1, %s5014_s18   ;;  %s5014_s18 = sphi %s5051_s18, %s5835_s18   ;;  %s5010_s17 = sphi %s5049_s17, %s5834_s17   ;;  %s5006_s16 = sphi %s5047_s16, %s5833_s16   ;;  %s5002_s15 = sphi %s5045_s15, %s5832_s15  }
   0x4   : > { %s22_s21 = ssub.s32 %s5014_s18, %s5065_s20  ;;  %s25_s22 = sadd.s32 1, %s5010_s17 }
   0x5   : > { %p23_p0 = scmp.eq.s32.totalorder %s22_s21, 0  ;;  %p32_p1 = scmp.ne.s32.totalorder %s5010_s17, %s5006_s16 }
   0x6   : > { %p33_p2 = scmp.eq.s32.totalorder %s5014_s18, 0  ;;  %p38_p3 = scmp.ne.s32.totalorder %s5006_s16, %s5002_s15 }
   0x7   : > { %s5075_s23 = scalar_select %p23_p0, %s5010_s17, %s25_s22  }
   0x8   : > { %p34_p4 = por %p33_p2, %p32_p1  ;;  %p39_p5 = scmp.eq.s32.totalorder %s4121_s19, 0 }
   0x9   : > { %p4914_p6 = scmp.lt.s32.totalorder %s5014_s18, 2  ;;  %s162_s25 = sand.u32 1, %s5010_s17  }
   0xa   : > { %p5080_p7 = por %p39_p5, %p38_p3  ;;  %s4125_s26 = sshll.u32 %s162_s25, 6 }
   0xb   : > { %s4161_s27 = sshll.u32 %s5014_s18, 10  ;;  %s166_s5 = scalar_lea.vmem [#allocation3], %s4125_s26 }
   0xc   : > { %s5089_s30 = scalar_lea.hbm %s5824_s0, %s4161_s27  ;;  %s174_s6 = sshll.u32 %s166_s5, 4  ;;  %s5091_s6 = int_to_ptr.vmem [resolvable:$true] %s174_s6 }
   0xd   : > { %p5093_p8 = pnand %p4914_p6, %p34_p4  ;;  %s5098_s8 = scalar_lea.sflag [#allocation4], %s162_s25 }
   0xe   : > { %s4950_s9 = scalar_lea.hbm %s5089_s30, 1024  ;;  %s4955_s12 = scalar_lea.hbm %s5824_s0, 2048 }
   0xf   : > { %p4951_p10 = scmp.ne.s32.totalorder %s5089_s30, %s4950_s9  ;;  %p4952_p11 = pneg %p5093_p8 }
  0x10   : > { %p4956_p0 = scmp.lt.u32.totalorder %s5089_s30, %s5824_s0  ;;  %p4957_p1 = scmp.lt.u32.totalorder %s4955_s12, %s4950_s9 }
  0x11   : > { %p4953_p12 = pnand %p4952_p11, %p4951_p10  ;;  %p4959_p3 = scmp.lt.u32.totalorder %s4950_s9, %s5089_s30 }
  0x12   : > { %p4958_p2 = por %p4957_p1, %p4956_p0 }
  0x13   : > { %p4954_p13 = pneg %p4953_p12 }
  0x14   : > { %p4960_p4 = por %p4959_p3, %p4958_p2 }
  0x16   : > { %p4961_p5 = pnand %p4960_p4, %p4954_p13 }
  0x18   : > { %4964 = shalt.err (!%p4961_p5)
}
  0x19   : > { %s4965_s15 = scalar_lea.vmem %s5091_s6, 1024  ;;  %s5016_s21 = smov [#allocation3]  }
  0x1a   : > { %p4966_p6 = scmp.ne.s32.totalorder %s5091_s6, %s4965_s15  ;;  %s4970_s22 = sshll.u32 %s5016_s21, 4  ;;  %s4971_s22 = int_to_ptr.vmem [resolvable:$false] %s4970_s22 }
  0x1b   : > { %s4972_s25 = scalar_lea.vmem %s4971_s22, 2048  ;;  %p4973_p9 = scmp.lt.s32.totalorder %s5091_s6, %s4971_s22 }
  0x1c   : > { %p4968_p10 = pnand %p4966_p6, %p4952_p11  ;;  %p4974_p0 = scmp.lt.s32.totalorder %s4972_s25, %s4965_s15 }
  0x1e   : > { %p4969_p12 = pneg %p4968_p10  ;;  %p4975_p1 = por %p4974_p0, %p4973_p9 }
  0x20   : > { %p4976_p2 = pnand %p4975_p1, %p4969_p12 }
  0x22   : > { %4979 = shalt.err (!%p4976_p2)
}
  0x23   : > { %s5017_s26 = smov 128   ;;  %s5018_s27 = smov 8  }
  0x24   : > { %4913 = dma.hbm_to_vmem [thread:$0]  (!%p5093_p8), %s5089_s30, 1024, %s5091_s6, %s5098_s8, %s5017_s26, %s5017_s26, %s5018_s27  }
  0x25   : > { %p182_p11 = scmp.lt.s32.totalorder %s5014_s18, 3  ;;  %p5831_p13 = scmp.ge.s32.totalorder %s5014_s18, 1 }
  0x27   : > { %p183_p3 = pnand %p5831_p13, %p182_p11 }
  0x28   : > { %s188_s28 = sand.u32 (!%p183_p3), 1, %s5006_s16  }
  0x29   : > { %186 = sbr.rel (%p183_p3) target bundleno = 755 (0x2f3), region = 32  ;;  %s4130_s29 = sshll.u32 (!%p183_p3), %s188_s28, 6 }
  0x2a   : > { %s189_s5 = scalar_lea.sflag (!%p183_p3), [#allocation4], %s188_s28  ;;  %s5130_s9 = scalar_lea.vmem (!%p183_p3), [#allocation3], %s4130_s29 }
  0x30   : > { %4997 = dma.done.wait (%p5080_p7), %s189_s5, 1024  }
  0x31   : > { %4999 = vsyncadd (%p5080_p7), %s189_s5, 4294966272  ;;  %vm245_vm0 = vcmask 130048   ;;  %v243_v0 = vld [vmem:[%s5130_s9] sm:$0xff]  ;;  %v244_v1 = vld [vmem:[%s5130_s9 + $0x8] sm:$0xff]  ;;  %s4131_s28 = sshll.u32 %s4121_s19, 2  ;;  %vm3980_vm1 = vcmask 113664  }
  0x32   : > { %v4136_v2 = vld [vmem:[%s5130_s9 + $0x10] sm:$0xff]  ;;  %v259_v3 = vand.u32 4294901760, %v243_v0  ;;  %v262_v4 = vand.u32 4294901760, %v244_v1  ;;  %v4137_v5 = vld [vmem:[%s5130_s9 + $0x18] sm:$0xff]  ;;  %v239_v7 = vld [vmem:[%s5825_s1] sm:$0xff]  ;;  %p226_p7 = scmp.lt.s32.totalorder %s4131_s28, 7 }
  0x33   : > { %v870_v6 = vand.u32 4294901760, %v4136_v2  ;;  %v240_v8 = vld [vmem:[%s5825_s1 + $0x8] sm:$0xff]  ;;  %v873_v9 = vand.u32 4294901760, %v4137_v5  ;;  %v247_v10 = vsel %vm245_vm0, %v239_v7, 0  ;;  %v241_v12 = vld [vmem:[%s5825_s1 + $0x10] sm:$0xff]  ;;  %v242_v13 = vld [vmem:[%s5825_s1 + $0x18] sm:$0xff] }
  0x34   : > { %v250_v11 = vsel %vm245_vm0, %v240_v8, 0  ;;  %v5154_v14 = vpack.c.bf16 %v262_v4, %v259_v3  ;;  %v5156_v15 = vand.u32 4294901760, %v247_v10  ;;  %v5160_v17 = vsub.f32 %v243_v0, %v259_v3  ;;  %v4138_v60 = vld [vmem:[%s5130_s9 + $0x20] sm:$0xff]  ;;  %v4139_v61 = vld [vmem:[%s5130_s9 + $0x28] sm:$0xff]  ;;  %v4140_v62 = vld [vmem:[%s5130_s9 + $0x30] sm:$0xff]  ;;  %s5837_s28 = smov (!%p226_p7, %s4131_s28), 7 }
  0x35   : > { %v5158_v16 = vand.u32 4294901760, %v250_v11  ;;  %v5162_v18 = vpack.c.bf16 %v873_v9, %v870_v6  ;;  %v5164_v19 = vsub.f32 %v244_v1, %v262_v4  ;;  %v253_v20 = vsel %vm245_vm0, %v241_v12, 0  ;;  %v4141_v63 = vld [vmem:[%s5130_s9 + $0x38] sm:$0xff]  ;;  %s4162_s29 = sshll.u32 %s5837_s28, 4  ;;  %s4907_s5 = smul.u32 48, %s5837_s28 }
  0x36   : > { %v256_v21 = vsel %vm245_vm0, %v242_v13, 0  ;;  %4548 = vmatprep.subr.bf16.mxu0 %v5154_v14  ;;  %v5170_v22 = vsub.f32 %v247_v10, %v5156_v15  ;;  %v368_v24 = vand.u32 4294901760, %v5160_v17  ;;  %v5176_v25 = vand.u32 4294901760, %v253_v20  ;;  %s5740_s6 = scalar_lea.vmem %s5827_s3, %s4162_s29 }
  0x37   : > { %v5173_v23 = vsub.f32 %v250_v11, %v5158_v16  ;;  %4572 = vmatprep.subr.bf16.mxu1 %v5162_v18  ;;  %4550 = vmatpush3.bf16.msra.mxu0 %v5154_v14  ;;  %v375_v26 = vand.u32 4294901760, %v5164_v19  ;;  %v5181_v27 = vand.u32 4294901760, %v256_v21  ;;  %v978_v28 = vsub.f32 %v4136_v2, %v870_v6  ;;  %s5745_s18 = scalar_lea.vmem %s5828_s4, %s4907_s5 }
  0x38   : > { %v985_v29 = vsub.f32 %v4137_v5, %v873_v9  ;;  %4574 = vmatpush3.bf16.msra.mxu1 %v5162_v18  ;;  %v5185_v30 = vand.u32 4294901760, %v5170_v22  ;;  %v369_v32 = vsub.f32 %v5160_v17, %v368_v24  ;;  %v5194_v33 = vsub.f32 %v253_v20, %v5176_v25 }
  0x39   : > { %v5188_v31 = vand.u32 4294901760, %v5173_v23  ;;  %v376_v34 = vsub.f32 %v5164_v19, %v375_v26  ;;  %v5198_v35 = vsub.f32 %v256_v21, %v5181_v27  ;;  %v979_v36 = vand.u32 4294901760, %v978_v28 }
  0x3a   : > { %v986_v37 = vand.u32 4294901760, %v985_v29  ;;  %v328_v38 = vsub.f32 %v5170_v22, %v5185_v30  ;;  %v370_v40 = vand.u32 4294901760, %v369_v32  ;;  %v5205_v41 = vand.u32 4294901760, %v5194_v33 }
  0x3b   : > { %v338_v39 = vsub.f32 %v5173_v23, %v5188_v31  ;;  %v377_v42 = vand.u32 4294901760, %v376_v34  ;;  %v5208_v43 = vand.u32 4294901760, %v5198_v35  ;;  %v980_v44 = vsub.f32 %v978_v28, %v979_v36 }
  0x3c   : > { %v987_v45 = vsub.f32 %v985_v29, %v986_v37  ;;  %v5210_v46 = vand.u32 4294901760, %v328_v38  ;;  %v348_v48 = vsub.f32 %v5194_v33, %v5205_v41  ;;  %v4555_v54 = vpack.c.bf16 %v5164_v19, %v5160_v17 }
  0x3d   : > { %v5212_v47 = vand.u32 4294901760, %v338_v39  ;;  %v4551_v49 = vpack.c.bf16 %v377_v42, %v370_v40  ;;  %v358_v50 = vsub.f32 %v5198_v35, %v5208_v43  ;;  %v981_v51 = vand.u32 4294901760, %v980_v44 }
  0x3e   : > { %v988_v52 = vand.u32 4294901760, %v987_v45  ;;  %4311 = vmatprep.mubr.f32.mxu0 %v5210_v46  ;;  %4371 = vmatprep.mubr.f32.mxu1 %v5210_v46  ;;  %v5220_v53 = vand.u32 4294901760, %v348_v48  ;;  %v4579_v57 = vpack.c.bf16 %v985_v29, %v978_v28  ;;  %v4563_v58 = vpack.c.bf16 %v375_v26, %v368_v24 }
  0x3f   : > { %4312 = vmatmul.mubr.f32.vlgmr.msra.gmra.mrb[0].mxu0 %v5212_v47  ;;  %4552 = vmatprep.subr.bf16.mxu0 %v4551_v49  ;;  %v5225_v55 = vand.u32 4294901760, %v358_v50  ;;  %v4587_v59 = vpack.c.bf16 %v986_v37, %v979_v36  ;;  %v1482_v0 = vand.u32 4294901760, %v4138_v60  ;;  %v1485_v1 = vand.u32 4294901760, %v4139_v61 }
  0x40   : > { %v4575_v56 = vpack.c.bf16 %v988_v52, %v981_v51  ;;  %4372 = vmatmul.mubr.f32.vlgmr.msra.gmra.mrb[0].mxu1 %v5212_v47  ;;  %4554 = vmatpush3.bf16.msra.mxu0 %v4551_v49  ;;  %v2094_v2 = vand.u32 4294901760, %v4140_v62  ;;  %v2097_v3 = vand.u32 4294901760, %v4141_v63  ;;  %vm3982_vm2 = vcmask 111616  }
  0x41   : > { %4314 = vmatprep.mubr.f32.mxu0 %v5220_v53  ;;  %4374 = vmatprep.mubr.f32.mxu1 %v5220_v53  ;;  %v5260_v4 = vsub.f32 %v4138_v60, %v1482_v0  ;;  %v5262_v5 = vsub.f32 %v4139_v61, %v1485_v1  ;;  %v5282_v12 = vpack.c.bf16 %v1485_v1, %v1482_v0 }
  0x42   : > { %4576 = vmatprep.subr.bf16.mxu1 %v4575_v56  ;;  %4556 = vmatprep.subr.bf16.mxu0 %v4555_v54  ;;  %v5265_v6 = vsub.f32 %v4140_v62, %v2094_v2  ;;  %v5267_v7 = vsub.f32 %v4141_v63, %v2097_v3  ;;  %v5291_v19 = vpack.c.bf16 %v2097_v3, %v2094_v2 }
  0x43   : > { %4315 = vmatmul.mubr.f32.gmra.mrb[2].mxu0 %v5225_v55  ;;  %4578 = vmatpush3.bf16.msra.mxu1 %v4575_v56  ;;  %v1591_v8 = vand.u32 4294901760, %v5260_v4  ;;  %v1598_v9 = vand.u32 4294901760, %v5262_v5  ;;  %v4603_v32 = vpack.c.bf16 %v5262_v5, %v5260_v4 }
  0x44   : > { %4375 = vmatmul.mubr.f32.gmra.mrb[2].mxu1 %v5225_v55  ;;  %4321 = vmatprep.mubr.f32.mxu0 %v5156_v15  ;;  %v2203_v10 = vand.u32 4294901760, %v5265_v6  ;;  %v2210_v11 = vand.u32 4294901760, %v5267_v7  ;;  %v4627_v34 = vpack.c.bf16 %v5267_v7, %v5265_v6 }
  0x45   : > { %4381 = vmatprep.mubr.f32.mxu1 %v5156_v15  ;;  %4580 = vmatprep.subr.bf16.mxu1 %v4579_v57  ;;  %v1592_v13 = vsub.f32 %v5260_v4, %v1591_v8  ;;  %v1599_v17 = vsub.f32 %v5262_v5, %v1598_v9  ;;  %v4611_v36 = vpack.c.bf16 %v1598_v9, %v1591_v8 }
  0x46   : > { %v2204_v20 = vsub.f32 %v5265_v6, %v2203_v10  ;;  %v2211_v21 = vsub.f32 %v5267_v7, %v2210_v11  ;;  %v4635_v37 = vpack.c.bf16 %v2210_v11, %v2203_v10 }
  0x47   : > { %4322 = vmatmul.mubr.f32.vlgmr.msra.gmra.mrb[0].mxu0 %v5158_v16  ;;  %v1593_v24 = vand.u32 4294901760, %v1592_v13  ;;  %v1600_v26 = vand.u32 4294901760, %v1599_v17 }
  0x48   : > { %4382 = vmatmul.mubr.f32.vlgmr.msra.gmra.mrb[0].mxu1 %v5158_v16  ;;  %4558 = vmatpush3.bf16.msra.mxu0 %v4555_v54  ;;  %v2205_v28 = vand.u32 4294901760, %v2204_v20  ;;  %v2212_v29 = vand.u32 4294901760, %v2211_v21 }
  0x49   : > { %4324 = vmatprep.mubr.f32.mxu0 %v5176_v25  ;;  %4384 = vmatprep.mubr.f32.mxu1 %v5176_v25 }
  0x4a   : > { %4582 = vmatpush3.bf16.msra.mxu1 %v4579_v57  ;;  %4560 = vmatprep.subr.bf16.mxu0 %v5154_v14 }
  0x4b   : > { %4325 = vmatmul.mubr.f32.gmra.mrb[2].mxu0 %v5181_v27  ;;  %4584 = vmatprep.subr.bf16.mxu1 %v5162_v18 }
  0x4c   : > { %4385 = vmatmul.mubr.f32.gmra.mrb[2].mxu1 %v5181_v27  ;;  %4331 = vmatprep.mubr.f32.mxu0 %v5170_v22 }
  0x4d   : > { %4391 = vmatprep.mubr.f32.mxu1 %v5170_v22 }
  0x4f   : > { %4332 = vmatmul.mubr.f32.vlgmr.msra.gmra.mrb[0].mxu0 %v5173_v23 }
  0x50   : > { %4392 = vmatmul.mubr.f32.vlgmr.msra.gmra.mrb[0].mxu1 %v5173_v23  ;;  %4562 = vmatpush3.bf16.msra.mxu0 %v5154_v14 }
  0x51   : > { %4334 = vmatprep.mubr.f32.mxu0 %v5194_v33  ;;  %4394 = vmatprep.mubr.f32.mxu1 %v5194_v33 }
  0x52   : > { %4586 = vmatpush3.bf16.msra.mxu1 %v5162_v18  ;;  %4564 = vmatprep.subr.bf16.mxu0 %v4563_v58 }
  0x53   : > { %4335 = vmatmul.mubr.f32.gmra.mrb[2].mxu0 %v5198_v35  ;;  %4588 = vmatprep.subr.bf16.mxu1 %v4587_v59 }
  0x54   : > { %4395 = vmatmul.mubr.f32.gmra.mrb[2].mxu1 %v5198_v35  ;;  %4341 = vmatprep.mubr.f32.mxu0 %v5185_v30 }
  0x55   : > { %4401 = vmatprep.mubr.f32.mxu1 %v5185_v30 }
  0x57   : > { %4342 = vmatmul.mubr.f32.vlgmr.msra.gmra.mrb[0].mxu0 %v5188_v31 }
  0x58   : > { %4402 = vmatmul.mubr.f32.vlgmr.msra.gmra.mrb[0].mxu1 %v5188_v31  ;;  %4566 = vmatpush3.bf16.msra.mxu0 %v4563_v58 }
  0x59   : > { %4344 = vmatprep.mubr.f32.mxu0 %v5205_v41  ;;  %4404 = vmatprep.mubr.f32.mxu1 %v5205_v41 }
  0x5a   : > { %4590 = vmatpush3.bf16.msra.mxu1 %v4587_v59  ;;  %4568 = vmatprep.subr.bf16.mxu0 %v5154_v14 }
  0x5b   : > { %4345 = vmatmul.mubr.f32.gmra.mrb[2].mxu0 %v5208_v43  ;;  %4592 = vmatprep.subr.bf16.mxu1 %v5162_v18 }
  0x5c   : > { %4405 = vmatmul.mubr.f32.gmra.mrb[2].mxu1 %v5208_v43  ;;  %4351 = vmatprep.mubr.f32.mxu0 %v5156_v15 }
  0x5d   : > { %4411 = vmatprep.mubr.f32.mxu1 %v5156_v15 }
  0x5f   : > { %4352 = vmatmul.mubr.f32.vlgmr.msra.gmra.mrb[0].mxu0 %v5158_v16 }
  0x60   : > { %4412 = vmatmul.mubr.f32.vlgmr.msra.gmra.mrb[0].mxu1 %v5158_v16  ;;  %4570 = vmatpush3.bf16.msra.mxu0 %v5154_v14  ;;  %v4599_v14 = vpack.c.bf16 %v1600_v26, %v1593_v24 }
  0x61   : > { %4354 = vmatprep.mubr.f32.mxu0 %v5176_v25  ;;  %4414 = vmatprep.mubr.f32.mxu1 %v5176_v25 }
  0x62   : > { %4594 = vmatpush3.bf16.msra.mxu1 %v5162_v18  ;;  %4596 = vmatprep.subr.bf16.mxu0 %v5282_v12  ;;  %v4623_v18 = vpack.c.bf16 %v2212_v29, %v2205_v28 }
  0x63   : > { %4355 = vmatmul.mubr.f32.gmra.mrb[2].mxu0 %v5181_v27  ;;  %4620 = vmatprep.subr.bf16.mxu1 %v5291_v19 }
  0x64   : > { %4415 = vmatmul.mubr.f32.gmra.mrb[2].mxu1 %v5181_v27  ;;  %4361 = vmatprep.mubr.f32.mxu0 %v5156_v15 }
  0x65   : > { %4421 = vmatprep.mubr.f32.mxu1 %v5156_v15 }
  0x67   : > { %4362 = vmatmul.mubr.f32.vlgmr.msra.gmra.mrb[0].mxu0 %v5158_v16 }
  0x68   : > { %4422 = vmatmul.mubr.f32.vlgmr.msra.gmra.mrb[0].mxu1 %v5158_v16  ;;  %4598 = vmatpush3.bf16.msra.mxu0 %v5282_v12 }
  0x69   : > { %4364 = vmatprep.mubr.f32.mxu0 %v5176_v25  ;;  %4424 = vmatprep.mubr.f32.mxu1 %v5176_v25 }
  0x6a   : > { %4622 = vmatpush3.bf16.msra.mxu1 %v5291_v19  ;;  %4600 = vmatprep.subr.bf16.mxu0 %v4599_v14 }
  0x6b   : > { %4365 = vmatmul.mubr.f32.gmra.mrb[2].mxu0 %v5181_v27  ;;  %4624 = vmatprep.subr.bf16.mxu1 %v4623_v18 }
  0x6c   : > { %4425 = vmatmul.mubr.f32.gmra.mrb[2].mxu1 %v5181_v27  ;;  %4431 = vmatprep.mubr.f32.mxu0 %v5210_v46 }
  0x6d   : > { %4491 = vmatprep.mubr.f32.mxu1 %v5210_v46 }
  0x6f   : > { %4432 = vmatmul.mubr.f32.vlgmr.msra.gmra.mrb[4].mxu0 %v5212_v47 }
  0x70   : > { %4492 = vmatmul.mubr.f32.vlgmr.msra.gmra.mrb[4].mxu1 %v5212_v47  ;;  %4602 = vmatpush3.bf16.msra.mxu0 %v4599_v14 }
  0x71   : > { %4434 = vmatprep.mubr.f32.mxu0 %v5220_v53  ;;  %4494 = vmatprep.mubr.f32.mxu1 %v5220_v53 }
  0x72   : > { %4626 = vmatpush3.bf16.msra.mxu1 %v4623_v18  ;;  %4604 = vmatprep.subr.bf16.mxu0 %v4603_v32 }
  0x73   : > { %4435 = vmatmul.mubr.f32.gmra.mrb[6].mxu0 %v5225_v55  ;;  %4628 = vmatprep.subr.bf16.mxu1 %v4627_v34 }
  0x74   : > { %4495 = vmatmul.mubr.f32.gmra.mrb[6].mxu1 %v5225_v55  ;;  %4441 = vmatprep.mubr.f32.mxu0 %v5156_v15 }
  0x75   : > { %4501 = vmatprep.mubr.f32.mxu1 %v5156_v15 }
  0x77   : > { %4442 = vmatmul.mubr.f32.vlgmr.msra.gmra.mrb[4].mxu0 %v5158_v16 }
  0x78   : > { %4502 = vmatmul.mubr.f32.vlgmr.msra.gmra.mrb[4].mxu1 %v5158_v16  ;;  %4606 = vmatpush3.bf16.msra.mxu0 %v4603_v32 }
  0x79   : > { %4444 = vmatprep.mubr.f32.mxu0 %v5176_v25  ;;  %4504 = vmatprep.mubr.f32.mxu1 %v5176_v25 }
  0x7a   : > { %4630 = vmatpush3.bf16.msra.mxu1 %v4627_v34  ;;  %4608 = vmatprep.subr.bf16.mxu0 %v5282_v12 }
  0x7b   : > { %4445 = vmatmul.mubr.f32.gmra.mrb[6].mxu0 %v5181_v27  ;;  %4632 = vmatprep.subr.bf16.mxu1 %v5291_v19 }
  0x7c   : > { %4505 = vmatmul.mubr.f32.gmra.mrb[6].mxu1 %v5181_v27  ;;  %4451 = vmatprep.mubr.f32.mxu0 %v5170_v22 }
  0x7d   : > { %4511 = vmatprep.mubr.f32.mxu1 %v5170_v22  ;;  %v2703_v22 = vld [vmem:[%s5826_s2 + $0x8] sm:$0xff] }
  0x7f   : > { %4452 = vmatmul.mubr.f32.vlgmr.msra.gmra.mrb[4].mxu0 %v5173_v23 }
  0x80   : > { %4512 = vmatmul.mubr.f32.vlgmr.msra.gmra.mrb[4].mxu1 %v5173_v23  ;;  %4610 = vmatpush3.bf16.msra.mxu0 %v5282_v12  ;;  %v2754_v23 = vand.u32 4294901760, %v2703_v22 }
  0x81   : > { %4454 = vmatprep.mubr.f32.mxu0 %v5194_v33  ;;  %4514 = vmatprep.mubr.f32.mxu1 %v5194_v33 }
  0x82   : > { %4634 = vmatpush3.bf16.msra.mxu1 %v5291_v19  ;;  %4612 = vmatprep.subr.bf16.mxu0 %v4611_v36 }
  0x83   : > { %4455 = vmatmul.mubr.f32.gmra.mrb[6].mxu0 %v5198_v35  ;;  %4636 = vmatprep.subr.bf16.mxu1 %v4635_v37 }
  0x84   : > { %4515 = vmatmul.mubr.f32.gmra.mrb[6].mxu1 %v5198_v35  ;;  %4461 = vmatprep.mubr.f32.mxu0 %v5185_v30 }
  0x85   : > { %4521 = vmatprep.mubr.f32.mxu1 %v5185_v30 }
  0x87   : > { %4462 = vmatmul.mubr.f32.vlgmr.msra.gmra.mrb[4].mxu0 %v5188_v31 }
  0x88   : > { %4522 = vmatmul.mubr.f32.vlgmr.msra.gmra.mrb[4].mxu1 %v5188_v31  ;;  %4614 = vmatpush3.bf16.msra.mxu0 %v4611_v36 }
  0x89   : > { %4464 = vmatprep.mubr.f32.mxu0 %v5205_v41  ;;  %4524 = vmatprep.mubr.f32.mxu1 %v5205_v41  ;;  %v5412_v41 = vsub.f32 %v2703_v22, %v2754_v23 }
  0x8a   : > { %4638 = vmatpush3.bf16.msra.mxu1 %v4635_v37  ;;  %4616 = vmatprep.subr.bf16.mxu0 %v5282_v12 }
  0x8b   : > { %4465 = vmatmul.mubr.f32.gmra.mrb[6].mxu0 %v5208_v43  ;;  %4640 = vmatprep.subr.bf16.mxu1 %v5291_v19 }
  0x8c   : > { %4525 = vmatmul.mubr.f32.gmra.mrb[6].mxu1 %v5208_v43  ;;  %4471 = vmatprep.mubr.f32.mxu0 %v5156_v15  ;;  %v3001_v43 = vand.u32 4294901760, %v5412_v41 }
  0x8d   : > { %4531 = vmatprep.mubr.f32.mxu1 %v5156_v15 }
  0x8e   : > { %v3002_v47 = vsub.f32 %v5412_v41, %v3001_v43 }
  0x8f   : > { %4472 = vmatmul.mubr.f32.vlgmr.msra.gmra.mrb[4].mxu0 %v5158_v16 }
  0x90   : > { %4532 = vmatmul.mubr.f32.vlgmr.msra.gmra.mrb[4].mxu1 %v5158_v16  ;;  %4618 = vmatpush3.bf16.msra.mxu0 %v5282_v12  ;;  %v3003_v53 = vand.u32 4294901760, %v3002_v47 }
  0x91   : > { %4474 = vmatprep.mubr.f32.mxu0 %v5176_v25  ;;  %4534 = vmatprep.mubr.f32.mxu1 %v5176_v25 }
  0x92   : > { %4642 = vmatpush3.bf16.msra.mxu1 %v5291_v19 }
  0x93   : > { %4475 = vmatmul.mubr.f32.gmra.mrb[6].mxu0 %v5181_v27 }
  0x94   : > { %4535 = vmatmul.mubr.f32.gmra.mrb[6].mxu1 %v5181_v27  ;;  %4481 = vmatprep.mubr.f32.mxu0 %v5156_v15 }
  0x95   : > { %4541 = vmatprep.mubr.f32.mxu1 %v5156_v15  ;;  %v2705_v15 = vld [vmem:[%s5826_s2 + $0x18] sm:$0xff] }
  0x96   : > { %v2758_v30 = vand.u32 4294901760, %v2705_v15 }
  0x97   : > { %4482 = vmatmul.mubr.f32.vlgmr.msra.gmra.mrb[4].mxu0 %v5158_v16 }
  0x98   : > { %4542 = vmatmul.mubr.f32.vlgmr.msra.gmra.mrb[4].mxu1 %v5158_v16  ;;  %4484 = vmatprep.mubr.f32.mxu0 %v5176_v25  ;;  %v2702_v16 = vld [vmem:[%s5826_s2] sm:$0xff]  ;;  %v5400_v35 = vpack.c.bf16 %v2758_v30, %v2754_v23  ;;  %v5414_v42 = vsub.f32 %v2705_v15, %v2758_v30 }
  0x99   : > { %4544 = vmatprep.mubr.f32.mxu1 %v5176_v25  ;;  %v2704_v25 = vld [vmem:[%s5826_s2 + $0x10] sm:$0xff]  ;;  %v2756_v31 = vand.u32 4294901760, %v2702_v16 }
  0x9a   : > { %v2760_v33 = vand.u32 4294901760, %v2704_v25  ;;  %4656 = vmatprep.subr.bf16.mxu0 %v5400_v35  ;;  %4644 = vmatprep.subr.bf16.mxu1 %v5400_v35  ;;  %v3013_v44 = vand.u32 4294901760, %v5414_v42  ;;  %v4651_v59 = vpack.c.bf16 %v5414_v42, %v5412_v41 }
  0x9b   : > { %4485 = vmatmul.mubr.f32.gmra.mrb[6].mxu0 %v5181_v27  ;;  %v5402_v38 = vsub.f32 %v2702_v16, %v2756_v31 }
  0x9c   : > { %4545 = vmatmul.mubr.f32.gmra.mrb[6].mxu1 %v5181_v27  ;;  %v5019_v27 = vmov 0.0   ;;  %v5404_v39 = vpack.c.bf16 %v2760_v33, %v2756_v31  ;;  %v5406_v40 = vsub.f32 %v2704_v25, %v2760_v33  ;;  %v3014_v48 = vsub.f32 %v5414_v42, %v3013_v44 }
  0x9d   : > { %3465 = vmatprep.mubr.f32.mxu0 %v5019_v27  ;;  %2822 = vmatprep.mubr.f32.mxu1 %v5019_v27  ;;  %v3007_v45 = vand.u32 4294901760, %v5402_v38  ;;  %v4659_v49 = vpack.c.bf16 %v3013_v44, %v3001_v43 }
  0x9e   : > { %4658 = vmatpush1.bf16.msra.mxu0 %v5404_v39  ;;  %4646 = vmatpush1.bf16.msra.mxu1 %v5404_v39  ;;  %v3019_v46 = vand.u32 4294901760, %v5406_v40  ;;  %v3015_v54 = vand.u32 4294901760, %v3014_v48  ;;  %v4653_v60 = vpack.c.bf16 %v5406_v40, %v5402_v38 }
  0x9f   : > { %v3008_v50 = vsub.f32 %v5402_v38, %v3007_v45  ;;  %4660 = vmatprep.subr.bf16.mxu0 %v4659_v49 }
  0xa0   : > { %v3020_v51 = vsub.f32 %v5406_v40, %v3019_v46  ;;  %v4661_v52 = vpack.c.bf16 %v3019_v46, %v3007_v45  ;;  %v4647_v57 = vpack.c.bf16 %v3015_v54, %v3003_v53 }
  0xa1   : > { %v3009_v55 = vand.u32 4294901760, %v3008_v50 }
  0xa2   : > { %v3021_v56 = vand.u32 4294901760, %v3020_v51  ;;  %4648 = vmatprep.subr.bf16.mxu1 %v4647_v57 }
  0xa4   : > { %v4649_v58 = vpack.c.bf16 %v3021_v56, %v3009_v55 }
 0x13a   : > { %v4363_v61 = vpop.f32.mrb[0].mxu0 }
 0x13b   : > { %847 = vst.msk [vmem:[#allocation2 + $0x8] sm:$0xff] %vm245_vm0, %v4363_v61  ;;  %v4423_v62 = vpop.f32.mrb[0].mxu1  ;;  %v824_v63 = vpop.f32.mrb[1].mxu0 }
 0x13c   : > { %1459 = vst.msk [vmem:[#allocation2 + $0x28] sm:$0xff] %vm245_vm0, %v4423_v62  ;;  %846 = vst.msk [vmem:[#allocation2] sm:$0xff] %vm245_vm0, %v824_v63  ;;  %v1435_v0 = vpop.f32.mrb[1].mxu1 }
 0x13d   : > { %1458 = vst.msk [vmem:[#allocation2 + $0x20] sm:$0xff] %vm245_vm0, %v1435_v0 }
 0x13e   : > { %v4366_v1 = vpop.f32.mrb[2].mxu0 }
 0x13f   : > { %849 = vst.msk [vmem:[#allocation2 + $0x18] sm:$0xff] %vm245_vm0, %v4366_v1  ;;  %v4426_v2 = vpop.f32.mrb[2].mxu1  ;;  %v836_v3 = vpop.f32.mrb[3].mxu0 }
 0x140   : > { %1461 = vst.msk [vmem:[#allocation2 + $0x38] sm:$0xff] %vm245_vm0, %v4426_v2  ;;  %848 = vst.msk [vmem:[#allocation2 + $0x10] sm:$0xff] %vm245_vm0, %v836_v3  ;;  %v1447_v4 = vpop.f32.mrb[3].mxu1 }
 0x141   : > { %1460 = vst.msk [vmem:[#allocation2 + $0x30] sm:$0xff] %vm245_vm0, %v1447_v4 }
 0x142   : > { %v2687_v5 = vld [vmem:[#allocation2 + $0x8] sm:$0xff] }
 0x143   : > { %v2686_v6 = vld [vmem:[#allocation2] sm:$0xff]  ;;  %v2710_v7 = vsel %vm245_vm0, %v2687_v5, 0  ;;  %v2691_v18 = vld [vmem:[#allocation2 + $0x28] sm:$0xff] }
 0x144   : > { %v2707_v8 = vsel %vm245_vm0, %v2686_v6, 0  ;;  %v5438_v9 = vand.u32 4294901760, %v2710_v7  ;;  %v2690_v11 = vld [vmem:[#allocation2 + $0x20] sm:$0xff]  ;;  %v2722_v37 = vsel %vm245_vm0, %v2691_v18, 0 }
 0x145   : > { %v5440_v10 = vand.u32 4294901760, %v2707_v8  ;;  %v2719_v24 = vsel %vm245_vm0, %v2690_v11, 0  ;;  %v5473_v25 = vand.u32 4294901760, %v2722_v37 }
 0x146   : > { %v5443_v12 = vsub.f32 %v2710_v7, %v5438_v9  ;;  %v2689_v13 = vld [vmem:[#allocation2 + $0x18] sm:$0xff]  ;;  %v5462_v36 = vand.u32 4294901760, %v2719_v24 }
 0x147   : > { %v5446_v17 = vsub.f32 %v2707_v8, %v5440_v10  ;;  %v2688_v19 = vld [vmem:[#allocation2 + $0x10] sm:$0xff]  ;;  %v2716_v20 = vsel %vm245_vm0, %v2689_v13, 0  ;;  %v2693_v43 = vld [vmem:[#allocation2 + $0x38] sm:$0xff]  ;;  %v5484_v44 = vsub.f32 %v2722_v37, %v5473_v25 }
 0x148   : > { %v2713_v21 = vsel %vm245_vm0, %v2688_v19, 0  ;;  %v2836_v28 = vand.u32 4294901760, %v5443_v12  ;;  %v5455_v14 = vand.u32 4294901760, %v2716_v20  ;;  %v2692_v30 = vld [vmem:[#allocation2 + $0x30] sm:$0xff]  ;;  %v5478_v42 = vsub.f32 %v2719_v24, %v5462_v36 }
 0x149   : > { %v2825_v26 = vand.u32 4294901760, %v5446_v17  ;;  %v5453_v29 = vand.u32 4294901760, %v2713_v21  ;;  %v2728_v49 = vsel %vm245_vm0, %v2693_v43, 0  ;;  %v2880_v50 = vand.u32 4294901760, %v5484_v44 }
 0x14a   : > { %v2837_v15 = vsub.f32 %v5443_v12, %v2836_v28  ;;  %v5468_v23 = vsub.f32 %v2716_v20, %v5455_v14  ;;  %v2869_v47 = vand.u32 4294901760, %v5478_v42  ;;  %v5498_v54 = vand.u32 4294901760, %v2728_v49 }
 0x14b   : > { %3469 = vmatmul.mubr.f32.vlgmr.msra.gmra.mrb[8].mxu0 %v2825_v26  ;;  %v2826_v32 = vsub.f32 %v5446_v17, %v2825_v26  ;;  %v5459_v34 = vsub.f32 %v2713_v21, %v5453_v29  ;;  %v2881_v56 = vsub.f32 %v5484_v44, %v2880_v50 }
 0x14c   : > { %3474 = vmatprep.mubr.f32.mxu0 %v5019_v27  ;;  %4662 = vmatpush1.bf16.msra.mxu0 %v4661_v52  ;;  %v2838_v31 = vand.u32 4294901760, %v2837_v15  ;;  %v2858_v41 = vand.u32 4294901760, %v5468_v23  ;;  %v2870_v52 = vsub.f32 %v5478_v42, %v2869_v47 }
 0x14d   : > { %v2827_v22 = vand.u32 4294901760, %v2826_v32  ;;  %v2847_v16 = vand.u32 4294901760, %v5459_v34  ;;  %4664 = vmatprep.subr.bf16.mxu0 %v5400_v35  ;;  %v2725_v35 = vsel %vm245_vm0, %v2692_v30, 0 }
 0x14e   : > { %v2859_v46 = vsub.f32 %v5468_v23, %v2858_v41  ;;  %v5488_v48 = vand.u32 4294901760, %v2725_v35  ;;  %v2871_v55 = vand.u32 4294901760, %v2870_v52 }
 0x14f   : > { %2828 = vmatmul.mubr.f32.vlgmr.msra.gmra.mrb[8].mxu1 %v2827_v22  ;;  %3478 = vmatmul.mubr.f32.gmra.mrb[10].mxu0 %v2836_v28  ;;  %v2848_v33 = vsub.f32 %v5459_v34, %v2847_v16 }
 0x150   : > { %2833 = vmatprep.mubr.f32.mxu1 %v5019_v27  ;;  %3483 = vmatprep.mubr.f32.mxu0 %v5019_v27  ;;  %v2860_v51 = vand.u32 4294901760, %v2859_v46  ;;  %v5496_v53 = vsub.f32 %v2725_v35, %v5488_v48 }
 0x151   : > { %4650 = vmatpush1.bf16.msra.mxu1 %v4649_v58  ;;  %v2849_v45 = vand.u32 4294901760, %v2848_v33  ;;  %v5505_v58 = vsub.f32 %v2728_v49, %v5498_v54 }
 0x152   : > { %4652 = vmatprep.subr.bf16.mxu1 %v4651_v59  ;;  %v2891_v57 = vand.u32 4294901760, %v5496_v53  ;;  %v2882_v59 = vand.u32 4294901760, %v2881_v56 }
 0x153   : > { %2839 = vmatmul.mubr.f32.gmra.mrb[10].mxu1 %v2838_v31  ;;  %3487 = vmatmul.mubr.f32.gmra.mrb[12].mxu0 %v2847_v16  ;;  %v2902_v62 = vand.u32 4294901760, %v5505_v58 }
 0x154   : > { %2844 = vmatprep.mubr.f32.mxu1 %v5019_v27  ;;  %3492 = vmatprep.mubr.f32.mxu0 %v5019_v27  ;;  %v2892_v61 = vsub.f32 %v5496_v53, %v2891_v57 }
 0x155   : > { %v2903_v0 = vsub.f32 %v5505_v58, %v2902_v62 }
 0x156   : > { %v2893_v63 = vand.u32 4294901760, %v2892_v61 }
 0x157   : > { %2850 = vmatmul.mubr.f32.gmra.mrb[12].mxu1 %v2849_v45  ;;  %3496 = vmatmul.mubr.f32.gmra.mrb[14].mxu0 %v2858_v41  ;;  %v2904_v1 = vand.u32 4294901760, %v2903_v0 }
 0x158   : > { %2855 = vmatprep.mubr.f32.mxu1 %v5019_v27  ;;  %3501 = vmatprep.mubr.f32.mxu0 %v5019_v27 }
 0x15b   : > { %2861 = vmatmul.mubr.f32.gmra.mrb[14].mxu1 %v2860_v51  ;;  %3505 = vmatmul.mubr.f32.gmra.mrb[16].mxu0 %v2869_v47 }
 0x15c   : > { %2866 = vmatprep.mubr.f32.mxu1 %v5019_v27  ;;  %3510 = vmatprep.mubr.f32.mxu0 %v5019_v27 }
 0x15f   : > { %2872 = vmatmul.mubr.f32.gmra.mrb[16].mxu1 %v2871_v55  ;;  %3514 = vmatmul.mubr.f32.gmra.mrb[18].mxu0 %v2880_v50 }
 0x160   : > { %2877 = vmatprep.mubr.f32.mxu1 %v5019_v27  ;;  %3519 = vmatprep.mubr.f32.mxu0 %v5019_v27 }
 0x163   : > { %2883 = vmatmul.mubr.f32.gmra.mrb[18].mxu1 %v2882_v59  ;;  %3523 = vmatmul.mubr.f32.gmra.mrb[20].mxu0 %v2891_v57 }
 0x164   : > { %2888 = vmatprep.mubr.f32.mxu1 %v5019_v27  ;;  %3528 = vmatprep.mubr.f32.mxu0 %v5019_v27 }
 0x167   : > { %2894 = vmatmul.mubr.f32.gmra.mrb[20].mxu1 %v2893_v63  ;;  %3532 = vmatmul.mubr.f32.gmra.mrb[22].mxu0 %v2902_v62 }
 0x168   : > { %2899 = vmatprep.mubr.f32.mxu1 %v5019_v27  ;;  %3537 = vmatprep.mubr.f32.mxu0 %v5019_v27 }
 0x16a   : > { %v4483_v2 = vpop.f32.mrb[4].mxu0 }
 0x16b   : > { %2071 = vst.msk [vmem:[#allocation2 + $0x48] sm:$0xff] %vm245_vm0, %v4483_v2  ;;  %v4543_v3 = vpop.f32.mrb[4].mxu1  ;;  %v2047_v4 = vpop.f32.mrb[5].mxu0  ;;  %2905 = vmatmul.mubr.f32.gmra.mrb[22].mxu1 %v2904_v1 }
 0x16c   : > { %2683 = vst.msk [vmem:[#allocation2 + $0x68] sm:$0xff] %vm245_vm0, %v4543_v3  ;;  %2070 = vst.msk [vmem:[#allocation2 + $0x40] sm:$0xff] %vm245_vm0, %v2047_v4  ;;  %v2659_v5 = vpop.f32.mrb[5].mxu1  ;;  %2910 = vmatprep.mubr.f32.mxu1 %v5019_v27 }
 0x16d   : > { %2682 = vst.msk [vmem:[#allocation2 + $0x60] sm:$0xff] %vm245_vm0, %v2659_v5 }
 0x16e   : > { %v4486_v6 = vpop.f32.mrb[6].mxu0 }
 0x16f   : > { %2073 = vst.msk [vmem:[#allocation2 + $0x58] sm:$0xff] %vm245_vm0, %v4486_v6  ;;  %v4546_v7 = vpop.f32.mrb[6].mxu1  ;;  %v2059_v8 = vpop.f32.mrb[7].mxu0 }
 0x170   : > { %2685 = vst.msk [vmem:[#allocation2 + $0x78] sm:$0xff] %vm245_vm0, %v4546_v7  ;;  %2072 = vst.msk [vmem:[#allocation2 + $0x50] sm:$0xff] %vm245_vm0, %v2059_v8  ;;  %v2671_v11 = vpop.f32.mrb[7].mxu1 }
 0x171   : > { %2684 = vst.msk [vmem:[#allocation2 + $0x70] sm:$0xff] %vm245_vm0, %v2671_v11 }
 0x172   : > { %v2695_v13 = vld [vmem:[#allocation2 + $0x48] sm:$0xff] }
 0x173   : > { %v2694_v19 = vld [vmem:[#allocation2 + $0x40] sm:$0xff]  ;;  %v2734_v20 = vsel %vm245_vm0, %v2695_v13, 0  ;;  %v2699_v43 = vld [vmem:[#allocation2 + $0x68] sm:$0xff] }
 0x174   : > { %v2731_v21 = vsel %vm245_vm0, %v2694_v19, 0  ;;  %v5527_v24 = vand.u32 4294901760, %v2734_v20  ;;  %v2698_v28 = vld [vmem:[#allocation2 + $0x60] sm:$0xff]  ;;  %v2746_v49 = vsel %vm245_vm0, %v2699_v43, 0 }
 0x175   : > { %v5529_v26 = vand.u32 4294901760, %v2731_v21  ;;  %v2743_v30 = vsel %vm245_vm0, %v2698_v28, 0  ;;  %v5561_v57 = vand.u32 4294901760, %v2746_v49 }
 0x176   : > { %v5532_v18 = vsub.f32 %v2734_v20, %v5527_v24  ;;  %v2697_v32 = vld [vmem:[#allocation2 + $0x58] sm:$0xff]  ;;  %v5551_v47 = vand.u32 4294901760, %v2743_v30 }
 0x177   : > { %v5535_v37 = vsub.f32 %v2731_v21, %v5529_v26  ;;  %v2696_v22 = vld [vmem:[#allocation2 + $0x50] sm:$0xff]  ;;  %v2740_v15 = vsel %vm245_vm0, %v2697_v32, 0  ;;  %v2701_v1 = vld [vmem:[#allocation2 + $0x78] sm:$0xff]  ;;  %v5572_v2 = vsub.f32 %v2746_v49, %v5561_v57 }
 0x178   : > { %v2737_v16 = vsel %vm245_vm0, %v2696_v22, 0  ;;  %v2924_v33 = vand.u32 4294901760, %v5532_v18  ;;  %v5544_v35 = vand.u32 4294901760, %v2740_v15  ;;  %v2700_v56 = vld [vmem:[#allocation2 + $0x70] sm:$0xff]  ;;  %v5566_v63 = vsub.f32 %v2743_v30, %v5551_v47 }
 0x179   : > { %v2913_v31 = vand.u32 4294901760, %v5535_v37  ;;  %v5542_v41 = vand.u32 4294901760, %v2737_v16  ;;  %v2749_v0 = vsel %vm245_vm0, %v2700_v56, 0  ;;  %v2752_v7 = vsel %vm245_vm0, %v2701_v1, 0 }
 0x17a   : > { %v2925_v51 = vsub.f32 %v5532_v18, %v2924_v33  ;;  %v5557_v55 = vsub.f32 %v2740_v15, %v5544_v35  ;;  %v2957_v5 = vand.u32 4294901760, %v5566_v63  ;;  %v5576_v6 = vand.u32 4294901760, %v2749_v0 }
 0x17b   : > { %3541 = vmatmul.mubr.f32.gmra.mrb[24].mxu0 %v2913_v31  ;;  %v2914_v45 = vsub.f32 %v5535_v37, %v2913_v31  ;;  %v5548_v46 = vsub.f32 %v2737_v16, %v5542_v41  ;;  %v2968_v8 = vand.u32 4294901760, %v5572_v2  ;;  %v5586_v20 = vand.u32 4294901760, %v2752_v7 }
 0x17c   : > { %3546 = vmatprep.mubr.f32.mxu0 %v5019_v27  ;;  %v2926_v59 = vand.u32 4294901760, %v2925_v51  ;;  %v2946_v62 = vand.u32 4294901760, %v5557_v55  ;;  %v2958_v13 = vsub.f32 %v5566_v63, %v2957_v5  ;;  %v5584_v19 = vsub.f32 %v2749_v0, %v5576_v6 }
 0x17d   : > { %v2915_v50 = vand.u32 4294901760, %v2914_v45  ;;  %v2935_v52 = vand.u32 4294901760, %v5548_v46  ;;  %v2969_v28 = vsub.f32 %v5572_v2, %v2968_v8  ;;  %v5593_v22 = vsub.f32 %v2752_v7, %v5586_v20 }
 0x17e   : > { %v2947_v4 = vsub.f32 %v5557_v55, %v2946_v62  ;;  %v2959_v21 = vand.u32 4294901760, %v2958_v13  ;;  %v2979_v32 = vand.u32 4294901760, %v5584_v19 }
 0x17f   : > { %2916 = vmatmul.mubr.f32.gmra.mrb[24].mxu1 %v2915_v50  ;;  %3550 = vmatmul.mubr.f32.gmra.mrb[26].mxu0 %v2924_v33  ;;  %v2936_v61 = vsub.f32 %v5548_v46, %v2935_v52  ;;  %v2970_v15 = vand.u32 4294901760, %v2969_v28  ;;  %v2990_v30 = vand.u32 4294901760, %v5593_v22 }
 0x180   : > { %2921 = vmatprep.mubr.f32.mxu1 %v5019_v27  ;;  %3555 = vmatprep.mubr.f32.mxu0 %v5019_v27  ;;  %v2948_v11 = vand.u32 4294901760, %v2947_v4  ;;  %v2980_v16 = vsub.f32 %v5584_v19, %v2979_v32 }
 0x181   : > { %v2937_v3 = vand.u32 4294901760, %v2936_v61  ;;  %v2991_v33 = vsub.f32 %v5593_v22, %v2990_v30 }
 0x182   : > { %v2981_v31 = vand.u32 4294901760, %v2980_v16 }
 0x183   : > { %2927 = vmatmul.mubr.f32.gmra.mrb[26].mxu1 %v2926_v59  ;;  %3559 = vmatmul.mubr.f32.gmra.mrb[28].mxu0 %v2935_v52  ;;  %v2992_v43 = vand.u32 4294901760, %v2991_v33 }
 0x184   : > { %2932 = vmatprep.mubr.f32.mxu1 %v5019_v27  ;;  %3564 = vmatprep.mubr.f32.mxu0 %v5019_v27 }
 0x187   : > { %2938 = vmatmul.mubr.f32.gmra.mrb[28].mxu1 %v2937_v3  ;;  %3568 = vmatmul.mubr.f32.gmra.mrb[30].mxu0 %v2946_v62 }
 0x188   : > { %2943 = vmatprep.mubr.f32.mxu1 %v5019_v27  ;;  %3573 = vmatprep.mubr.f32.mxu0 %v5019_v27 }
 0x18b   : > { %2949 = vmatmul.mubr.f32.gmra.mrb[30].mxu1 %v2948_v11  ;;  %3577 = vmatmul.mubr.f32.gmra.mrb[32].mxu0 %v2957_v5 }
 0x18c   : > { %2954 = vmatprep.mubr.f32.mxu1 %v5019_v27  ;;  %3582 = vmatprep.mubr.f32.mxu0 %v5019_v27 }
 0x18f   : > { %2960 = vmatmul.mubr.f32.gmra.mrb[32].mxu1 %v2959_v21  ;;  %3586 = vmatmul.mubr.f32.gmra.mrb[34].mxu0 %v2968_v8 }
 0x190   : > { %2965 = vmatprep.mubr.f32.mxu1 %v5019_v27  ;;  %3591 = vmatprep.mubr.f32.mxu0 %v5019_v27 }
 0x193   : > { %2971 = vmatmul.mubr.f32.gmra.mrb[34].mxu1 %v2970_v15  ;;  %3595 = vmatmul.mubr.f32.gmra.mrb[36].mxu0 %v2979_v32 }
 0x194   : > { %2976 = vmatprep.mubr.f32.mxu1 %v5019_v27  ;;  %3600 = vmatprep.mubr.f32.mxu0 %v5019_v27 }
 0x197   : > { %2982 = vmatmul.mubr.f32.gmra.mrb[36].mxu1 %v2981_v31  ;;  %3604 = vmatmul.mubr.f32.gmra.mrb[38].mxu0 %v2990_v30 }
 0x198   : > { %2987 = vmatprep.mubr.f32.mxu1 %v5019_v27  ;;  %3686 = vmatprep.mubr.f32.mxu0 %v5019_v27 }
 0x19b   : > { %2993 = vmatmul.mubr.f32.gmra.mrb[38].mxu1 %v2992_v43  ;;  %3688 = vmatmul.mubr.f32.vlgmr.msra.gmra.mrb[8].mxu0 %v5440_v10 }
 0x19c   : > { %3083 = vmatprep.mubr.f32.mxu1 %v5019_v27  ;;  %3693 = vmatprep.mubr.f32.mxu0 %v5019_v27 }
 0x19d   : > { %4666 = vmatpush1.bf16.msra.mxu0 %v5404_v39 }
 0x19f   : > { %3085 = vmatmul.mubr.f32.vlgmr.msra.gmra.mrb[8].mxu1 %v5440_v10  ;;  %3695 = vmatmul.mubr.f32.gmra.mrb[10].mxu0 %v5438_v9 }
 0x1a0   : > { %4654 = vmatpush1.bf16.msra.mxu1 %v4653_v60  ;;  %3090 = vmatprep.mubr.f32.mxu1 %v5019_v27 }
 0x1a1   : > { %3700 = vmatprep.mubr.f32.mxu0 %v5019_v27 }
 0x1a3   : > { %3092 = vmatmul.mubr.f32.gmra.mrb[10].mxu1 %v5438_v9  ;;  %3702 = vmatmul.mubr.f32.gmra.mrb[12].mxu0 %v5453_v29 }
 0x1a4   : > { %3097 = vmatprep.mubr.f32.mxu1 %v5019_v27  ;;  %3707 = vmatprep.mubr.f32.mxu0 %v5019_v27 }
 0x1a7   : > { %3099 = vmatmul.mubr.f32.gmra.mrb[12].mxu1 %v5453_v29  ;;  %3709 = vmatmul.mubr.f32.gmra.mrb[14].mxu0 %v5455_v14 }
 0x1a8   : > { %3104 = vmatprep.mubr.f32.mxu1 %v5019_v27  ;;  %3714 = vmatprep.mubr.f32.mxu0 %v5019_v27 }
 0x1ab   : > { %3106 = vmatmul.mubr.f32.gmra.mrb[14].mxu1 %v5455_v14  ;;  %3716 = vmatmul.mubr.f32.gmra.mrb[16].mxu0 %v5462_v36 }
 0x1ac   : > { %3111 = vmatprep.mubr.f32.mxu1 %v5019_v27  ;;  %3721 = vmatprep.mubr.f32.mxu0 %v5019_v27 }
 0x1af   : > { %3113 = vmatmul.mubr.f32.gmra.mrb[16].mxu1 %v5462_v36  ;;  %3723 = vmatmul.mubr.f32.gmra.mrb[18].mxu0 %v5473_v25 }
 0x1b0   : > { %3118 = vmatprep.mubr.f32.mxu1 %v5019_v27  ;;  %3728 = vmatprep.mubr.f32.mxu0 %v5019_v27 }
 0x1b3   : > { %3120 = vmatmul.mubr.f32.gmra.mrb[18].mxu1 %v5473_v25  ;;  %3730 = vmatmul.mubr.f32.gmra.mrb[20].mxu0 %v5488_v48 }
 0x1b4   : > { %3125 = vmatprep.mubr.f32.mxu1 %v5019_v27  ;;  %3735 = vmatprep.mubr.f32.mxu0 %v5019_v27 }
 0x1b7   : > { %3127 = vmatmul.mubr.f32.gmra.mrb[20].mxu1 %v5488_v48  ;;  %3737 = vmatmul.mubr.f32.gmra.mrb[22].mxu0 %v5498_v54 }
 0x1b8   : > { %3132 = vmatprep.mubr.f32.mxu1 %v5019_v27  ;;  %3742 = vmatprep.mubr.f32.mxu0 %v5019_v27 }
 0x1bb   : > { %3134 = vmatmul.mubr.f32.gmra.mrb[22].mxu1 %v5498_v54  ;;  %3744 = vmatmul.mubr.f32.gmra.mrb[24].mxu0 %v5529_v26 }
 0x1bc   : > { %3139 = vmatprep.mubr.f32.mxu1 %v5019_v27  ;;  %3749 = vmatprep.mubr.f32.mxu0 %v5019_v27 }
 0x1bf   : > { %3141 = vmatmul.mubr.f32.gmra.mrb[24].mxu1 %v5529_v26  ;;  %3751 = vmatmul.mubr.f32.gmra.mrb[26].mxu0 %v5527_v24 }
 0x1c0   : > { %3146 = vmatprep.mubr.f32.mxu1 %v5019_v27  ;;  %3756 = vmatprep.mubr.f32.mxu0 %v5019_v27 }
 0x1c3   : > { %3148 = vmatmul.mubr.f32.gmra.mrb[26].mxu1 %v5527_v24  ;;  %3758 = vmatmul.mubr.f32.gmra.mrb[28].mxu0 %v5542_v41 }
 0x1c4   : > { %3153 = vmatprep.mubr.f32.mxu1 %v5019_v27  ;;  %3763 = vmatprep.mubr.f32.mxu0 %v5019_v27 }
 0x1c7   : > { %3155 = vmatmul.mubr.f32.gmra.mrb[28].mxu1 %v5542_v41  ;;  %3765 = vmatmul.mubr.f32.gmra.mrb[30].mxu0 %v5544_v35 }
 0x1c8   : > { %3160 = vmatprep.mubr.f32.mxu1 %v5019_v27  ;;  %3770 = vmatprep.mubr.f32.mxu0 %v5019_v27 }
 0x1cb   : > { %3162 = vmatmul.mubr.f32.gmra.mrb[30].mxu1 %v5544_v35  ;;  %3772 = vmatmul.mubr.f32.gmra.mrb[32].mxu0 %v5551_v47 }
 0x1cc   : > { %3167 = vmatprep.mubr.f32.mxu1 %v5019_v27  ;;  %3777 = vmatprep.mubr.f32.mxu0 %v5019_v27 }
 0x1cf   : > { %3169 = vmatmul.mubr.f32.gmra.mrb[32].mxu1 %v5551_v47  ;;  %3779 = vmatmul.mubr.f32.gmra.mrb[34].mxu0 %v5561_v57 }
 0x1d0   : > { %3174 = vmatprep.mubr.f32.mxu1 %v5019_v27  ;;  %3784 = vmatprep.mubr.f32.mxu0 %v5019_v27 }
 0x1d3   : > { %3176 = vmatmul.mubr.f32.gmra.mrb[34].mxu1 %v5561_v57  ;;  %3786 = vmatmul.mubr.f32.gmra.mrb[36].mxu0 %v5576_v6 }
 0x1d4   : > { %3181 = vmatprep.mubr.f32.mxu1 %v5019_v27  ;;  %3791 = vmatprep.mubr.f32.mxu0 %v5019_v27 }
 0x1d7   : > { %3183 = vmatmul.mubr.f32.gmra.mrb[36].mxu1 %v5576_v6  ;;  %3793 = vmatmul.mubr.f32.gmra.mrb[38].mxu0 %v5586_v20 }
 0x1d8   : > { %3188 = vmatprep.mubr.f32.mxu1 %v5019_v27  ;;  %3867 = vmatprep.mubr.f32.mxu0 %v5019_v27 }
 0x1db   : > { %3190 = vmatmul.mubr.f32.gmra.mrb[38].mxu1 %v5586_v20  ;;  %3869 = vmatmul.mubr.f32.vlgmr.msra.gmra.mrb[8].mxu0 %v5440_v10 }
 0x1dc   : > { %3268 = vmatprep.mubr.f32.mxu1 %v5019_v27  ;;  %3874 = vmatprep.mubr.f32.mxu0 %v5019_v27 }
 0x1df   : > { %3271 = vmatmul.mubr.f32.vlgmr.msra.gmra.mrb[8].mxu1 %v5446_v17  ;;  %3876 = vmatmul.mubr.f32.gmra.mrb[10].mxu0 %v5438_v9 }
 0x1e0   : > { %3276 = vmatprep.mubr.f32.mxu1 %v5019_v27  ;;  %3881 = vmatprep.mubr.f32.mxu0 %v5019_v27 }
 0x1e3   : > { %3279 = vmatmul.mubr.f32.gmra.mrb[10].mxu1 %v5443_v12  ;;  %3883 = vmatmul.mubr.f32.gmra.mrb[12].mxu0 %v5453_v29 }
 0x1e4   : > { %3284 = vmatprep.mubr.f32.mxu1 %v5019_v27  ;;  %3888 = vmatprep.mubr.f32.mxu0 %v5019_v27 }
 0x1e7   : > { %3287 = vmatmul.mubr.f32.gmra.mrb[12].mxu1 %v5459_v34  ;;  %3890 = vmatmul.mubr.f32.gmra.mrb[14].mxu0 %v5455_v14 }
 0x1e8   : > { %3292 = vmatprep.mubr.f32.mxu1 %v5019_v27  ;;  %3895 = vmatprep.mubr.f32.mxu0 %v5019_v27 }
 0x1eb   : > { %3295 = vmatmul.mubr.f32.gmra.mrb[14].mxu1 %v5468_v23  ;;  %3897 = vmatmul.mubr.f32.gmra.mrb[16].mxu0 %v5462_v36 }
 0x1ec   : > { %3300 = vmatprep.mubr.f32.mxu1 %v5019_v27  ;;  %3902 = vmatprep.mubr.f32.mxu0 %v5019_v27 }
 0x1ef   : > { %3303 = vmatmul.mubr.f32.gmra.mrb[16].mxu1 %v5478_v42  ;;  %3904 = vmatmul.mubr.f32.gmra.mrb[18].mxu0 %v5473_v25 }
 0x1f0   : > { %3308 = vmatprep.mubr.f32.mxu1 %v5019_v27  ;;  %3909 = vmatprep.mubr.f32.mxu0 %v5019_v27 }
 0x1f3   : > { %3311 = vmatmul.mubr.f32.gmra.mrb[18].mxu1 %v5484_v44  ;;  %3911 = vmatmul.mubr.f32.gmra.mrb[20].mxu0 %v5488_v48 }
 0x1f4   : > { %3316 = vmatprep.mubr.f32.mxu1 %v5019_v27  ;;  %3916 = vmatprep.mubr.f32.mxu0 %v5019_v27 }
 0x1f7   : > { %3319 = vmatmul.mubr.f32.gmra.mrb[20].mxu1 %v5496_v53  ;;  %3918 = vmatmul.mubr.f32.gmra.mrb[22].mxu0 %v5498_v54 }
 0x1f8   : > { %3324 = vmatprep.mubr.f32.mxu1 %v5019_v27  ;;  %3923 = vmatprep.mubr.f32.mxu0 %v5019_v27 }
 0x1fb   : > { %3327 = vmatmul.mubr.f32.gmra.mrb[22].mxu1 %v5505_v58  ;;  %3925 = vmatmul.mubr.f32.gmra.mrb[24].mxu0 %v5529_v26 }
 0x1fc   : > { %3332 = vmatprep.mubr.f32.mxu1 %v5019_v27  ;;  %3930 = vmatprep.mubr.f32.mxu0 %v5019_v27 }
 0x1ff   : > { %3335 = vmatmul.mubr.f32.gmra.mrb[24].mxu1 %v5535_v37  ;;  %3932 = vmatmul.mubr.f32.gmra.mrb[26].mxu0 %v5527_v24 }
 0x200   : > { %3340 = vmatprep.mubr.f32.mxu1 %v5019_v27  ;;  %3937 = vmatprep.mubr.f32.mxu0 %v5019_v27 }
 0x203   : > { %3343 = vmatmul.mubr.f32.gmra.mrb[26].mxu1 %v5532_v18  ;;  %3939 = vmatmul.mubr.f32.gmra.mrb[28].mxu0 %v5542_v41 }
 0x204   : > { %3348 = vmatprep.mubr.f32.mxu1 %v5019_v27  ;;  %3944 = vmatprep.mubr.f32.mxu0 %v5019_v27 }
 0x207   : > { %3351 = vmatmul.mubr.f32.gmra.mrb[28].mxu1 %v5548_v46  ;;  %3946 = vmatmul.mubr.f32.gmra.mrb[30].mxu0 %v5544_v35 }
 0x208   : > { %3356 = vmatprep.mubr.f32.mxu1 %v5019_v27  ;;  %3951 = vmatprep.mubr.f32.mxu0 %v5019_v27 }
 0x20b   : > { %3359 = vmatmul.mubr.f32.gmra.mrb[30].mxu1 %v5557_v55  ;;  %3953 = vmatmul.mubr.f32.gmra.mrb[32].mxu0 %v5551_v47 }
 0x20c   : > { %3364 = vmatprep.mubr.f32.mxu1 %v5019_v27  ;;  %3958 = vmatprep.mubr.f32.mxu0 %v5019_v27 }
 0x20f   : > { %3367 = vmatmul.mubr.f32.gmra.mrb[32].mxu1 %v5566_v63  ;;  %3960 = vmatmul.mubr.f32.gmra.mrb[34].mxu0 %v5561_v57 }
 0x210   : > { %3372 = vmatprep.mubr.f32.mxu1 %v5019_v27  ;;  %3965 = vmatprep.mubr.f32.mxu0 %v5019_v27 }
 0x213   : > { %3375 = vmatmul.mubr.f32.gmra.mrb[34].mxu1 %v5572_v2  ;;  %3967 = vmatmul.mubr.f32.gmra.mrb[36].mxu0 %v5576_v6 }
 0x214   : > { %3380 = vmatprep.mubr.f32.mxu1 %v5019_v27  ;;  %3972 = vmatprep.mubr.f32.mxu0 %v5019_v27 }
 0x217   : > { %3383 = vmatmul.mubr.f32.gmra.mrb[36].mxu1 %v5584_v19  ;;  %3974 = vmatmul.mubr.f32.gmra.mrb[38].mxu0 %v5586_v20 }
 0x218   : > { %3388 = vmatprep.mubr.f32.mxu1 %v5019_v27 }
 0x21b   : > { %3391 = vmatmul.mubr.f32.gmra.mrb[38].mxu1 %v5593_v22 }
 0x2ae   : > { %v3870_v38 = vpop.f32.mrb[8].mxu0 }
 0x2af   : > { %v3872_v39 = vpop.f32.mrb[9].mxu0 }
 0x2b2   : > { %v3272_v40 = vpop.f32.mrb[8].mxu1  ;;  %v3877_v27 = vpop.f32.mrb[10].mxu0 }
 0x2b3   : > { %v4667_v60 = vadd.f32 %v3870_v38, %v3272_v40  ;;  %v3274_v9 = vpop.f32.mrb[9].mxu1  ;;  %v3879_v10 = vpop.f32.mrb[11].mxu0 }
 0x2b4   : > { %v4668_v12 = vadd.f32 %v3872_v39, %v3274_v9 }
 0x2b5   : > { %3981 = vst.msk [vmem:[%s5740_s6] sm:$0xff] %vm3980_vm1, %v4667_v60 }
 0x2b6   : > { %4142 = vst.msk [vmem:[%s5745_s18 + $0x10] sm:$0xff] %vm3980_vm1, %v4668_v12  ;;  %v3280_v17 = vpop.f32.mrb[10].mxu1  ;;  %v3884_v29 = vpop.f32.mrb[12].mxu0 }
 0x2b7   : > { %v4669_v14 = vadd.f32 %v3877_v27, %v3280_v17  ;;  %v3282_v34 = vpop.f32.mrb[11].mxu1  ;;  %v3886_v36 = vpop.f32.mrb[13].mxu0 }
 0x2b8   : > { %v4670_v23 = vadd.f32 %v3879_v10, %v3282_v34 }
 0x2b9   : > { %3983 = vst.msk [vmem:[%s5740_s6 + $0x8] sm:$0x3f] %vm3982_vm2, %v4669_v14 }
 0x2ba   : > { %4143 = vst.msk [vmem:[%s5745_s18 + $0x18] sm:$0x3f] %vm3982_vm2, %v4670_v23  ;;  %v3288_v25 = vpop.f32.mrb[12].mxu1  ;;  %v3891_v42 = vpop.f32.mrb[14].mxu0 }
 0x2bb   : > { %v4671_v44 = vadd.f32 %v3884_v29, %v3288_v25  ;;  %v3290_v48 = vpop.f32.mrb[13].mxu1  ;;  %v3893_v53 = vpop.f32.mrb[15].mxu0 }
 0x2bc   : > { %v4672_v54 = vadd.f32 %v3886_v36, %v3290_v48 }
 0x2bd   : > { %3990 = vst.msk [vmem:[%s5745_s18] sm:$0xff] %vm3980_vm1, %v4671_v44 }
 0x2be   : > { %4150 = vst.msk [vmem:[%s5745_s18 + $0x20] sm:$0xff] %vm3980_vm1, %v4672_v54  ;;  %v3296_v58 = vpop.f32.mrb[14].mxu1  ;;  %v3898_v24 = vpop.f32.mrb[16].mxu0 }
 0x2bf   : > { %v4673_v26 = vadd.f32 %v3891_v42, %v3296_v58  ;;  %v3298_v18 = vpop.f32.mrb[15].mxu1  ;;  %v3900_v37 = vpop.f32.mrb[17].mxu0 }
 0x2c0   : > { %v4674_v41 = vadd.f32 %v3893_v53, %v3298_v18 }
 0x2c1   : > { %3991 = vst.msk [vmem:[%s5745_s18 + $0x8] sm:$0x3f] %vm3982_vm2, %v4673_v26 }
 0x2c2   : > { %4151 = vst.msk [vmem:[%s5745_s18 + $0x28] sm:$0x3f] %vm3982_vm2, %v4674_v41  ;;  %v3304_v35 = vpop.f32.mrb[16].mxu1  ;;  %v3905_v45 = vpop.f32.mrb[18].mxu0 }
 0x2c3   : > { %v4675_v46 = vadd.f32 %v3898_v24, %v3304_v35  ;;  %v3306_v47 = vpop.f32.mrb[17].mxu1  ;;  %v3907_v49 = vpop.f32.mrb[19].mxu0 }
 0x2c4   : > { %v4676_v50 = vadd.f32 %v3900_v37, %v3306_v47 }
 0x2c5   : > { %3984 = vst.msk [vmem:[%s5740_s6 + $0x10] sm:$0xff] %vm3980_vm1, %v4675_v46 }
 0x2c6   : > { %4144 = vst.msk [vmem:[%s5745_s18 + $0x40] sm:$0xff] %vm3980_vm1, %v4676_v50  ;;  %v3312_v51 = vpop.f32.mrb[18].mxu1  ;;  %v3912_v52 = vpop.f32.mrb[20].mxu0 }
 0x2c7   : > { %v4677_v55 = vadd.f32 %v3905_v45, %v3312_v51  ;;  %v3314_v56 = vpop.f32.mrb[19].mxu1  ;;  %v3914_v57 = vpop.f32.mrb[21].mxu0 }
 0x2c8   : > { %v4678_v59 = vadd.f32 %v3907_v49, %v3314_v56 }
 0x2c9   : > { %3985 = vst.msk [vmem:[%s5740_s6 + $0x18] sm:$0x3f] %vm3982_vm2, %v4677_v55 }
 0x2ca   : > { %4145 = vst.msk [vmem:[%s5745_s18 + $0x48] sm:$0x3f] %vm3982_vm2, %v4678_v59  ;;  %v3320_v61 = vpop.f32.mrb[20].mxu1  ;;  %v3919_v62 = vpop.f32.mrb[22].mxu0 }
 0x2cb   : > { %v4679_v63 = vadd.f32 %v3912_v52, %v3320_v61  ;;  %v3322_v0 = vpop.f32.mrb[21].mxu1  ;;  %v3921_v1 = vpop.f32.mrb[23].mxu0 }
 0x2cc   : > { %v4680_v2 = vadd.f32 %v3914_v57, %v3322_v0 }
 0x2cd   : > { %3992 = vst.msk [vmem:[%s5745_s18 + $0x30] sm:$0xff] %vm3980_vm1, %v4679_v63 }
 0x2ce   : > { %4152 = vst.msk [vmem:[%s5745_s18 + $0x50] sm:$0xff] %vm3980_vm1, %v4680_v2  ;;  %v3328_v3 = vpop.f32.mrb[22].mxu1  ;;  %v3926_v4 = vpop.f32.mrb[24].mxu0 }
 0x2cf   : > { %v4681_v5 = vadd.f32 %v3919_v62, %v3328_v3  ;;  %v3330_v6 = vpop.f32.mrb[23].mxu1  ;;  %v3928_v7 = vpop.f32.mrb[25].mxu0 }
 0x2d0   : > { %v4682_v8 = vadd.f32 %v3921_v1, %v3330_v6 }
 0x2d1   : > { %3993 = vst.msk [vmem:[%s5745_s18 + $0x38] sm:$0x3f] %vm3982_vm2, %v4681_v5 }
 0x2d2   : > { %4153 = vst.msk [vmem:[%s5745_s18 + $0x58] sm:$0x3f] %vm3982_vm2, %v4682_v8  ;;  %v3336_v11 = vpop.f32.mrb[24].mxu1  ;;  %v3933_v13 = vpop.f32.mrb[26].mxu0 }
 0x2d3   : > { %v4683_v19 = vadd.f32 %v3926_v4, %v3336_v11  ;;  %v3338_v20 = vpop.f32.mrb[25].mxu1  ;;  %v3935_v21 = vpop.f32.mrb[27].mxu0 }
 0x2d4   : > { %v4684_v28 = vadd.f32 %v3928_v7, %v3338_v20 }
 0x2d5   : > { %3986 = vst.msk [vmem:[%s5740_s6 + $0x20] sm:$0xff] %vm3980_vm1, %v4683_v19 }
 0x2d6   : > { %4146 = vst.msk [vmem:[%s5745_s18 + $0x70] sm:$0xff] %vm3980_vm1, %v4684_v28  ;;  %v3344_v32 = vpop.f32.mrb[26].mxu1  ;;  %v3940_v22 = vpop.f32.mrb[28].mxu0 }
 0x2d7   : > { %v4685_v15 = vadd.f32 %v3933_v13, %v3344_v32  ;;  %v3346_v16 = vpop.f32.mrb[27].mxu1  ;;  %v3942_v30 = vpop.f32.mrb[29].mxu0 }
 0x2d8   : > { %v4686_v31 = vadd.f32 %v3935_v21, %v3346_v16 }
 0x2d9   : > { %3987 = vst.msk [vmem:[%s5740_s6 + $0x28] sm:$0x3f] %vm3982_vm2, %v4685_v15 }
 0x2da   : > { %4147 = vst.msk [vmem:[%s5745_s18 + $0x78] sm:$0x3f] %vm3982_vm2, %v4686_v31  ;;  %v3352_v33 = vpop.f32.mrb[28].mxu1  ;;  %v3947_v43 = vpop.f32.mrb[30].mxu0 }
 0x2db   : > { %v4687_v38 = vadd.f32 %v3940_v22, %v3352_v33  ;;  %v3354_v39 = vpop.f32.mrb[29].mxu1  ;;  %v3949_v40 = vpop.f32.mrb[31].mxu0 }
 0x2dc   : > { %v4688_v27 = vadd.f32 %v3942_v30, %v3354_v39 }
 0x2dd   : > { %3994 = vst.msk [vmem:[%s5745_s18 + $0x60] sm:$0xff] %vm3980_vm1, %v4687_v38 }
 0x2de   : > { %4154 = vst.msk [vmem:[%s5745_s18 + $0x80] sm:$0xff] %vm3980_vm1, %v4688_v27  ;;  %v3360_v60 = vpop.f32.mrb[30].mxu1  ;;  %v3954_v9 = vpop.f32.mrb[32].mxu0 }
 0x2df   : > { %v4689_v10 = vadd.f32 %v3947_v43, %v3360_v60  ;;  %v3362_v12 = vpop.f32.mrb[31].mxu1  ;;  %v3956_v17 = vpop.f32.mrb[33].mxu0 }
 0x2e0   : > { %v4690_v29 = vadd.f32 %v3949_v40, %v3362_v12 }
 0x2e1   : > { %3995 = vst.msk [vmem:[%s5745_s18 + $0x68] sm:$0x3f] %vm3982_vm2, %v4689_v10 }
 0x2e2   : > { %4155 = vst.msk [vmem:[%s5745_s18 + $0x88] sm:$0x3f] %vm3982_vm2, %v4690_v29  ;;  %v3368_v14 = vpop.f32.mrb[32].mxu1  ;;  %v3961_v34 = vpop.f32.mrb[34].mxu0 }
 0x2e3   : > { %v4691_v36 = vadd.f32 %v3954_v9, %v3368_v14  ;;  %v3370_v23 = vpop.f32.mrb[33].mxu1  ;;  %v3963_v25 = vpop.f32.mrb[35].mxu0 }
 0x2e4   : > { %v4692_v42 = vadd.f32 %v3956_v17, %v3370_v23 }
 0x2e5   : > { %3988 = vst.msk [vmem:[%s5740_s6 + $0x30] sm:$0xff] %vm3980_vm1, %v4691_v36 }
 0x2e6   : > { %4148 = vst.msk [vmem:[%s5745_s18 + $0xa0] sm:$0xff] %vm3980_vm1, %v4692_v42  ;;  %v3376_v44 = vpop.f32.mrb[34].mxu1  ;;  %v3968_v48 = vpop.f32.mrb[36].mxu0 }
 0x2e7   : > { %v4693_v53 = vadd.f32 %v3961_v34, %v3376_v44  ;;  %v3378_v54 = vpop.f32.mrb[35].mxu1  ;;  %v3970_v58 = vpop.f32.mrb[37].mxu0 }
 0x2e8   : > { %v4694_v24 = vadd.f32 %v3963_v25, %v3378_v54 }
 0x2e9   : > { %3989 = vst.msk [vmem:[%s5740_s6 + $0x38] sm:$0x3f] %vm3982_vm2, %v4693_v53 }
 0x2ea   : > { %4149 = vst.msk [vmem:[%s5745_s18 + $0xa8] sm:$0x3f] %vm3982_vm2, %v4694_v24  ;;  %v3384_v26 = vpop.f32.mrb[36].mxu1  ;;  %v3975_v18 = vpop.f32.mrb[38].mxu0 }
 0x2eb   : > { %v4695_v37 = vadd.f32 %v3968_v48, %v3384_v26  ;;  %v3386_v41 = vpop.f32.mrb[37].mxu1  ;;  %v3977_v35 = vpop.f32.mrb[39].mxu0 }
 0x2ec   : > { %v4696_v45 = vadd.f32 %v3970_v58, %v3386_v41 }
 0x2ed   : > { %3996 = vst.msk [vmem:[%s5745_s18 + $0x90] sm:$0xff] %vm3980_vm1, %v4695_v37 }
 0x2ee   : > { %4156 = vst.msk [vmem:[%s5745_s18 + $0xb0] sm:$0xff] %vm3980_vm1, %v4696_v45  ;;  %v3392_v46 = vpop.f32.mrb[38].mxu1 }
 0x2ef   : > { %v4697_v47 = vadd.f32 %v3975_v18, %v3392_v46  ;;  %v3394_v49 = vpop.f32.mrb[39].mxu1 }
 0x2f0   : > { %v4698_v50 = vadd.f32 %v3977_v35, %v3394_v49 }
 0x2f1   : > { %3997 = vst.msk [vmem:[%s5745_s18 + $0x98] sm:$0x3f] %vm3982_vm2, %v4697_v47 }
 0x2f2   : > { %4157 = vst.msk [vmem:[%s5745_s18 + $0xb8] sm:$0x3f] %vm3982_vm2, %v4698_v50 }
 0x2f3 PF: > { %p15_p8 = scmp.ge.s32.totalorder %s5065_s20, 4   ;;  %s5832_s15 = smov %s5006_s16 }
 0x2f4   : > { %s5833_s16 = smov %s5010_s17  ;;  %s5834_s17 = smov %s5075_s23 }
 0x2f5   : > { %s5835_s18 = smov %s5065_s20  ;;  %17 = sbr.rel (!%p15_p8) target bundleno = 3 (0x3), region = 92 }
 0x2fc   :  { %4059 = vsyncpa [#allocation4], 1 }
 0x2fd   :  { %4061 = vsyncpa [#allocation4 + $0x1], 1 }

// kernel: tpu_custom_call.1
= control target key start
LH: loop header
LB: loop body
LE: loop exit
PB: predicated region body
PF: predicated region fallthrough
CT: control target
= control target key end

     0   :  { %10 = vsyncpa [#allocation4], 0  ;;  %s5824_s0 = inlined_call_operand.hbm [shape: f32[8,16,16], index: 0, kind: input, shape index: {}]   ;;  %s5825_s1 = inlined_call_operand.vmem [shape: f32[32,16], index: 1, kind: input, shape index: {}]   ;;  %s5826_s2 = inlined_call_operand.vmem [shape: f32[16,256], index: 2, kind: input, shape index: {}]   ;;  %s5827_s3 = inlined_call_operand.vmem [shape: f32[8,14,14], index: 3, kind: output, shape index: {0}]   ;;  %s5828_s4 = inlined_call_operand.vmem [shape: f32[8,3,14,14], index: 4, kind: output, shape index: {1}]  }
   0x1   :  { %12 = vsyncpa [#allocation4 + $0x1], 0  ;;  %s5045_s15 = smov 0   ;;  %s5047_s16 = smov 0  }
   0x2   :  { %s5049_s17 = smov 0   ;;  %s5051_s18 = smov 0  }
   0x3 LB: > { %s4121_s19 = sadd.s32 4294967295, %s5014_s18   ;;  %s5065_s20 = sadd.s32 1, %s5014_s18   ;;  %s5014_s18 = sphi %s5051_s18, %s5835_s18   ;;  %s5010_s17 = sphi %s5049_s17, %s5834_s17   ;;  %s5006_s16 = sphi %s5047_s16, %s5833_s16   ;;  %s5002_s15 = sphi %s5045_s15, %s5832_s15  }
   0x4   : > { %s22_s21 = ssub.s32 %s5014_s18, %s5065_s20  ;;  %s25_s22 = sadd.s32 1, %s5010_s17 }
   0x5   : > { %p23_p0 = scmp.eq.s32.totalorder %s22_s21, 0  ;;  %p32_p1 = scmp.ne.s32.totalorder %s5010_s17, %s5006_s16 }
   0x6   : > { %p33_p2 = scmp.eq.s32.totalorder %s5014_s18, 0  ;;  %p38_p3 = scmp.ne.s32.totalorder %s5006_s16, %s5002_s15 }
   0x7   : > { %s5075_s23 = scalar_select %p23_p0, %s5010_s17, %s25_s22  }
   0x8   : > { %p34_p4 = por %p33_p2, %p32_p1  ;;  %p39_p5 = scmp.eq.s32.totalorder %s4121_s19, 0 }
   0x9   : > { %p4914_p6 = scmp.lt.s32.totalorder %s5014_s18, 2  ;;  %s162_s25 = sand.u32 1, %s5010_s17  }
   0xa   : > { %p5080_p7 = por %p39_p5, %p38_p3  ;;  %s4125_s26 = sshll.u32 %s162_s25, 6 }
   0xb   : > { %s4161_s27 = sshll.u32 %s5014_s18, 10  ;;  %s166_s5 = scalar_lea.vmem [#allocation3], %s4125_s26 }
   0xc   : > { %s5089_s30 = scalar_lea.hbm %s5824_s0, %s4161_s27  ;;  %s174_s6 = sshll.u32 %s166_s5, 4  ;;  %s5091_s6 = int_to_ptr.vmem [resolvable:$true] %s174_s6 }
   0xd   : > { %p5093_p8 = pnand %p4914_p6, %p34_p4  ;;  %s5098_s8 = scalar_lea.sflag [#allocation4], %s162_s25 }
   0xe   : > { %s4950_s9 = scalar_lea.hbm %s5089_s30, 1024  ;;  %s4955_s12 = scalar_lea.hbm %s5824_s0, 2048 }
   0xf   : > { %p4951_p10 = scmp.ne.s32.totalorder %s5089_s30, %s4950_s9  ;;  %p4952_p11 = pneg %p5093_p8 }
  0x10   : > { %p4956_p0 = scmp.lt.u32.totalorder %s5089_s30, %s5824_s0  ;;  %p4957_p1 = scmp.lt.u32.totalorder %s4955_s12, %s4950_s9 }
  0x11   : > { %p4953_p12 = pnand %p4952_p11, %p4951_p10  ;;  %p4959_p3 = scmp.lt.u32.totalorder %s4950_s9, %s5089_s30 }
  0x12   : > { %p4958_p2 = por %p4957_p1, %p4956_p0 }
  0x13   : > { %p4954_p13 = pneg %p4953_p12 }
  0x14   : > { %p4960_p4 = por %p4959_p3, %p4958_p2 }
  0x16   : > { %p4961_p5 = pnand %p4960_p4, %p4954_p13 }
  0x18   : > { %4964 = shalt.err (!%p4961_p5)
}
  0x19   : > { %s4965_s15 = scalar_lea.vmem %s5091_s6, 1024  ;;  %s5016_s21 = smov [#allocation3]  }
  0x1a   : > { %p4966_p6 = scmp.ne.s32.totalorder %s5091_s6, %s4965_s15  ;;  %s4970_s22 = sshll.u32 %s5016_s21, 4  ;;  %s4971_s22 = int_to_ptr.vmem [resolvable:$false] %s4970_s22 }
  0x1b   : > { %s4972_s25 = scalar_lea.vmem %s4971_s22, 2048  ;;  %p4973_p9 = scmp.lt.s32.totalorder %s5091_s6, %s4971_s22 }
  0x1c   : > { %p4968_p10 = pnand %p4966_p6, %p4952_p11  ;;  %p4974_p0 = scmp.lt.s32.totalorder %s4972_s25, %s4965_s15 }
  0x1e   : > { %p4969_p12 = pneg %p4968_p10  ;;  %p4975_p1 = por %p4974_p0, %p4973_p9 }
  0x20   : > { %p4976_p2 = pnand %p4975_p1, %p4969_p12 }
  0x22   : > { %4979 = shalt.err (!%p4976_p2)
}
  0x23   : > { %s5017_s26 = smov 128   ;;  %s5018_s27 = smov 8  }
  0x24   : > { %4913 = dma.hbm_to_vmem [thread:$0]  (!%p5093_p8), %s5089_s30, 1024, %s5091_s6, %s5098_s8, %s5017_s26, %s5017_s26, %s5018_s27  }
  0x25   : > { %p182_p11 = scmp.lt.s32.totalorder %s5014_s18, 3  ;;  %p5831_p13 = scmp.ge.s32.totalorder %s5014_s18, 1 }
  0x27   : > { %p183_p3 = pnand %p5831_p13, %p182_p11 }
  0x28   : > { %s188_s28 = sand.u32 (!%p183_p3), 1, %s5006_s16  }
  0x29   : > { %186 = sbr.rel (%p183_p3) target bundleno = 755 (0x2f3), region = 32  ;;  %s4130_s29 = sshll.u32 (!%p183_p3), %s188_s28, 6 }
  0x2a   : > { %s189_s5 = scalar_lea.sflag (!%p183_p3), [#allocation4], %s188_s28  ;;  %s5130_s9 = scalar_lea.vmem (!%p183_p3), [#allocation3], %s4130_s29 }
  0x30   : > { %4997 = dma.done.wait (%p5080_p7), %s189_s5, 1024  }
  0x31   : > { %4999 = vsyncadd (%p5080_p7), %s189_s5, 4294966272  ;;  %vm245_vm0 = vcmask 130048   ;;  %v243_v0 = vld [vmem:[%s5130_s9] sm:$0xff]  ;;  %v244_v1 = vld [vmem:[%s5130_s9 + $0x8] sm:$0xff]  ;;  %s4131_s28 = sshll.u32 %s4121_s19, 2  ;;  %vm3980_vm1 = vcmask 113664  }
  0x32   : > { %v4136_v2 = vld [vmem:[%s5130_s9 + $0x10] sm:$0xff]  ;;  %v259_v3 = vand.u32 4294901760, %v243_v0  ;;  %v262_v4 = vand.u32 4294901760, %v244_v1  ;;  %v4137_v5 = vld [vmem:[%s5130_s9 + $0x18] sm:$0xff]  ;;  %v239_v7 = vld [vmem:[%s5825_s1] sm:$0xff]  ;;  %p226_p7 = scmp.lt.s32.totalorder %s4131_s28, 7 }
  0x33   : > { %v870_v6 = vand.u32 4294901760, %v4136_v2  ;;  %v240_v8 = vld [vmem:[%s5825_s1 + $0x8] sm:$0xff]  ;;  %v873_v9 = vand.u32 4294901760, %v4137_v5  ;;  %v247_v10 = vsel %vm245_vm0, %v239_v7, 0  ;;  %v241_v12 = vld [vmem:[%s5825_s1 + $0x10] sm:$0xff]  ;;  %v242_v13 = vld [vmem:[%s5825_s1 + $0x18] sm:$0xff] }
  0x34   : > { %v250_v11 = vsel %vm245_vm0, %v240_v8, 0  ;;  %v5154_v14 = vpack.c.bf16 %v262_v4, %v259_v3  ;;  %v5156_v15 = vand.u32 4294901760, %v247_v10  ;;  %v5160_v17 = vsub.f32 %v243_v0, %v259_v3  ;;  %v4138_v60 = vld [vmem:[%s5130_s9 + $0x20] sm:$0xff]  ;;  %v4139_v61 = vld [vmem:[%s5130_s9 + $0x28] sm:$0xff]  ;;  %v4140_v62 = vld [vmem:[%s5130_s9 + $0x30] sm:$0xff]  ;;  %s5837_s28 = smov (!%p226_p7, %s4131_s28), 7 }
  0x35   : > { %v5158_v16 = vand.u32 4294901760, %v250_v11  ;;  %v5162_v18 = vpack.c.bf16 %v873_v9, %v870_v6  ;;  %v5164_v19 = vsub.f32 %v244_v1, %v262_v4  ;;  %v253_v20 = vsel %vm245_vm0, %v241_v12, 0  ;;  %v4141_v63 = vld [vmem:[%s5130_s9 + $0x38] sm:$0xff]  ;;  %s4162_s29 = sshll.u32 %s5837_s28, 4  ;;  %s4907_s5 = smul.u32 48, %s5837_s28 }
  0x36   : > { %v256_v21 = vsel %vm245_vm0, %v242_v13, 0  ;;  %4548 = vmatprep.subr.bf16.mxu0 %v5154_v14  ;;  %v5170_v22 = vsub.f32 %v247_v10, %v5156_v15  ;;  %v368_v24 = vand.u32 4294901760, %v5160_v17  ;;  %v5176_v25 = vand.u32 4294901760, %v253_v20  ;;  %s5740_s6 = scalar_lea.vmem %s5827_s3, %s4162_s29 }
  0x37   : > { %v5173_v23 = vsub.f32 %v250_v11, %v5158_v16  ;;  %4572 = vmatprep.subr.bf16.mxu1 %v5162_v18  ;;  %4550 = vmatpush3.bf16.msra.mxu0 %v5154_v14  ;;  %v375_v26 = vand.u32 4294901760, %v5164_v19  ;;  %v5181_v27 = vand.u32 4294901760, %v256_v21  ;;  %v978_v28 = vsub.f32 %v4136_v2, %v870_v6  ;;  %s5745_s18 = scalar_lea.vmem %s5828_s4, %s4907_s5 }
  0x38   : > { %v985_v29 = vsub.f32 %v4137_v5, %v873_v9  ;;  %4574 = vmatpush3.bf16.msra.mxu1 %v5162_v18  ;;  %v5185_v30 = vand.u32 4294901760, %v5170_v22  ;;  %v369_v32 = vsub.f32 %v5160_v17, %v368_v24  ;;  %v5194_v33 = vsub.f32 %v253_v20, %v5176_v25 }
  0x39   : > { %v5188_v31 = vand.u32 4294901760, %v5173_v23  ;;  %v376_v34 = vsub.f32 %v5164_v19, %v375_v26  ;;  %v5198_v35 = vsub.f32 %v256_v21, %v5181_v27  ;;  %v979_v36 = vand.u32 4294901760, %v978_v28 }
  0x3a   : > { %v986_v37 = vand.u32 4294901760, %v985_v29  ;;  %v328_v38 = vsub.f32 %v5170_v22, %v5185_v30  ;;  %v370_v40 = vand.u32 4294901760, %v369_v32  ;;  %v5205_v41 = vand.u32 4294901760, %v5194_v33 }
  0x3b   : > { %v338_v39 = vsub.f32 %v5173_v23, %v5188_v31  ;;  %v377_v42 = vand.u32 4294901760, %v376_v34  ;;  %v5208_v43 = vand.u32 4294901760, %v5198_v35  ;;  %v980_v44 = vsub.f32 %v978_v28, %v979_v36 }
  0x3c   : > { %v987_v45 = vsub.f32 %v985_v29, %v986_v37  ;;  %v5210_v46 = vand.u32 4294901760, %v328_v38  ;;  %v348_v48 = vsub.f32 %v5194_v33, %v5205_v41  ;;  %v4555_v54 = vpack.c.bf16 %v5164_v19, %v5160_v17 }
  0x3d   : > { %v5212_v47 = vand.u32 4294901760, %v338_v39  ;;  %v4551_v49 = vpack.c.bf16 %v377_v42, %v370_v40  ;;  %v358_v50 = vsub.f32 %v5198_v35, %v5208_v43  ;;  %v981_v51 = vand.u32 4294901760, %v980_v44 }
  0x3e   : > { %v988_v52 = vand.u32 4294901760, %v987_v45  ;;  %4311 = vmatprep.mubr.f32.mxu0 %v5210_v46  ;;  %4371 = vmatprep.mubr.f32.mxu1 %v5210_v46  ;;  %v5220_v53 = vand.u32 4294901760, %v348_v48  ;;  %v4579_v57 = vpack.c.bf16 %v985_v29, %v978_v28  ;;  %v4563_v58 = vpack.c.bf16 %v375_v26, %v368_v24 }
  0x3f   : > { %4312 = vmatmul.mubr.f32.vlgmr.msra.gmra.mrb[0].mxu0 %v5212_v47  ;;  %4552 = vmatprep.subr.bf16.mxu0 %v4551_v49  ;;  %v5225_v55 = vand.u32 4294901760, %v358_v50  ;;  %v4587_v59 = vpack.c.bf16 %v986_v37, %v979_v36  ;;  %v1482_v0 = vand.u32 4294901760, %v4138_v60  ;;  %v1485_v1 = vand.u32 4294901760, %v4139_v61 }
  0x40   : > { %v4575_v56 = vpack.c.bf16 %v988_v52, %v981_v51  ;;  %4372 = vmatmul.mubr.f32.vlgmr.msra.gmra.mrb[0].mxu1 %v5212_v47  ;;  %4554 = vmatpush3.bf16.msra.mxu0 %v4551_v49  ;;  %v2094_v2 = vand.u32 4294901760, %v4140_v62  ;;  %v2097_v3 = vand.u32 4294901760, %v4141_v63  ;;  %vm3982_vm2 = vcmask 111616  }
  0x41   : > { %4314 = vmatprep.mubr.f32.mxu0 %v5220_v53  ;;  %4374 = vmatprep.mubr.f32.mxu1 %v5220_v53  ;;  %v5260_v4 = vsub.f32 %v4138_v60, %v1482_v0  ;;  %v5262_v5 = vsub.f32 %v4139_v61, %v1485_v1  ;;  %v5282_v12 = vpack.c.bf16 %v1485_v1, %v1482_v0 }
  0x42   : > { %4576 = vmatprep.subr.bf16.mxu1 %v4575_v56  ;;  %4556 = vmatprep.subr.bf16.mxu0 %v4555_v54  ;;  %v5265_v6 = vsub.f32 %v4140_v62, %v2094_v2  ;;  %v5267_v7 = vsub.f32 %v4141_v63, %v2097_v3  ;;  %v5291_v19 = vpack.c.bf16 %v2097_v3, %v2094_v2 }
  0x43   : > { %4315 = vmatmul.mubr.f32.gmra.mrb[2].mxu0 %v5225_v55  ;;  %4578 = vmatpush3.bf16.msra.mxu1 %v4575_v56  ;;  %v1591_v8 = vand.u32 4294901760, %v5260_v4  ;;  %v1598_v9 = vand.u32 4294901760, %v5262_v5  ;;  %v4603_v32 = vpack.c.bf16 %v5262_v5, %v5260_v4 }
  0x44   : > { %4375 = vmatmul.mubr.f32.gmra.mrb[2].mxu1 %v5225_v55  ;;  %4321 = vmatprep.mubr.f32.mxu0 %v5156_v15  ;;  %v2203_v10 = vand.u32 4294901760, %v5265_v6  ;;  %v2210_v11 = vand.u32 4294901760, %v5267_v7  ;;  %v4627_v34 = vpack.c.bf16 %v5267_v7, %v5265_v6 }
  0x45   : > { %4381 = vmatprep.mubr.f32.mxu1 %v5156_v15  ;;  %4580 = vmatprep.subr.bf16.mxu1 %v4579_v57  ;;  %v1592_v13 = vsub.f32 %v5260_v4, %v1591_v8  ;;  %v1599_v17 = vsub.f32 %v5262_v5, %v1598_v9  ;;  %v4611_v36 = vpack.c.bf16 %v1598_v9, %v1591_v8 }
  0x46   : > { %v2204_v20 = vsub.f32 %v5265_v6, %v2203_v10  ;;  %v2211_v21 = vsub.f32 %v5267_v7, %v2210_v11  ;;  %v4635_v37 = vpack.c.bf16 %v2210_v11, %v2203_v10 }
  0x47   : > { %4322 = vmatmul.mubr.f32.vlgmr.msra.gmra.mrb[0].mxu0 %v5158_v16  ;;  %v1593_v24 = vand.u32 4294901760, %v1592_v13  ;;  %v1600_v26 = vand.u32 4294901760, %v1599_v17 }
  0x48   : > { %4382 = vmatmul.mubr.f32.vlgmr.msra.gmra.mrb[0].mxu1 %v5158_v16  ;;  %4558 = vmatpush3.bf16.msra.mxu0 %v4555_v54  ;;  %v2205_v28 = vand.u32 4294901760, %v2204_v20  ;;  %v2212_v29 = vand.u32 4294901760, %v2211_v21 }
  0x49   : > { %4324 = vmatprep.mubr.f32.mxu0 %v5176_v25  ;;  %4384 = vmatprep.mubr.f32.mxu1 %v5176_v25 }
  0x4a   : > { %4582 = vmatpush3.bf16.msra.mxu1 %v4579_v57  ;;  %4560 = vmatprep.subr.bf16.mxu0 %v5154_v14 }
  0x4b   : > { %4325 = vmatmul.mubr.f32.gmra.mrb[2].mxu0 %v5181_v27  ;;  %4584 = vmatprep.subr.bf16.mxu1 %v5162_v18 }
  0x4c   : > { %4385 = vmatmul.mubr.f32.gmra.mrb[2].mxu1 %v5181_v27  ;;  %4331 = vmatprep.mubr.f32.mxu0 %v5170_v22 }
  0x4d   : > { %4391 = vmatprep.mubr.f32.mxu1 %v5170_v22 }
  0x4f   : > { %4332 = vmatmul.mubr.f32.vlgmr.msra.gmra.mrb[0].mxu0 %v5173_v23 }
  0x50   : > { %4392 = vmatmul.mubr.f32.vlgmr.msra.gmra.mrb[0].mxu1 %v5173_v23  ;;  %4562 = vmatpush3.bf16.msra.mxu0 %v5154_v14 }
  0x51   : > { %4334 = vmatprep.mubr.f32.mxu0 %v5194_v33  ;;  %4394 = vmatprep.mubr.f32.mxu1 %v5194_v33 }
  0x52   : > { %4586 = vmatpush3.bf16.msra.mxu1 %v5162_v18  ;;  %4564 = vmatprep.subr.bf16.mxu0 %v4563_v58 }
  0x53   : > { %4335 = vmatmul.mubr.f32.gmra.mrb[2].mxu0 %v5198_v35  ;;  %4588 = vmatprep.subr.bf16.mxu1 %v4587_v59 }
  0x54   : > { %4395 = vmatmul.mubr.f32.gmra.mrb[2].mxu1 %v5198_v35  ;;  %4341 = vmatprep.mubr.f32.mxu0 %v5185_v30 }
  0x55   : > { %4401 = vmatprep.mubr.f32.mxu1 %v5185_v30 }
  0x57   : > { %4342 = vmatmul.mubr.f32.vlgmr.msra.gmra.mrb[0].mxu0 %v5188_v31 }
  0x58   : > { %4402 = vmatmul.mubr.f32.vlgmr.msra.gmra.mrb[0].mxu1 %v5188_v31  ;;  %4566 = vmatpush3.bf16.msra.mxu0 %v4563_v58 }
  0x59   : > { %4344 = vmatprep.mubr.f32.mxu0 %v5205_v41  ;;  %4404 = vmatprep.mubr.f32.mxu1 %v5205_v41 }
  0x5a   : > { %4590 = vmatpush3.bf16.msra.mxu1 %v4587_v59  ;;  %4568 = vmatprep.subr.bf16.mxu0 %v5154_v14 }
  0x5b   : > { %4345 = vmatmul.mubr.f32.gmra.mrb[2].mxu0 %v5208_v43  ;;  %4592 = vmatprep.subr.bf16.mxu1 %v5162_v18 }
  0x5c   : > { %4405 = vmatmul.mubr.f32.gmra.mrb[2].mxu1 %v5208_v43  ;;  %4351 = vmatprep.mubr.f32.mxu0 %v5156_v15 }
  0x5d   : > { %4411 = vmatprep.mubr.f32.mxu1 %v5156_v15 }
  0x5f   : > { %4352 = vmatmul.mubr.f32.vlgmr.msra.gmra.mrb[0].mxu0 %v5158_v16 }
  0x60   : > { %4412 = vmatmul.mubr.f32.vlgmr.msra.gmra.mrb[0].mxu1 %v5158_v16  ;;  %4570 = vmatpush3.bf16.msra.mxu0 %v5154_v14  ;;  %v4599_v14 = vpack.c.bf16 %v1600_v26, %v1593_v24 }
  0x61   : > { %4354 = vmatprep.mubr.f32.mxu0 %v5176_v25  ;;  %4414 = vmatprep.mubr.f32.mxu1 %v5176_v25 }
  0x62   : > { %4594 = vmatpush3.bf16.msra.mxu1 %v5162_v18  ;;  %4596 = vmatprep.subr.bf16.mxu0 %v5282_v12  ;;  %v4623_v18 = vpack.c.bf16 %v2212_v29, %v2205_v28 }
  0x63   : > { %4355 = vmatmul.mubr.f32.gmra.mrb[2].mxu0 %v5181_v27  ;;  %4620 = vmatprep.subr.bf16.mxu1 %v5291_v19 }
  0x64   : > { %4415 = vmatmul.mubr.f32.gmra.mrb[2].mxu1 %v5181_v27  ;;  %4361 = vmatprep.mubr.f32.mxu0 %v5156_v15 }
  0x65   : > { %4421 = vmatprep.mubr.f32.mxu1 %v5156_v15 }
  0x67   : > { %4362 = vmatmul.mubr.f32.vlgmr.msra.gmra.mrb[0].mxu0 %v5158_v16 }
  0x68   : > { %4422 = vmatmul.mubr.f32.vlgmr.msra.gmra.mrb[0].mxu1 %v5158_v16  ;;  %4598 = vmatpush3.bf16.msra.mxu0 %v5282_v12 }
  0x69   : > { %4364 = vmatprep.mubr.f32.mxu0 %v5176_v25  ;;  %4424 = vmatprep.mubr.f32.mxu1 %v5176_v25 }
  0x6a   : > { %4622 = vmatpush3.bf16.msra.mxu1 %v5291_v19  ;;  %4600 = vmatprep.subr.bf16.mxu0 %v4599_v14 }
  0x6b   : > { %4365 = vmatmul.mubr.f32.gmra.mrb[2].mxu0 %v5181_v27  ;;  %4624 = vmatprep.subr.bf16.mxu1 %v4623_v18 }
  0x6c   : > { %4425 = vmatmul.mubr.f32.gmra.mrb[2].mxu1 %v5181_v27  ;;  %4431 = vmatprep.mubr.f32.mxu0 %v5210_v46 }
  0x6d   : > { %4491 = vmatprep.mubr.f32.mxu1 %v5210_v46 }
  0x6f   : > { %4432 = vmatmul.mubr.f32.vlgmr.msra.gmra.mrb[4].mxu0 %v5212_v47 }
  0x70   : > { %4492 = vmatmul.mubr.f32.vlgmr.msra.gmra.mrb[4].mxu1 %v5212_v47  ;;  %4602 = vmatpush3.bf16.msra.mxu0 %v4599_v14 }
  0x71   : > { %4434 = vmatprep.mubr.f32.mxu0 %v5220_v53  ;;  %4494 = vmatprep.mubr.f32.mxu1 %v5220_v53 }
  0x72   : > { %4626 = vmatpush3.bf16.msra.mxu1 %v4623_v18  ;;  %4604 = vmatprep.subr.bf16.mxu0 %v4603_v32 }
  0x73   : > { %4435 = vmatmul.mubr.f32.gmra.mrb[6].mxu0 %v5225_v55  ;;  %4628 = vmatprep.subr.bf16.mxu1 %v4627_v34 }
  0x74   : > { %4495 = vmatmul.mubr.f32.gmra.mrb[6].mxu1 %v5225_v55  ;;  %4441 = vmatprep.mubr.f32.mxu0 %v5156_v15 }
  0x75   : > { %4501 = vmatprep.mubr.f32.mxu1 %v5156_v15 }
  0x77   : > { %4442 = vmatmul.mubr.f32.vlgmr.msra.gmra.mrb[4].mxu0 %v5158_v16 }
  0x78   : > { %4502 = vmatmul.mubr.f32.vlgmr.msra.gmra.mrb[4].mxu1 %v5158_v16  ;;  %4606 = vmatpush3.bf16.msra.mxu0 %v4603_v32 }
  0x79   : > { %4444 = vmatprep.mubr.f32.mxu0 %v5176_v25  ;;  %4504 = vmatprep.mubr.f32.mxu1 %v5176_v25 }
  0x7a   : > { %4630 = vmatpush3.bf16.msra.mxu1 %v4627_v34  ;;  %4608 = vmatprep.subr.bf16.mxu0 %v5282_v12 }
  0x7b   : > { %4445 = vmatmul.mubr.f32.gmra.mrb[6].mxu0 %v5181_v27  ;;  %4632 = vmatprep.subr.bf16.mxu1 %v5291_v19 }
  0x7c   : > { %4505 = vmatmul.mubr.f32.gmra.mrb[6].mxu1 %v5181_v27  ;;  %4451 = vmatprep.mubr.f32.mxu0 %v5170_v22 }
  0x7d   : > { %4511 = vmatprep.mubr.f32.mxu1 %v5170_v22  ;;  %v2703_v22 = vld [vmem:[%s5826_s2 + $0x8] sm:$0xff] }
  0x7f   : > { %4452 = vmatmul.mubr.f32.vlgmr.msra.gmra.mrb[4].mxu0 %v5173_v23 }
  0x80   : > { %4512 = vmatmul.mubr.f32.vlgmr.msra.gmra.mrb[4].mxu1 %v5173_v23  ;;  %4610 = vmatpush3.bf16.msra.mxu0 %v5282_v12  ;;  %v2754_v23 = vand.u32 4294901760, %v2703_v22 }
  0x81   : > { %4454 = vmatprep.mubr.f32.mxu0 %v5194_v33  ;;  %4514 = vmatprep.mubr.f32.mxu1 %v5194_v33 }
  0x82   : > { %4634 = vmatpush3.bf16.msra.mxu1 %v5291_v19  ;;  %4612 = vmatprep.subr.bf16.mxu0 %v4611_v36 }
  0x83   : > { %4455 = vmatmul.mubr.f32.gmra.mrb[6].mxu0 %v5198_v35  ;;  %4636 = vmatprep.subr.bf16.mxu1 %v4635_v37 }
  0x84   : > { %4515 = vmatmul.mubr.f32.gmra.mrb[6].mxu1 %v5198_v35  ;;  %4461 = vmatprep.mubr.f32.mxu0 %v5185_v30 }
  0x85   : > { %4521 = vmatprep.mubr.f32.mxu1 %v5185_v30 }
  0x87   : > { %4462 = vmatmul.mubr.f32.vlgmr.msra.gmra.mrb[4].mxu0 %v5188_v31 }
  0x88   : > { %4522 = vmatmul.mubr.f32.vlgmr.msra.gmra.mrb[4].mxu1 %v5188_v31  ;;  %4614 = vmatpush3.bf16.msra.mxu0 %v4611_v36 }
  0x89   : > { %4464 = vmatprep.mubr.f32.mxu0 %v5205_v41  ;;  %4524 = vmatprep.mubr.f32.mxu1 %v5205_v41  ;;  %v5412_v41 = vsub.f32 %v2703_v22, %v2754_v23 }
  0x8a   : > { %4638 = vmatpush3.bf16.msra.mxu1 %v4635_v37  ;;  %4616 = vmatprep.subr.bf16.mxu0 %v5282_v12 }
  0x8b   : > { %4465 = vmatmul.mubr.f32.gmra.mrb[6].mxu0 %v5208_v43  ;;  %4640 = vmatprep.subr.bf16.mxu1 %v5291_v19 }
  0x8c   : > { %4525 = vmatmul.mubr.f32.gmra.mrb[6].mxu1 %v5208_v43  ;;  %4471 = vmatprep.mubr.f32.mxu0 %v5156_v15  ;;  %v3001_v43 = vand.u32 4294901760, %v5412_v41 }
  0x8d   : > { %4531 = vmatprep.mubr.f32.mxu1 %v5156_v15 }
  0x8e   : > { %v3002_v47 = vsub.f32 %v5412_v41, %v3001_v43 }
  0x8f   : > { %4472 = vmatmul.mubr.f32.vlgmr.msra.gmra.mrb[4].mxu0 %v5158_v16 }
  0x90   : > { %4532 = vmatmul.mubr.f32.vlgmr.msra.gmra.mrb[4].mxu1 %v5158_v16  ;;  %4618 = vmatpush3.bf16.msra.mxu0 %v5282_v12  ;;  %v3003_v53 = vand.u32 4294901760, %v3002_v47 }
  0x91   : > { %4474 = vmatprep.mubr.f32.mxu0 %v5176_v25  ;;  %4534 = vmatprep.mubr.f32.mxu1 %v5176_v25 }
  0x92   : > { %4642 = vmatpush3.bf16.msra.mxu1 %v5291_v19 }
  0x93   : > { %4475 = vmatmul.mubr.f32.gmra.mrb[6].mxu0 %v5181_v27 }
  0x94   : > { %4535 = vmatmul.mubr.f32.gmra.mrb[6].mxu1 %v5181_v27  ;;  %4481 = vmatprep.mubr.f32.mxu0 %v5156_v15 }
  0x95   : > { %4541 = vmatprep.mubr.f32.mxu1 %v5156_v15  ;;  %v2705_v15 = vld [vmem:[%s5826_s2 + $0x18] sm:$0xff] }
  0x96   : > { %v2758_v30 = vand.u32 4294901760, %v2705_v15 }
  0x97   : > { %4482 = vmatmul.mubr.f32.vlgmr.msra.gmra.mrb[4].mxu0 %v5158_v16 }
  0x98   : > { %4542 = vmatmul.mubr.f32.vlgmr.msra.gmra.mrb[4].mxu1 %v5158_v16  ;;  %4484 = vmatprep.mubr.f32.mxu0 %v5176_v25  ;;  %v2702_v16 = vld [vmem:[%s5826_s2] sm:$0xff]  ;;  %v5400_v35 = vpack.c.bf16 %v2758_v30, %v2754_v23  ;;  %v5414_v42 = vsub.f32 %v2705_v15, %v2758_v30 }
  0x99   : > { %4544 = vmatprep.mubr.f32.mxu1 %v5176_v25  ;;  %v2704_v25 = vld [vmem:[%s5826_s2 + $0x10] sm:$0xff]  ;;  %v2756_v31 = vand.u32 4294901760, %v2702_v16 }
  0x9a   : > { %v2760_v33 = vand.u32 4294901760, %v2704_v25  ;;  %4656 = vmatprep.subr.bf16.mxu0 %v5400_v35  ;;  %4644 = vmatprep.subr.bf16.mxu1 %v5400_v35  ;;  %v3013_v44 = vand.u32 4294901760, %v5414_v42  ;;  %v4651_v59 = vpack.c.bf16 %v5414_v42, %v5412_v41 }
  0x9b   : > { %4485 = vmatmul.mubr.f32.gmra.mrb[6].mxu0 %v5181_v27  ;;  %v5402_v38 = vsub.f32 %v2702_v16, %v2756_v31 }
  0x9c   : > { %4545 = vmatmul.mubr.f32.gmra.mrb[6].mxu1 %v5181_v27  ;;  %v5019_v27 = vmov 0.0   ;;  %v5404_v39 = vpack.c.bf16 %v2760_v33, %v2756_v31  ;;  %v5406_v40 = vsub.f32 %v2704_v25, %v2760_v33  ;;  %v3014_v48 = vsub.f32 %v5414_v42, %v3013_v44 }
  0x9d   : > { %3465 = vmatprep.mubr.f32.mxu0 %v5019_v27  ;;  %2822 = vmatprep.mubr.f32.mxu1 %v5019_v27  ;;  %v3007_v45 = vand.u32 4294901760, %v5402_v38  ;;  %v4659_v49 = vpack.c.bf16 %v3013_v44, %v3001_v43 }
  0x9e   : > { %4658 = vmatpush1.bf16.msra.mxu0 %v5404_v39  ;;  %4646 = vmatpush1.bf16.msra.mxu1 %v5404_v39  ;;  %v3019_v46 = vand.u32 4294901760, %v5406_v40  ;;  %v3015_v54 = vand.u32 4294901760, %v3014_v48  ;;  %v4653_v60 = vpack.c.bf16 %v5406_v40, %v5402_v38 }
  0x9f   : > { %v3008_v50 = vsub.f32 %v5402_v38, %v3007_v45  ;;  %4660 = vmatprep.subr.bf16.mxu0 %v4659_v49 }
  0xa0   : > { %v3020_v51 = vsub.f32 %v5406_v40, %v3019_v46  ;;  %v4661_v52 = vpack.c.bf16 %v3019_v46, %v3007_v45  ;;  %v4647_v57 = vpack.c.bf16 %v3015_v54, %v3003_v53 }
  0xa1   : > { %v3009_v55 = vand.u32 4294901760, %v3008_v50 }
  0xa2   : > { %v3021_v56 = vand.u32 4294901760, %v3020_v51  ;;  %4648 = vmatprep.subr.bf16.mxu1 %v4647_v57 }
  0xa4   : > { %v4649_v58 = vpack.c.bf16 %v3021_v56, %v3009_v55 }
 0x13a   : > { %v4363_v61 = vpop.f32.mrb[0].mxu0 }
 0x13b   : > { %847 = vst.msk [vmem:[#allocation2 + $0x8] sm:$0xff] %vm245_vm0, %v4363_v61  ;;  %v4423_v62 = vpop.f32.mrb[0].mxu1  ;;  %v824_v63 = vpop.f32.mrb[1].mxu0 }
 0x13c   : > { %1459 = vst.msk [vmem:[#allocation2 + $0x28] sm:$0xff] %vm245_vm0, %v4423_v62  ;;  %846 = vst.msk [vmem:[#allocation2] sm:$0xff] %vm245_vm0, %v824_v63  ;;  %v1435_v0 = vpop.f32.mrb[1].mxu1 }
 0x13d   : > { %1458 = vst.msk [vmem:[#allocation2 + $0x20] sm:$0xff] %vm245_vm0, %v1435_v0 }
 0x13e   : > { %v4366_v1 = vpop.f32.mrb[2].mxu0 }
 0x13f   : > { %849 = vst.msk [vmem:[#allocation2 + $0x18] sm:$0xff] %vm245_vm0, %v4366_v1  ;;  %v4426_v2 = vpop.f32.mrb[2].mxu1  ;;  %v836_v3 = vpop.f32.mrb[3].mxu0 }
 0x140   : > { %1461 = vst.msk [vmem:[#allocation2 + $0x38] sm:$0xff] %vm245_vm0, %v4426_v2  ;;  %848 = vst.msk [vmem:[#allocation2 + $0x10] sm:$0xff] %vm245_vm0, %v836_v3  ;;  %v1447_v4 = vpop.f32.mrb[3].mxu1 }
 0x141   : > { %1460 = vst.msk [vmem:[#allocation2 + $0x30] sm:$0xff] %vm245_vm0, %v1447_v4 }
 0x142   : > { %v2687_v5 = vld [vmem:[#allocation2 + $0x8] sm:$0xff] }
 0x143   : > { %v2686_v6 = vld [vmem:[#allocation2] sm:$0xff]  ;;  %v2710_v7 = vsel %vm245_vm0, %v2687_v5, 0  ;;  %v2691_v18 = vld [vmem:[#allocation2 + $0x28] sm:$0xff] }
 0x144   : > { %v2707_v8 = vsel %vm245_vm0, %v2686_v6, 0  ;;  %v5438_v9 = vand.u32 4294901760, %v2710_v7  ;;  %v2690_v11 = vld [vmem:[#allocation2 + $0x20] sm:$0xff]  ;;  %v2722_v37 = vsel %vm245_vm0, %v2691_v18, 0 }
 0x145   : > { %v5440_v10 = vand.u32 4294901760, %v2707_v8  ;;  %v2719_v24 = vsel %vm245_vm0, %v2690_v11, 0  ;;  %v5473_v25 = vand.u32 4294901760, %v2722_v37 }
 0x146   : > { %v5443_v12 = vsub.f32 %v2710_v7, %v5438_v9  ;;  %v2689_v13 = vld [vmem:[#allocation2 + $0x18] sm:$0xff]  ;;  %v5462_v36 = vand.u32 4294901760, %v2719_v24 }
 0x147   : > { %v5446_v17 = vsub.f32 %v2707_v8, %v5440_v10  ;;  %v2688_v19 = vld [vmem:[#allocation2 + $0x10] sm:$0xff]  ;;  %v2716_v20 = vsel %vm245_vm0, %v2689_v13, 0  ;;  %v2693_v43 = vld [vmem:[#allocation2 + $0x38] sm:$0xff]  ;;  %v5484_v44 = vsub.f32 %v2722_v37, %v5473_v25 }
 0x148   : > { %v2713_v21 = vsel %vm245_vm0, %v2688_v19, 0  ;;  %v2836_v28 = vand.u32 4294901760, %v5443_v12  ;;  %v5455_v14 = vand.u32 4294901760, %v2716_v20  ;;  %v2692_v30 = vld [vmem:[#allocation2 + $0x30] sm:$0xff]  ;;  %v5478_v42 = vsub.f32 %v2719_v24, %v5462_v36 }
 0x149   : > { %v2825_v26 = vand.u32 4294901760, %v5446_v17  ;;  %v5453_v29 = vand.u32 4294901760, %v2713_v21  ;;  %v2728_v49 = vsel %vm245_vm0, %v2693_v43, 0  ;;  %v2880_v50 = vand.u32 4294901760, %v5484_v44 }
 0x14a   : > { %v2837_v15 = vsub.f32 %v5443_v12, %v2836_v28  ;;  %v5468_v23 = vsub.f32 %v2716_v20, %v5455_v14  ;;  %v2869_v47 = vand.u32 4294901760, %v5478_v42  ;;  %v5498_v54 = vand.u32 4294901760, %v2728_v49 }
 0x14b   : > { %3469 = vmatmul.mubr.f32.vlgmr.msra.gmra.mrb[8].mxu0 %v2825_v26  ;;  %v2826_v32 = vsub.f32 %v5446_v17, %v2825_v26  ;;  %v5459_v34 = vsub.f32 %v2713_v21, %v5453_v29  ;;  %v2881_v56 = vsub.f32 %v5484_v44, %v2880_v50 }
 0x14c   : > { %3474 = vmatprep.mubr.f32.mxu0 %v5019_v27  ;;  %4662 = vmatpush1.bf16.msra.mxu0 %v4661_v52  ;;  %v2838_v31 = vand.u32 4294901760, %v2837_v15  ;;  %v2858_v41 = vand.u32 4294901760, %v5468_v23  ;;  %v2870_v52 = vsub.f32 %v5478_v42, %v2869_v47 }
 0x14d   : > { %v2827_v22 = vand.u32 4294901760, %v2826_v32  ;;  %v2847_v16 = vand.u32 4294901760, %v5459_v34  ;;  %4664 = vmatprep.subr.bf16.mxu0 %v5400_v35  ;;  %v2725_v35 = vsel %vm245_vm0, %v2692_v30, 0 }
 0x14e   : > { %v2859_v46 = vsub.f32 %v5468_v23, %v2858_v41  ;;  %v5488_v48 = vand.u32 4294901760, %v2725_v35  ;;  %v2871_v55 = vand.u32 4294901760, %v2870_v52 }
 0x14f   : > { %2828 = vmatmul.mubr.f32.vlgmr.msra.gmra.mrb[8].mxu1 %v2827_v22  ;;  %3478 = vmatmul.mubr.f32.gmra.mrb[10].mxu0 %v2836_v28  ;;  %v2848_v33 = vsub.f32 %v5459_v34, %v2847_v16 }
 0x150   : > { %2833 = vmatprep.mubr.f32.mxu1 %v5019_v27  ;;  %3483 = vmatprep.mubr.f32.mxu0 %v5019_v27  ;;  %v2860_v51 = vand.u32 4294901760, %v2859_v46  ;;  %v5496_v53 = vsub.f32 %v2725_v35, %v5488_v48 }
 0x151   : > { %4650 = vmatpush1.bf16.msra.mxu1 %v4649_v58  ;;  %v2849_v45 = vand.u32 4294901760, %v2848_v33  ;;  %v5505_v58 = vsub.f32 %v2728_v49, %v5498_v54 }
 0x152   : > { %4652 = vmatprep.subr.bf16.mxu1 %v4651_v59  ;;  %v2891_v57 = vand.u32 4294901760, %v5496_v53  ;;  %v2882_v59 = vand.u32 4294901760, %v2881_v56 }
 0x153   : > { %2839 = vmatmul.mubr.f32.gmra.mrb[10].mxu1 %v2838_v31  ;;  %3487 = vmatmul.mubr.f32.gmra.mrb[12].mxu0 %v2847_v16  ;;  %v2902_v62 = vand.u32 4294901760, %v5505_v58 }
 0x154   : > { %2844 = vmatprep.mubr.f32.mxu1 %v5019_v27  ;;  %3492 = vmatprep.mubr.f32.mxu0 %v5019_v27  ;;  %v2892_v61 = vsub.f32 %v5496_v53, %v2891_v57 }
 0x155   : > { %v2903_v0 = vsub.f32 %v5505_v58, %v2902_v62 }
 0x156   : > { %v2893_v63 = vand.u32 4294901760, %v2892_v61 }
 0x157   : > { %2850 = vmatmul.mubr.f32.gmra.mrb[12].mxu1 %v2849_v45  ;;  %3496 = vmatmul.mubr.f32.gmra.mrb[14].mxu0 %v2858_v41  ;;  %v2904_v1 = vand.u32 4294901760, %v2903_v0 }
 0x158   : > { %2855 = vmatprep.mubr.f32.mxu1 %v5019_v27  ;;  %3501 = vmatprep.mubr.f32.mxu0 %v5019_v27 }
 0x15b   : > { %2861 = vmatmul.mubr.f32.gmra.mrb[14].mxu1 %v2860_v51  ;;  %3505 = vmatmul.mubr.f32.gmra.mrb[16].mxu0 %v2869_v47 }
 0x15c   : > { %2866 = vmatprep.mubr.f32.mxu1 %v5019_v27  ;;  %3510 = vmatprep.mubr.f32.mxu0 %v5019_v27 }
 0x15f   : > { %2872 = vmatmul.mubr.f32.gmra.mrb[16].mxu1 %v2871_v55  ;;  %3514 = vmatmul.mubr.f32.gmra.mrb[18].mxu0 %v2880_v50 }
 0x160   : > { %2877 = vmatprep.mubr.f32.mxu1 %v5019_v27  ;;  %3519 = vmatprep.mubr.f32.mxu0 %v5019_v27 }
 0x163   : > { %2883 = vmatmul.mubr.f32.gmra.mrb[18].mxu1 %v2882_v59  ;;  %3523 = vmatmul.mubr.f32.gmra.mrb[20].mxu0 %v2891_v57 }
 0x164   : > { %2888 = vmatprep.mubr.f32.mxu1 %v5019_v27  ;;  %3528 = vmatprep.mubr.f32.mxu0 %v5019_v27 }
 0x167   : > { %2894 = vmatmul.mubr.f32.gmra.mrb[20].mxu1 %v2893_v63  ;;  %3532 = vmatmul.mubr.f32.gmra.mrb[22].mxu0 %v2902_v62 }
 0x168   : > { %2899 = vmatprep.mubr.f32.mxu1 %v5019_v27  ;;  %3537 = vmatprep.mubr.f32.mxu0 %v5019_v27 }
 0x16a   : > { %v4483_v2 = vpop.f32.mrb[4].mxu0 }
 0x16b   : > { %2071 = vst.msk [vmem:[#allocation2 + $0x48] sm:$0xff] %vm245_vm0, %v4483_v2  ;;  %v4543_v3 = vpop.f32.mrb[4].mxu1  ;;  %v2047_v4 = vpop.f32.mrb[5].mxu0  ;;  %2905 = vmatmul.mubr.f32.gmra.mrb[22].mxu1 %v2904_v1 }
 0x16c   : > { %2683 = vst.msk [vmem:[#allocation2 + $0x68] sm:$0xff] %vm245_vm0, %v4543_v3  ;;  %2070 = vst.msk [vmem:[#allocation2 + $0x40] sm:$0xff] %vm245_vm0, %v2047_v4  ;;  %v2659_v5 = vpop.f32.mrb[5].mxu1  ;;  %2910 = vmatprep.mubr.f32.mxu1 %v5019_v27 }
 0x16d   : > { %2682 = vst.msk [vmem:[#allocation2 + $0x60] sm:$0xff] %vm245_vm0, %v2659_v5 }
 0x16e   : > { %v4486_v6 = vpop.f32.mrb[6].mxu0 }
 0x16f   : > { %2073 = vst.msk [vmem:[#allocation2 + $0x58] sm:$0xff] %vm245_vm0, %v4486_v6  ;;  %v4546_v7 = vpop.f32.mrb[6].mxu1  ;;  %v2059_v8 = vpop.f32.mrb[7].mxu0 }
 0x170   : > { %2685 = vst.msk [vmem:[#allocation2 + $0x78] sm:$0xff] %vm245_vm0, %v4546_v7  ;;  %2072 = vst.msk [vmem:[#allocation2 + $0x50] sm:$0xff] %vm245_vm0, %v2059_v8  ;;  %v2671_v11 = vpop.f32.mrb[7].mxu1 }
 0x171   : > { %2684 = vst.msk [vmem:[#allocation2 + $0x70] sm:$0xff] %vm245_vm0, %v2671_v11 }
 0x172   : > { %v2695_v13 = vld [vmem:[#allocation2 + $0x48] sm:$0xff] }
 0x173   : > { %v2694_v19 = vld [vmem:[#allocation2 + $0x40] sm:$0xff]  ;;  %v2734_v20 = vsel %vm245_vm0, %v2695_v13, 0  ;;  %v2699_v43 = vld [vmem:[#allocation2 + $0x68] sm:$0xff] }
 0x174   : > { %v2731_v21 = vsel %vm245_vm0, %v2694_v19, 0  ;;  %v5527_v24 = vand.u32 4294901760, %v2734_v20  ;;  %v2698_v28 = vld [vmem:[#allocation2 + $0x60] sm:$0xff]  ;;  %v2746_v49 = vsel %vm245_vm0, %v2699_v43, 0 }
 0x175   : > { %v5529_v26 = vand.u32 4294901760, %v2731_v21  ;;  %v2743_v30 = vsel %vm245_vm0, %v2698_v28, 0  ;;  %v5561_v57 = vand.u32 4294901760, %v2746_v49 }
 0x176   : > { %v5532_v18 = vsub.f32 %v2734_v20, %v5527_v24  ;;  %v2697_v32 = vld [vmem:[#allocation2 + $0x58] sm:$0xff]  ;;  %v5551_v47 = vand.u32 4294901760, %v2743_v30 }
 0x177   : > { %v5535_v37 = vsub.f32 %v2731_v21, %v5529_v26  ;;  %v2696_v22 = vld [vmem:[#allocation2 + $0x50] sm:$0xff]  ;;  %v2740_v15 = vsel %vm245_vm0, %v2697_v32, 0  ;;  %v2701_v1 = vld [vmem:[#allocation2 + $0x78] sm:$0xff]  ;;  %v5572_v2 = vsub.f32 %v2746_v49, %v5561_v57 }
 0x178   : > { %v2737_v16 = vsel %vm245_vm0, %v2696_v22, 0  ;;  %v2924_v33 = vand.u32 4294901760, %v5532_v18  ;;  %v5544_v35 = vand.u32 4294901760, %v2740_v15  ;;  %v2700_v56 = vld [vmem:[#allocation2 + $0x70] sm:$0xff]  ;;  %v5566_v63 = vsub.f32 %v2743_v30, %v5551_v47 }
 0x179   : > { %v2913_v31 = vand.u32 4294901760, %v5535_v37  ;;  %v5542_v41 = vand.u32 4294901760, %v2737_v16  ;;  %v2749_v0 = vsel %vm245_vm0, %v2700_v56, 0  ;;  %v2752_v7 = vsel %vm245_vm0, %v2701_v1, 0 }
 0x17a   : > { %v2925_v51 = vsub.f32 %v5532_v18, %v2924_v33  ;;  %v5557_v55 = vsub.f32 %v2740_v15, %v5544_v35  ;;  %v2957_v5 = vand.u32 4294901760, %v5566_v63  ;;  %v5576_v6 = vand.u32 4294901760, %v2749_v0 }
 0x17b   : > { %3541 = vmatmul.mubr.f32.gmra.mrb[24].mxu0 %v2913_v31  ;;  %v2914_v45 = vsub.f32 %v5535_v37, %v2913_v31  ;;  %v5548_v46 = vsub.f32 %v2737_v16, %v5542_v41  ;;  %v2968_v8 = vand.u32 4294901760, %v5572_v2  ;;  %v5586_v20 = vand.u32 4294901760, %v2752_v7 }
 0x17c   : > { %3546 = vmatprep.mubr.f32.mxu0 %v5019_v27  ;;  %v2926_v59 = vand.u32 4294901760, %v2925_v51  ;;  %v2946_v62 = vand.u32 4294901760, %v5557_v55  ;;  %v2958_v13 = vsub.f32 %v5566_v63, %v2957_v5  ;;  %v5584_v19 = vsub.f32 %v2749_v0, %v5576_v6 }
 0x17d   : > { %v2915_v50 = vand.u32 4294901760, %v2914_v45  ;;  %v2935_v52 = vand.u32 4294901760, %v5548_v46  ;;  %v2969_v28 = vsub.f32 %v5572_v2, %v2968_v8  ;;  %v5593_v22 = vsub.f32 %v2752_v7, %v5586_v20 }
 0x17e   : > { %v2947_v4 = vsub.f32 %v5557_v55, %v2946_v62  ;;  %v2959_v21 = vand.u32 4294901760, %v2958_v13  ;;  %v2979_v32 = vand.u32 4294901760, %v5584_v19 }
 0x17f   : > { %2916 = vmatmul.mubr.f32.gmra.mrb[24].mxu1 %v2915_v50  ;;  %3550 = vmatmul.mubr.f32.gmra.mrb[26].mxu0 %v2924_v33  ;;  %v2936_v61 = vsub.f32 %v5548_v46, %v2935_v52  ;;  %v2970_v15 = vand.u32 4294901760, %v2969_v28  ;;  %v2990_v30 = vand.u32 4294901760, %v5593_v22 }
 0x180   : > { %2921 = vmatprep.mubr.f32.mxu1 %v5019_v27  ;;  %3555 = vmatprep.mubr.f32.mxu0 %v5019_v27  ;;  %v2948_v11 = vand.u32 4294901760, %v2947_v4  ;;  %v2980_v16 = vsub.f32 %v5584_v19, %v2979_v32 }
 0x181   : > { %v2937_v3 = vand.u32 4294901760, %v2936_v61  ;;  %v2991_v33 = vsub.f32 %v5593_v22, %v2990_v30 }
 0x182   : > { %v2981_v31 = vand.u32 4294901760, %v2980_v16 }
 0x183   : > { %2927 = vmatmul.mubr.f32.gmra.mrb[26].mxu1 %v2926_v59  ;;  %3559 = vmatmul.mubr.f32.gmra.mrb[28].mxu0 %v2935_v52  ;;  %v2992_v43 = vand.u32 4294901760, %v2991_v33 }
 0x184   : > { %2932 = vmatprep.mubr.f32.mxu1 %v5019_v27  ;;  %3564 = vmatprep.mubr.f32.mxu0 %v5019_v27 }
 0x187   : > { %2938 = vmatmul.mubr.f32.gmra.mrb[28].mxu1 %v2937_v3  ;;  %3568 = vmatmul.mubr.f32.gmra.mrb[30].mxu0 %v2946_v62 }
 0x188   : > { %2943 = vmatprep.mubr.f32.mxu1 %v5019_v27  ;;  %3573 = vmatprep.mubr.f32.mxu0 %v5019_v27 }
 0x18b   : > { %2949 = vmatmul.mubr.f32.gmra.mrb[30].mxu1 %v2948_v11  ;;  %3577 = vmatmul.mubr.f32.gmra.mrb[32].mxu0 %v2957_v5 }
 0x18c   : > { %2954 = vmatprep.mubr.f32.mxu1 %v5019_v27  ;;  %3582 = vmatprep.mubr.f32.mxu0 %v5019_v27 }
 0x18f   : > { %2960 = vmatmul.mubr.f32.gmra.mrb[32].mxu1 %v2959_v21  ;;  %3586 = vmatmul.mubr.f32.gmra.mrb[34].mxu0 %v2968_v8 }
 0x190   : > { %2965 = vmatprep.mubr.f32.mxu1 %v5019_v27  ;;  %3591 = vmatprep.mubr.f32.mxu0 %v5019_v27 }
 0x193   : > { %2971 = vmatmul.mubr.f32.gmra.mrb[34].mxu1 %v2970_v15  ;;  %3595 = vmatmul.mubr.f32.gmra.mrb[36].mxu0 %v2979_v32 }
 0x194   : > { %2976 = vmatprep.mubr.f32.mxu1 %v5019_v27  ;;  %3600 = vmatprep.mubr.f32.mxu0 %v5019_v27 }
 0x197   : > { %2982 = vmatmul.mubr.f32.gmra.mrb[36].mxu1 %v2981_v31  ;;  %3604 = vmatmul.mubr.f32.gmra.mrb[38].mxu0 %v2990_v30 }
 0x198   : > { %2987 = vmatprep.mubr.f32.mxu1 %v5019_v27  ;;  %3686 = vmatprep.mubr.f32.mxu0 %v5019_v27 }
 0x19b   : > { %2993 = vmatmul.mubr.f32.gmra.mrb[38].mxu1 %v2992_v43  ;;  %3688 = vmatmul.mubr.f32.vlgmr.msra.gmra.mrb[8].mxu0 %v5440_v10 }
 0x19c   : > { %3083 = vmatprep.mubr.f32.mxu1 %v5019_v27  ;;  %3693 = vmatprep.mubr.f32.mxu0 %v5019_v27 }
 0x19d   : > { %4666 = vmatpush1.bf16.msra.mxu0 %v5404_v39 }
 0x19f   : > { %3085 = vmatmul.mubr.f32.vlgmr.msra.gmra.mrb[8].mxu1 %v5440_v10  ;;  %3695 = vmatmul.mubr.f32.gmra.mrb[10].mxu0 %v5438_v9 }
 0x1a0   : > { %4654 = vmatpush1.bf16.msra.mxu1 %v4653_v60  ;;  %3090 = vmatprep.mubr.f32.mxu1 %v5019_v27 }
 0x1a1   : > { %3700 = vmatprep.mubr.f32.mxu0 %v5019_v27 }
 0x1a3   : > { %3092 = vmatmul.mubr.f32.gmra.mrb[10].mxu1 %v5438_v9  ;;  %3702 = vmatmul.mubr.f32.gmra.mrb[12].mxu0 %v5453_v29 }
 0x1a4   : > { %3097 = vmatprep.mubr.f32.mxu1 %v5019_v27  ;;  %3707 = vmatprep.mubr.f32.mxu0 %v5019_v27 }
 0x1a7   : > { %3099 = vmatmul.mubr.f32.gmra.mrb[12].mxu1 %v5453_v29  ;;  %3709 = vmatmul.mubr.f32.gmra.mrb[14].mxu0 %v5455_v14 }
 0x1a8   : > { %3104 = vmatprep.mubr.f32.mxu1 %v5019_v27  ;;  %3714 = vmatprep.mubr.f32.mxu0 %v5019_v27 }
 0x1ab   : > { %3106 = vmatmul.mubr.f32.gmra.mrb[14].mxu1 %v5455_v14  ;;  %3716 = vmatmul.mubr.f32.gmra.mrb[16].mxu0 %v5462_v36 }
 0x1ac   : > { %3111 = vmatprep.mubr.f32.mxu1 %v5019_v27  ;;  %3721 = vmatprep.mubr.f32.mxu0 %v5019_v27 }
 0x1af   : > { %3113 = vmatmul.mubr.f32.gmra.mrb[16].mxu1 %v5462_v36  ;;  %3723 = vmatmul.mubr.f32.gmra.mrb[18].mxu0 %v5473_v25 }
 0x1b0   : > { %3118 = vmatprep.mubr.f32.mxu1 %v5019_v27  ;;  %3728 = vmatprep.mubr.f32.mxu0 %v5019_v27 }
 0x1b3   : > { %3120 = vmatmul.mubr.f32.gmra.mrb[18].mxu1 %v5473_v25  ;;  %3730 = vmatmul.mubr.f32.gmra.mrb[20].mxu0 %v5488_v48 }
 0x1b4   : > { %3125 = vmatprep.mubr.f32.mxu1 %v5019_v27  ;;  %3735 = vmatprep.mubr.f32.mxu0 %v5019_v27 }
 0x1b7   : > { %3127 = vmatmul.mubr.f32.gmra.mrb[20].mxu1 %v5488_v48  ;;  %3737 = vmatmul.mubr.f32.gmra.mrb[22].mxu0 %v5498_v54 }
 0x1b8   : > { %3132 = vmatprep.mubr.f32.mxu1 %v5019_v27  ;;  %3742 = vmatprep.mubr.f32.mxu0 %v5019_v27 }
 0x1bb   : > { %3134 = vmatmul.mubr.f32.gmra.mrb[22].mxu1 %v5498_v54  ;;  %3744 = vmatmul.mubr.f32.gmra.mrb[24].mxu0 %v5529_v26 }
 0x1bc   : > { %3139 = vmatprep.mubr.f32.mxu1 %v5019_v27  ;;  %3749 = vmatprep.mubr.f32.mxu0 %v5019_v27 }
 0x1bf   : > { %3141 = vmatmul.mubr.f32.gmra.mrb[24].mxu1 %v5529_v26  ;;  %3751 = vmatmul.mubr.f32.gmra.mrb[26].mxu0 %v5527_v24 }
 0x1c0   : > { %3146 = vmatprep.mubr.f32.mxu1 %v5019_v27  ;;  %3756 = vmatprep.mubr.f32.mxu0 %v5019_v27 }
 0x1c3   : > { %3148 = vmatmul.mubr.f32.gmra.mrb[26].mxu1 %v5527_v24  ;;  %3758 = vmatmul.mubr.f32.gmra.mrb[28].mxu0 %v5542_v41 }
 0x1c4   : > { %3153 = vmatprep.mubr.f32.mxu1 %v5019_v27  ;;  %3763 = vmatprep.mubr.f32.mxu0 %v5019_v27 }
 0x1c7   : > { %3155 = vmatmul.mubr.f32.gmra.mrb[28].mxu1 %v5542_v41  ;;  %3765 = vmatmul.mubr.f32.gmra.mrb[30].mxu0 %v5544_v35 }
 0x1c8   : > { %3160 = vmatprep.mubr.f32.mxu1 %v5019_v27  ;;  %3770 = vmatprep.mubr.f32.mxu0 %v5019_v27 }
 0x1cb   : > { %3162 = vmatmul.mubr.f32.gmra.mrb[30].mxu1 %v5544_v35  ;;  %3772 = vmatmul.mubr.f32.gmra.mrb[32].mxu0 %v5551_v47 }
 0x1cc   : > { %3167 = vmatprep.mubr.f32.mxu1 %v5019_v27  ;;  %3777 = vmatprep.mubr.f32.mxu0 %v5019_v27 }
 0x1cf   : > { %3169 = vmatmul.mubr.f32.gmra.mrb[32].mxu1 %v5551_v47  ;;  %3779 = vmatmul.mubr.f32.gmra.mrb[34].mxu0 %v5561_v57 }
 0x1d0   : > { %3174 = vmatprep.mubr.f32.mxu1 %v5019_v27  ;;  %3784 = vmatprep.mubr.f32.mxu0 %v5019_v27 }
 0x1d3   : > { %3176 = vmatmul.mubr.f32.gmra.mrb[34].mxu1 %v5561_v57  ;;  %3786 = vmatmul.mubr.f32.gmra.mrb[36].mxu0 %v5576_v6 }
 0x1d4   : > { %3181 = vmatprep.mubr.f32.mxu1 %v5019_v27  ;;  %3791 = vmatprep.mubr.f32.mxu0 %v5019_v27 }
 0x1d7   : > { %3183 = vmatmul.mubr.f32.gmra.mrb[36].mxu1 %v5576_v6  ;;  %3793 = vmatmul.mubr.f32.gmra.mrb[38].mxu0 %v5586_v20 }
 0x1d8   : > { %3188 = vmatprep.mubr.f32.mxu1 %v5019_v27  ;;  %3867 = vmatprep.mubr.f32.mxu0 %v5019_v27 }
 0x1db   : > { %3190 = vmatmul.mubr.f32.gmra.mrb[38].mxu1 %v5586_v20  ;;  %3869 = vmatmul.mubr.f32.vlgmr.msra.gmra.mrb[8].mxu0 %v5440_v10 }
 0x1dc   : > { %3268 = vmatprep.mubr.f32.mxu1 %v5019_v27  ;;  %3874 = vmatprep.mubr.f32.mxu0 %v5019_v27 }
 0x1df   : > { %3271 = vmatmul.mubr.f32.vlgmr.msra.gmra.mrb[8].mxu1 %v5446_v17  ;;  %3876 = vmatmul.mubr.f32.gmra.mrb[10].mxu0 %v5438_v9 }
 0x1e0   : > { %3276 = vmatprep.mubr.f32.mxu1 %v5019_v27  ;;  %3881 = vmatprep.mubr.f32.mxu0 %v5019_v27 }
 0x1e3   : > { %3279 = vmatmul.mubr.f32.gmra.mrb[10].mxu1 %v5443_v12  ;;  %3883 = vmatmul.mubr.f32.gmra.mrb[12].mxu0 %v5453_v29 }
 0x1e4   : > { %3284 = vmatprep.mubr.f32.mxu1 %v5019_v27  ;;  %3888 = vmatprep.mubr.f32.mxu0 %v5019_v27 }
 0x1e7   : > { %3287 = vmatmul.mubr.f32.gmra.mrb[12].mxu1 %v5459_v34  ;;  %3890 = vmatmul.mubr.f32.gmra.mrb[14].mxu0 %v5455_v14 }
 0x1e8   : > { %3292 = vmatprep.mubr.f32.mxu1 %v5019_v27  ;;  %3895 = vmatprep.mubr.f32.mxu0 %v5019_v27 }
 0x1eb   : > { %3295 = vmatmul.mubr.f32.gmra.mrb[14].mxu1 %v5468_v23  ;;  %3897 = vmatmul.mubr.f32.gmra.mrb[16].mxu0 %v5462_v36 }
 0x1ec   : > { %3300 = vmatprep.mubr.f32.mxu1 %v5019_v27  ;;  %3902 = vmatprep.mubr.f32.mxu0 %v5019_v27 }
 0x1ef   : > { %3303 = vmatmul.mubr.f32.gmra.mrb[16].mxu1 %v5478_v42  ;;  %3904 = vmatmul.mubr.f32.gmra.mrb[18].mxu0 %v5473_v25 }
 0x1f0   : > { %3308 = vmatprep.mubr.f32.mxu1 %v5019_v27  ;;  %3909 = vmatprep.mubr.f32.mxu0 %v5019_v27 }
 0x1f3   : > { %3311 = vmatmul.mubr.f32.gmra.mrb[18].mxu1 %v5484_v44  ;;  %3911 = vmatmul.mubr.f32.gmra.mrb[20].mxu0 %v5488_v48 }
 0x1f4   : > { %3316 = vmatprep.mubr.f32.mxu1 %v5019_v27  ;;  %3916 = vmatprep.mubr.f32.mxu0 %v5019_v27 }
 0x1f7   : > { %3319 = vmatmul.mubr.f32.gmra.mrb[20].mxu1 %v5496_v53  ;;  %3918 = vmatmul.mubr.f32.gmra.mrb[22].mxu0 %v5498_v54 }
 0x1f8   : > { %3324 = vmatprep.mubr.f32.mxu1 %v5019_v27  ;;  %3923 = vmatprep.mubr.f32.mxu0 %v5019_v27 }
 0x1fb   : > { %3327 = vmatmul.mubr.f32.gmra.mrb[22].mxu1 %v5505_v58  ;;  %3925 = vmatmul.mubr.f32.gmra.mrb[24].mxu0 %v5529_v26 }
 0x1fc   : > { %3332 = vmatprep.mubr.f32.mxu1 %v5019_v27  ;;  %3930 = vmatprep.mubr.f32.mxu0 %v5019_v27 }
 0x1ff   : > { %3335 = vmatmul.mubr.f32.gmra.mrb[24].mxu1 %v5535_v37  ;;  %3932 = vmatmul.mubr.f32.gmra.mrb[26].mxu0 %v5527_v24 }
 0x200   : > { %3340 = vmatprep.mubr.f32.mxu1 %v5019_v27  ;;  %3937 = vmatprep.mubr.f32.mxu0 %v5019_v27 }
 0x203   : > { %3343 = vmatmul.mubr.f32.gmra.mrb[26].mxu1 %v5532_v18  ;;  %3939 = vmatmul.mubr.f32.gmra.mrb[28].mxu0 %v5542_v41 }
 0x204   : > { %3348 = vmatprep.mubr.f32.mxu1 %v5019_v27  ;;  %3944 = vmatprep.mubr.f32.mxu0 %v5019_v27 }
 0x207   : > { %3351 = vmatmul.mubr.f32.gmra.mrb[28].mxu1 %v5548_v46  ;;  %3946 = vmatmul.mubr.f32.gmra.mrb[30].mxu0 %v5544_v35 }
 0x208   : > { %3356 = vmatprep.mubr.f32.mxu1 %v5019_v27  ;;  %3951 = vmatprep.mubr.f32.mxu0 %v5019_v27 }
 0x20b   : > { %3359 = vmatmul.mubr.f32.gmra.mrb[30].mxu1 %v5557_v55  ;;  %3953 = vmatmul.mubr.f32.gmra.mrb[32].mxu0 %v5551_v47 }
 0x20c   : > { %3364 = vmatprep.mubr.f32.mxu1 %v5019_v27  ;;  %3958 = vmatprep.mubr.f32.mxu0 %v5019_v27 }
 0x20f   : > { %3367 = vmatmul.mubr.f32.gmra.mrb[32].mxu1 %v5566_v63  ;;  %3960 = vmatmul.mubr.f32.gmra.mrb[34].mxu0 %v5561_v57 }
 0x210   : > { %3372 = vmatprep.mubr.f32.mxu1 %v5019_v27  ;;  %3965 = vmatprep.mubr.f32.mxu0 %v5019_v27 }
 0x213   : > { %3375 = vmatmul.mubr.f32.gmra.mrb[34].mxu1 %v5572_v2  ;;  %3967 = vmatmul.mubr.f32.gmra.mrb[36].mxu0 %v5576_v6 }
 0x214   : > { %3380 = vmatprep.mubr.f32.mxu1 %v5019_v27  ;;  %3972 = vmatprep.mubr.f32.mxu0 %v5019_v27 }
 0x217   : > { %3383 = vmatmul.mubr.f32.gmra.mrb[36].mxu1 %v5584_v19  ;;  %3974 = vmatmul.mubr.f32.gmra.mrb[38].mxu0 %v5586_v20 }
 0x218   : > { %3388 = vmatprep.mubr.f32.mxu1 %v5019_v27 }
 0x21b   : > { %3391 = vmatmul.mubr.f32.gmra.mrb[38].mxu1 %v5593_v22 }
 0x2ae   : > { %v3870_v38 = vpop.f32.mrb[8].mxu0 }
 0x2af   : > { %v3872_v39 = vpop.f32.mrb[9].mxu0 }
 0x2b2   : > { %v3272_v40 = vpop.f32.mrb[8].mxu1  ;;  %v3877_v27 = vpop.f32.mrb[10].mxu0 }
 0x2b3   : > { %v4667_v60 = vadd.f32 %v3870_v38, %v3272_v40  ;;  %v3274_v9 = vpop.f32.mrb[9].mxu1  ;;  %v3879_v10 = vpop.f32.mrb[11].mxu0 }
 0x2b4   : > { %v4668_v12 = vadd.f32 %v3872_v39, %v3274_v9 }
 0x2b5   : > { %3981 = vst.msk [vmem:[%s5740_s6] sm:$0xff] %vm3980_vm1, %v4667_v60 }
 0x2b6   : > { %4142 = vst.msk [vmem:[%s5745_s18 + $0x10] sm:$0xff] %vm3980_vm1, %v4668_v12  ;;  %v3280_v17 = vpop.f32.mrb[10].mxu1  ;;  %v3884_v29 = vpop.f32.mrb[12].mxu0 }
 0x2b7   : > { %v4669_v14 = vadd.f32 %v3877_v27, %v3280_v17  ;;  %v3282_v34 = vpop.f32.mrb[11].mxu1  ;;  %v3886_v36 = vpop.f32.mrb[13].mxu0 }
 0x2b8   : > { %v4670_v23 = vadd.f32 %v3879_v10, %v3282_v34 }
 0x2b9   : > { %3983 = vst.msk [vmem:[%s5740_s6 + $0x8] sm:$0x3f] %vm3982_vm2, %v4669_v14 }
 0x2ba   : > { %4143 = vst.msk [vmem:[%s5745_s18 + $0x18] sm:$0x3f] %vm3982_vm2, %v4670_v23  ;;  %v3288_v25 = vpop.f32.mrb[12].mxu1  ;;  %v3891_v42 = vpop.f32.mrb[14].mxu0 }
 0x2bb   : > { %v4671_v44 = vadd.f32 %v3884_v29, %v3288_v25  ;;  %v3290_v48 = vpop.f32.mrb[13].mxu1  ;;  %v3893_v53 = vpop.f32.mrb[15].mxu0 }
 0x2bc   : > { %v4672_v54 = vadd.f32 %v3886_v36, %v3290_v48 }
 0x2bd   : > { %3990 = vst.msk [vmem:[%s5745_s18] sm:$0xff] %vm3980_vm1, %v4671_v44 }
 0x2be   : > { %4150 = vst.msk [vmem:[%s5745_s18 + $0x20] sm:$0xff] %vm3980_vm1, %v4672_v54  ;;  %v3296_v58 = vpop.f32.mrb[14].mxu1  ;;  %v3898_v24 = vpop.f32.mrb[16].mxu0 }
 0x2bf   : > { %v4673_v26 = vadd.f32 %v3891_v42, %v3296_v58  ;;  %v3298_v18 = vpop.f32.mrb[15].mxu1  ;;  %v3900_v37 = vpop.f32.mrb[17].mxu0 }
 0x2c0   : > { %v4674_v41 = vadd.f32 %v3893_v53, %v3298_v18 }
 0x2c1   : > { %3991 = vst.msk [vmem:[%s5745_s18 + $0x8] sm:$0x3f] %vm3982_vm2, %v4673_v26 }
 0x2c2   : > { %4151 = vst.msk [vmem:[%s5745_s18 + $0x28] sm:$0x3f] %vm3982_vm2, %v4674_v41  ;;  %v3304_v35 = vpop.f32.mrb[16].mxu1  ;;  %v3905_v45 = vpop.f32.mrb[18].mxu0 }
 0x2c3   : > { %v4675_v46 = vadd.f32 %v3898_v24, %v3304_v35  ;;  %v3306_v47 = vpop.f32.mrb[17].mxu1  ;;  %v3907_v49 = vpop.f32.mrb[19].mxu0 }
 0x2c4   : > { %v4676_v50 = vadd.f32 %v3900_v37, %v3306_v47 }
 0x2c5   : > { %3984 = vst.msk [vmem:[%s5740_s6 + $0x10] sm:$0xff] %vm3980_vm1, %v4675_v46 }
 0x2c6   : > { %4144 = vst.msk [vmem:[%s5745_s18 + $0x40] sm:$0xff] %vm3980_vm1, %v4676_v50  ;;  %v3312_v51 = vpop.f32.mrb[18].mxu1  ;;  %v3912_v52 = vpop.f32.mrb[20].mxu0 }
 0x2c7   : > { %v4677_v55 = vadd.f32 %v3905_v45, %v3312_v51  ;;  %v3314_v56 = vpop.f32.mrb[19].mxu1  ;;  %v3914_v57 = vpop.f32.mrb[21].mxu0 }
 0x2c8   : > { %v4678_v59 = vadd.f32 %v3907_v49, %v3314_v56 }
 0x2c9   : > { %3985 = vst.msk [vmem:[%s5740_s6 + $0x18] sm:$0x3f] %vm3982_vm2, %v4677_v55 }
 0x2ca   : > { %4145 = vst.msk [vmem:[%s5745_s18 + $0x48] sm:$0x3f] %vm3982_vm2, %v4678_v59  ;;  %v3320_v61 = vpop.f32.mrb[20].mxu1  ;;  %v3919_v62 = vpop.f32.mrb[22].mxu0 }
 0x2cb   : > { %v4679_v63 = vadd.f32 %v3912_v52, %v3320_v61  ;;  %v3322_v0 = vpop.f32.mrb[21].mxu1  ;;  %v3921_v1 = vpop.f32.mrb[23].mxu0 }
 0x2cc   : > { %v4680_v2 = vadd.f32 %v3914_v57, %v3322_v0 }
 0x2cd   : > { %3992 = vst.msk [vmem:[%s5745_s18 + $0x30] sm:$0xff] %vm3980_vm1, %v4679_v63 }
 0x2ce   : > { %4152 = vst.msk [vmem:[%s5745_s18 + $0x50] sm:$0xff] %vm3980_vm1, %v4680_v2  ;;  %v3328_v3 = vpop.f32.mrb[22].mxu1  ;;  %v3926_v4 = vpop.f32.mrb[24].mxu0 }
 0x2cf   : > { %v4681_v5 = vadd.f32 %v3919_v62, %v3328_v3  ;;  %v3330_v6 = vpop.f32.mrb[23].mxu1  ;;  %v3928_v7 = vpop.f32.mrb[25].mxu0 }
 0x2d0   : > { %v4682_v8 = vadd.f32 %v3921_v1, %v3330_v6 }
 0x2d1   : > { %3993 = vst.msk [vmem:[%s5745_s18 + $0x38] sm:$0x3f] %vm3982_vm2, %v4681_v5 }
 0x2d2   : > { %4153 = vst.msk [vmem:[%s5745_s18 + $0x58] sm:$0x3f] %vm3982_vm2, %v4682_v8  ;;  %v3336_v11 = vpop.f32.mrb[24].mxu1  ;;  %v3933_v13 = vpop.f32.mrb[26].mxu0 }
 0x2d3   : > { %v4683_v19 = vadd.f32 %v3926_v4, %v3336_v11  ;;  %v3338_v20 = vpop.f32.mrb[25].mxu1  ;;  %v3935_v21 = vpop.f32.mrb[27].mxu0 }
 0x2d4   : > { %v4684_v28 = vadd.f32 %v3928_v7, %v3338_v20 }
 0x2d5   : > { %3986 = vst.msk [vmem:[%s5740_s6 + $0x20] sm:$0xff] %vm3980_vm1, %v4683_v19 }
 0x2d6   : > { %4146 = vst.msk [vmem:[%s5745_s18 + $0x70] sm:$0xff] %vm3980_vm1, %v4684_v28  ;;  %v3344_v32 = vpop.f32.mrb[26].mxu1  ;;  %v3940_v22 = vpop.f32.mrb[28].mxu0 }
 0x2d7   : > { %v4685_v15 = vadd.f32 %v3933_v13, %v3344_v32  ;;  %v3346_v16 = vpop.f32.mrb[27].mxu1  ;;  %v3942_v30 = vpop.f32.mrb[29].mxu0 }
 0x2d8   : > { %v4686_v31 = vadd.f32 %v3935_v21, %v3346_v16 }
 0x2d9   : > { %3987 = vst.msk [vmem:[%s5740_s6 + $0x28] sm:$0x3f] %vm3982_vm2, %v4685_v15 }
 0x2da   : > { %4147 = vst.msk [vmem:[%s5745_s18 + $0x78] sm:$0x3f] %vm3982_vm2, %v4686_v31  ;;  %v3352_v33 = vpop.f32.mrb[28].mxu1  ;;  %v3947_v43 = vpop.f32.mrb[30].mxu0 }
 0x2db   : > { %v4687_v38 = vadd.f32 %v3940_v22, %v3352_v33  ;;  %v3354_v39 = vpop.f32.mrb[29].mxu1  ;;  %v3949_v40 = vpop.f32.mrb[31].mxu0 }
 0x2dc   : > { %v4688_v27 = vadd.f32 %v3942_v30, %v3354_v39 }
 0x2dd   : > { %3994 = vst.msk [vmem:[%s5745_s18 + $0x60] sm:$0xff] %vm3980_vm1, %v4687_v38 }
 0x2de   : > { %4154 = vst.msk [vmem:[%s5745_s18 + $0x80] sm:$0xff] %vm3980_vm1, %v4688_v27  ;;  %v3360_v60 = vpop.f32.mrb[30].mxu1  ;;  %v3954_v9 = vpop.f32.mrb[32].mxu0 }
 0x2df   : > { %v4689_v10 = vadd.f32 %v3947_v43, %v3360_v60  ;;  %v3362_v12 = vpop.f32.mrb[31].mxu1  ;;  %v3956_v17 = vpop.f32.mrb[33].mxu0 }
 0x2e0   : > { %v4690_v29 = vadd.f32 %v3949_v40, %v3362_v12 }
 0x2e1   : > { %3995 = vst.msk [vmem:[%s5745_s18 + $0x68] sm:$0x3f] %vm3982_vm2, %v4689_v10 }
 0x2e2   : > { %4155 = vst.msk [vmem:[%s5745_s18 + $0x88] sm:$0x3f] %vm3982_vm2, %v4690_v29  ;;  %v3368_v14 = vpop.f32.mrb[32].mxu1  ;;  %v3961_v34 = vpop.f32.mrb[34].mxu0 }
 0x2e3   : > { %v4691_v36 = vadd.f32 %v3954_v9, %v3368_v14  ;;  %v3370_v23 = vpop.f32.mrb[33].mxu1  ;;  %v3963_v25 = vpop.f32.mrb[35].mxu0 }
 0x2e4   : > { %v4692_v42 = vadd.f32 %v3956_v17, %v3370_v23 }
 0x2e5   : > { %3988 = vst.msk [vmem:[%s5740_s6 + $0x30] sm:$0xff] %vm3980_vm1, %v4691_v36 }
 0x2e6   : > { %4148 = vst.msk [vmem:[%s5745_s18 + $0xa0] sm:$0xff] %vm3980_vm1, %v4692_v42  ;;  %v3376_v44 = vpop.f32.mrb[34].mxu1  ;;  %v3968_v48 = vpop.f32.mrb[36].mxu0 }
 0x2e7   : > { %v4693_v53 = vadd.f32 %v3961_v34, %v3376_v44  ;;  %v3378_v54 = vpop.f32.mrb[35].mxu1  ;;  %v3970_v58 = vpop.f32.mrb[37].mxu0 }
 0x2e8   : > { %v4694_v24 = vadd.f32 %v3963_v25, %v3378_v54 }
 0x2e9   : > { %3989 = vst.msk [vmem:[%s5740_s6 + $0x38] sm:$0x3f] %vm3982_vm2, %v4693_v53 }
 0x2ea   : > { %4149 = vst.msk [vmem:[%s5745_s18 + $0xa8] sm:$0x3f] %vm3982_vm2, %v4694_v24  ;;  %v3384_v26 = vpop.f32.mrb[36].mxu1  ;;  %v3975_v18 = vpop.f32.mrb[38].mxu0 }
 0x2eb   : > { %v4695_v37 = vadd.f32 %v3968_v48, %v3384_v26  ;;  %v3386_v41 = vpop.f32.mrb[37].mxu1  ;;  %v3977_v35 = vpop.f32.mrb[39].mxu0 }
 0x2ec   : > { %v4696_v45 = vadd.f32 %v3970_v58, %v3386_v41 }
 0x2ed   : > { %3996 = vst.msk [vmem:[%s5745_s18 + $0x90] sm:$0xff] %vm3980_vm1, %v4695_v37 }
 0x2ee   : > { %4156 = vst.msk [vmem:[%s5745_s18 + $0xb0] sm:$0xff] %vm3980_vm1, %v4696_v45  ;;  %v3392_v46 = vpop.f32.mrb[38].mxu1 }
 0x2ef   : > { %v4697_v47 = vadd.f32 %v3975_v18, %v3392_v46  ;;  %v3394_v49 = vpop.f32.mrb[39].mxu1 }
 0x2f0   : > { %v4698_v50 = vadd.f32 %v3977_v35, %v3394_v49 }
 0x2f1   : > { %3997 = vst.msk [vmem:[%s5745_s18 + $0x98] sm:$0x3f] %vm3982_vm2, %v4697_v47 }
 0x2f2   : > { %4157 = vst.msk [vmem:[%s5745_s18 + $0xb8] sm:$0x3f] %vm3982_vm2, %v4698_v50 }
 0x2f3 PF: > { %p15_p8 = scmp.ge.s32.totalorder %s5065_s20, 4   ;;  %s5832_s15 = smov %s5006_s16 }
 0x2f4   : > { %s5833_s16 = smov %s5010_s17  ;;  %s5834_s17 = smov %s5075_s23 }
 0x2f5   : > { %s5835_s18 = smov %s5065_s20  ;;  %17 = sbr.rel (!%p15_p8) target bundleno = 3 (0x3), region = 92 }
 0x2fc   :  { %4059 = vsyncpa [#allocation4], 1 }
 0x2fd   :  { %4061 = vsyncpa [#allocation4 + $0x1], 1 }

</bundles_post_ra>
